<compile_context>
chip_gen: v6e
topology: v6e:2x2x1
jax: 0.10.0
libtpu: 0.0.40
codegen_flags: <defaults>
</compile_context>

<pallas_src>
import functools

import jax
import jax.numpy as jnp
import numpy as np
from jax import lax
from jax.experimental import pallas as pl
from jax.experimental.pallas import tpu as pltpu


def _round_up(x, m):
    return ((x + m - 1) // m) * m


# ---------------------------------------------------------------------------
# Shared elementwise helpers (used by both the kernel and the pure-JAX
# reference so the two stay numerically comparable).
# ---------------------------------------------------------------------------
def _elu(v):
    # NOTE: the exp argument is clamped to <= 0 so the branch that the select
    # discards never produces inf; do not "simplify" this back to exp(v).
    return jnp.where(v > 0.0, v, jnp.exp(jnp.minimum(v, 0.0)) - 1.0)


def _softplus(v):
    # numerically-stable softplus
    return jnp.maximum(v, 0.0) + jnp.log1p(jnp.exp(-jnp.abs(v)))


def _sigmoid(v):
    # sigmoid(x) == 0.5*(tanh(x/2)+1): tanh runs on the EUP (a separate bundle
    # slot) and avoids the VALU divide of 1/(1+exp(-x)).
    return 0.5 * (jnp.tanh(0.5 * v) + 1.0)


# ---------------------------------------------------------------------------
# Kernel
# ---------------------------------------------------------------------------
def rssm_rollout_kernel(
    # --- per-time-block inputs: (TT, BB, F) ---
    obs_ref, act_ref, noise_ref,
    # --- initial state for this batch block: (BB, S), (BB, H) ---
    init_stoch_ref, init_deter_ref,
    # --- weights (bf16, pre-transposed (in, out)) & biases (f32) ---
    w_sa_s_ref, w_sa_a_ref, b_sa_ref,
    w_ih_ref, w_hh_ref, b_ih_ref, b_hh_ref,
    w_h1_ref, w_q1e_ref, b_h1_ref,
    w_heads_ref, b_heads_ref,
    # --- packed, lane-aligned outputs: (TT, BB, 2*SH) and (TT, BB, Hp+Sp) ---
    stats_out_ref, state_out_ref,
    # --- scratch: recurrent carries (persist across time blocks) ---
    stoch_c, deter_c,
    *, hidden_dim, stoch_dim, block_steps, stats_half, deter_pad, stoch_pad,
):
    H, S, TT = hidden_dim, stoch_dim, block_steps
    SH, Hp, Sp = stats_half, deter_pad, stoch_pad
    bf16 = jnp.bfloat16
    f32 = jnp.float32
    BB = init_stoch_ref.shape[0]

    # grid = (batch_blocks, time_blocks); time (axis 1) is innermost & serial.
    @pl.when(pl.program_id(1) == 0)
    def _():
        stoch_c[...] = init_stoch_ref[...]
        deter_c[...] = init_deter_ref[...]

    # Hoist weight loads out of the unrolled time loop.
    w_sa_s = w_sa_s_ref[...]
    w_sa_a = w_sa_a_ref[...]
    w_ih = w_ih_ref[...]
    w_hh = w_hh_ref[...]
    w_h1 = w_h1_ref[...]
    w_q1e = w_q1e_ref[...]
    w_heads = w_heads_ref[...]

    # Hoist bias broadcasts (JAX does not CSE broadcast_in_dim; with unroll=True
    # an in-loop (1,N)->(BB,N) broadcast would be re-emitted TT times).
    b_sa = jnp.broadcast_to(b_sa_ref[...], (BB, H))
    b_ih = jnp.broadcast_to(b_ih_ref[...], (BB, 3 * H))
    b_hh = jnp.broadcast_to(b_hh_ref[...], (BB, 3 * H))
    b_h1 = jnp.broadcast_to(b_h1_ref[...], (BB, 2 * H))
    b_heads = jnp.broadcast_to(b_heads_ref[...], (BB, 2 * SH))

    # Zero padding blocks for the lane-dense state-slab store (hoisted).
    zeros_hp = jnp.zeros((BB, Hp - H), f32) if Hp > H else None
    zeros_sp = jnp.zeros((BB, Sp - S), f32) if Sp > S else None

    def step(t, carry):
        stoch, deter = carry                 # (BB, S), (BB, H)  f32
        obs = obs_ref[t]                     # (BB, E)  bf16
        act = act_ref[t]                     # (BB, A)  bf16
        eps = noise_ref[t]                   # (BB, S)  f32

        # ---- state-action embedding: ELU([stoch, act] @ W_sa + b) ----------
        # (split-K matmul == concat along K; avoids an in-kernel lane concat)
        x = _elu(
            jnp.dot(stoch.astype(bf16), w_sa_s, preferred_element_type=f32)
            + jnp.dot(act, w_sa_a, preferred_element_type=f32)
            + b_sa)

        # ---- GRU cell (PyTorch nn.GRUCell semantics) ------------------------
        gi = jnp.dot(x.astype(bf16), w_ih, preferred_element_type=f32) + b_ih
        gh = jnp.dot(deter.astype(bf16), w_hh, preferred_element_type=f32) + b_hh
        r = _sigmoid(gi[:, 0:H] + gh[:, 0:H])
        z = _sigmoid(gi[:, H:2 * H] + gh[:, H:2 * H])
        n = jnp.tanh(gi[:, 2 * H:3 * H] + r * gh[:, 2 * H:3 * H])
        deter_new = (1.0 - z) * n + z * deter

        # ---- fused first layers of prior & posterior heads -------------------
        # h12 = ELU(deter @ [w_p1 | w_q1_det] + obs @ [0 | w_q1_obs] + [b_p1 | b_q1])
        #     = [hp | hq]   (lane-packed, no in-kernel concat needed)
        h12 = _elu(
            jnp.dot(deter_new.astype(bf16), w_h1, preferred_element_type=f32)
            + jnp.dot(obs, w_q1e, preferred_element_type=f32)
            + b_h1)

        # ---- fused second layers -> lane-aligned packed stats ----------------
        # columns: [prior_mean | post_mean | pad->SH | prior_std | post_std | pad->SH]
        raw = (jnp.dot(h12.astype(bf16), w_heads, preferred_element_type=f32)
               + b_heads)                                    # (BB, 2*SH)
        means = raw[:, 0:SH]
        stds = _softplus(raw[:, SH:]) + 0.1                  # softplus only on std half

        # ---- reparameterized sample of the stochastic state ------------------
        post_mean = means[:, S:2 * S]
        post_std = stds[:, S:2 * S]
        stoch_new = post_mean + post_std * eps

        # ---- lane-aligned output stores ---------------------------------------
        stats_out_ref[t, :, 0:SH] = means                    # full 128-multiple store
        stats_out_ref[t, :, SH:] = stds                      # aligned start, full width

        pieces = [deter_new]
        if zeros_hp is not None:
            pieces.append(zeros_hp)
        pieces.append(stoch_new)
        if zeros_sp is not None:
            pieces.append(zeros_sp)
        state_out_ref[t] = jnp.concatenate(pieces, axis=-1)  # one lane-dense store

        return stoch_new, deter_new

    stoch_f, deter_f = lax.fori_loop(
        0, TT, step, (stoch_c[...], deter_c[...]), unroll=True)
    stoch_c[...] = stoch_f
    deter_c[...] = deter_f


# ---------------------------------------------------------------------------
# Wrapper
# ---------------------------------------------------------------------------
def rssm_rollout(steps, obs_embed, prev_action, noise, prev_state, params,
                 *, block_steps=8, batch_block=None, single_buffer_weights=True):
    """Roll out the RSSM for `steps` time steps.

    obs_embed   : (T, B, E)  float32
    prev_action : (T, B, A)  float32
    noise       : (T, B, S)  float32   (reparameterization noise per step)
    prev_state  : (stoch (B, S), deter (B, H))
    params      : natural (unfused) parameter dict, see make_params().
    """
    T, B, E = obs_embed.shape
    A = prev_action.shape[-1]
    init_stoch, init_deter = prev_state
    S = init_stoch.shape[-1]
    H = init_deter.shape[-1]
    assert T == steps

    TT = min(block_steps, T)
    assert T % TT == 0, "steps must be divisible by block_steps"

    # Batch-block choice: prefer >=2 blocks (v7x megacore), BB a multiple of 8,
    # and keep BB near 128-256 so the MXU M dimension is filled at large B.
    if batch_block is None:
        BB = B
        if B % 2 == 0 and (B // 2) % 8 == 0:
            BB = B // 2
            while BB > 256 and B % (BB // 2) == 0 and (BB // 2) % 8 == 0:
                BB //= 2
    else:
        BB = batch_block
    assert B % BB == 0
    assert BB == B or BB % 8 == 0  # (8,128) sublane rule for partial batch blocks

    f32, bf16 = jnp.float32, jnp.bfloat16

    # Lane-aligned padded widths.
    SH = _round_up(2 * S, 128)       # width of each stats half (means / stds)
    Hp = _round_up(H, 128)           # deter slot in the state slab
    Sp = _round_up(S, 128)           # stoch slot in the state slab

    # ---- build the fused / bf16 weight layout the kernel expects -----------
    w_sa = params["w_sa"].astype(bf16)                 # (S+A, H)
    w_sa_s, w_sa_a = w_sa[:S], w_sa[S:]
    w_ih = params["w_ih"].astype(bf16)                 # (H, 3H)
    w_hh = params["w_hh"].astype(bf16)                 # (H, 3H)
    w_q1 = params["w_q1"]                              # (H+E, H)
    w_h1 = jnp.concatenate([params["w_p1"], w_q1[:H]], axis=1).astype(bf16)   # (H, 2H)
    w_q1e = jnp.concatenate([jnp.zeros((E, H), f32), w_q1[H:]],
                            axis=1).astype(bf16)                              # (E, 2H)
    b_h1 = jnp.concatenate([params["b_p1"], params["b_q1"]], axis=1)          # (1, 2H)

    # Fused head weights producing the padded stats slab directly:
    # cols [0:S]=prior_mean, [S:2S]=post_mean, [SH:SH+S]=prior_std, [SH+S:SH+2S]=post_std
    w_heads = jnp.zeros((2 * H, 2 * SH), f32)
    w_heads = w_heads.at[:H, 0:S].set(params["w_p2"][:, :S])
    w_heads = w_heads.at[H:, S:2 * S].set(params["w_q2"][:, :S])
    w_heads = w_heads.at[:H, SH:SH + S].set(params["w_p2"][:, S:])
    w_heads = w_heads.at[H:, SH + S:SH + 2 * S].set(params["w_q2"][:, S:])
    w_heads = w_heads.astype(bf16)                                            # (2H, 2*SH)
    b_heads = jnp.zeros((1, 2 * SH), f32)
    b_heads = b_heads.at[:, 0:S].set(params["b_p2"][:, :S])
    b_heads = b_heads.at[:, S:2 * S].set(params["b_q2"][:, :S])
    b_heads = b_heads.at[:, SH:SH + S].set(params["b_p2"][:, S:])
    b_heads = b_heads.at[:, SH + S:SH + 2 * S].set(params["b_q2"][:, S:])

    # bf16 step inputs (halves HBM traffic and step-buffer VMEM); kernel consumes
    # them directly at the dots. Noise stays f32 (pure elementwise use).
    obs_bf = obs_embed.astype(bf16)
    act_bf = prev_action.astype(bf16)

    def step_spec(feat):
        return pl.BlockSpec((TT, BB, feat), lambda b, t: (t, b, 0))

    def state_spec(feat):
        return pl.BlockSpec((BB, feat), lambda b, t: (b, 0))

    def weight_spec(shape):
        idx = lambda *_: (0,) * len(shape)
        if single_buffer_weights:
            try:
                # Grid-invariant weights: a single VMEM buffer is enough.
                return pl.BlockSpec(shape, idx, pipeline_mode=pl.Buffered(1))
            except (TypeError, AttributeError, ValueError):
                pass
        return pl.BlockSpec(shape, idx)

    in_specs = [
        step_spec(E),                       # obs_embed (bf16)
        step_spec(A),                       # prev_action (bf16)
        step_spec(S),                       # noise (f32)
        state_spec(S),                      # init_stoch
        state_spec(H),                      # init_deter
        weight_spec((S, H)),                # w_sa_s
        weight_spec((A, H)),                # w_sa_a
        weight_spec((1, H)),                # b_sa
        weight_spec((H, 3 * H)),            # w_ih
        weight_spec((H, 3 * H)),            # w_hh
        weight_spec((1, 3 * H)),            # b_ih
        weight_spec((1, 3 * H)),            # b_hh
        weight_spec((H, 2 * H)),            # w_h1  = [w_p1 | w_q1_deter]
        weight_spec((E, 2 * H)),            # w_q1e = [0    | w_q1_obs]
        weight_spec((1, 2 * H)),            # b_h1  = [b_p1 | b_q1]
        weight_spec((2 * H, 2 * SH)),       # w_heads (padded block-diag)
        weight_spec((1, 2 * SH)),           # b_heads
    ]

    out_shape = (
        jax.ShapeDtypeStruct((T, B, 2 * SH), f32),    # packed, padded stats
        jax.ShapeDtypeStruct((T, B, Hp + Sp), f32),   # packed, padded (deter, stoch)
    )
    out_specs = [step_spec(2 * SH), step_spec(Hp + Sp)]

    # ---- VMEM budget (weights single-buffered; step slabs double-buffered) ----
    est_bytes = (
        2 * TT * BB * (2 * E + 2 * A + 4 * S)                 # step inputs
        + 2 * TT * BB * 4 * (2 * SH + Hp + Sp)                # step outputs
        + 2 * ((S + A) * H + 6 * H * H + 2 * H * H + 2 * E * H + 2 * H * 2 * SH)
        + 4 * (H + 6 * H + 2 * H + 2 * SH)                    # f32 biases
        + 4 * BB * (S + H)                                    # carries
    )
    vmem_limit = int(min(max(2 * est_bytes, 32 * 1024 * 1024), 100 * 1024 * 1024))

    kernel = functools.partial(
        rssm_rollout_kernel, hidden_dim=H, stoch_dim=S, block_steps=TT,
        stats_half=SH, deter_pad=Hp, stoch_pad=Sp)

    call = pl.pallas_call(
        kernel,
        out_shape=out_shape,
        grid_spec=pltpu.PrefetchScalarGridSpec(
            num_scalar_prefetch=0,
            grid=(B // BB, T // TT),
            in_specs=in_specs,
            out_specs=out_specs,
            scratch_shapes=[
                pltpu.VMEM((BB, S), f32),   # stoch carry
                pltpu.VMEM((BB, H), f32),   # deter carry
            ],
        ),
        compiler_params=pltpu.CompilerParams(
            # batch blocks are independent (v7x megacore); time is serial.
            dimension_semantics=("parallel", "arbitrary"),
            vmem_limit_bytes=vmem_limit,
        ),
    )

    stats, state = call(
        obs_bf, act_bf, noise, init_stoch, init_deter,
        w_sa_s, w_sa_a, params["b_sa"],
        w_ih, w_hh, params["b_ih"], params["b_hh"],
        w_h1, w_q1e, b_h1, w_heads, b_heads,
    )

    prior_mean = stats[..., 0:S]
    post_mean = stats[..., S:2 * S]
    prior_std = stats[..., SH:SH + S]
    post_std = stats[..., SH + S:SH + 2 * S]
    deters = state[..., 0:H]
    stochs = state[..., Hp:Hp + S]
    return prior_mean, prior_std, post_mean, post_std, deters, stochs


# ---------------------------------------------------------------------------
# Pure-JAX reference (natural, unfused layer structure; bf16 MXU operands with
# f32 accumulation to mirror the kernel's precision).
# ---------------------------------------------------------------------------
def rssm_rollout_ref(obs_embed, prev_action, noise, prev_state, params):
    f32, bf16 = jnp.float32, jnp.bfloat16
    S = prev_state[0].shape[-1]
    H = prev_state[1].shape[-1]

    def dot(a, w):
        return jnp.dot(a.astype(bf16), w.astype(bf16), preferred_element_type=f32)

    def step(carry, inp):
        stoch, deter = carry
        obs, act, eps = inp
        x = _elu(dot(jnp.concatenate([stoch, act], -1), params["w_sa"]) + params["b_sa"])
        gi = dot(x, params["w_ih"]) + params["b_ih"]
        gh = dot(deter, params["w_hh"]) + params["b_hh"]
        r = _sigmoid(gi[:, 0:H] + gh[:, 0:H])
        z = _sigmoid(gi[:, H:2 * H] + gh[:, H:2 * H])
        n = jnp.tanh(gi[:, 2 * H:] + r * gh[:, 2 * H:])
        deter = (1.0 - z) * n + z * deter
        hp = _elu(dot(deter, params["w_p1"]) + params["b_p1"])
        hq = _elu(dot(jnp.concatenate([deter, obs], -1), params["w_q1"]) + params["b_q1"])
        ps = dot(hp, params["w_p2"]) + params["b_p2"]
        qs = dot(hq, params["w_q2"]) + params["b_q2"]
        prior_mean, prior_std = ps[:, :S], _softplus(ps[:, S:]) + 0.1
        post_mean, post_std = qs[:, :S], _softplus(qs[:, S:]) + 0.1
        stoch = post_mean + post_std * eps
        return (stoch, deter), (prior_mean, prior_std, post_mean, post_std, deter, stoch)

    (_, _), outs = lax.scan(step, prev_state, (obs_embed, prev_action, noise))
    return outs


# ---------------------------------------------------------------------------
# Deterministic parameter / input construction and smoke test
# ---------------------------------------------------------------------------
def make_params(key, E, A, S, H):
    def init(k, shape, fan_in):
        return jax.random.normal(k, shape, jnp.float32) / jnp.sqrt(float(fan_in))

    keys = jax.random.split(key, 16)
    return {
        "w_sa": init(keys[0], (S + A, H), S + A),
        "b_sa": 0.1 * jax.random.normal(keys[1], (1, H), jnp.float32),
        "w_ih": init(keys[2], (H, 3 * H), H),
        "w_hh": init(keys[3], (H, 3 * H), H),
        "b_ih": 0.1 * jax.random.normal(keys[4], (1, 3 * H), jnp.float32),
        "b_hh": 0.1 * jax.random.normal(keys[5], (1, 3 * H), jnp.float32),
        "w_p1": init(keys[6], (H, H), H),
        "b_p1": 0.1 * jax.random.normal(keys[7], (1, H), jnp.float32),
        "w_p2": init(keys[8], (H, 2 * S), H),
        "b_p2": 0.1 * jax.random.normal(keys[9], (1, 2 * S), jnp.float32),
        "w_q1": init(keys[10], (H + E, H), H + E),
        "b_q1": 0.1 * jax.random.normal(keys[11], (1, H), jnp.float32),
        "w_q2": init(keys[12], (H, 2 * S), H),
        "b_q2": 0.1 * jax.random.normal(keys[13], (1, 2 * S), jnp.float32),
    }


if __name__ == "__main__":
    # Small, module-consistent shapes:
    T, B = 8, 2          # steps, batch
    E, A = 32, 4         # obs-embedding dim, action dim
    H, S = 32, 8         # deterministic (GRU) dim, stochastic dim

    key = jax.random.PRNGKey(0)
    k_obs, k_act, k_noise, k_s0, k_d0, k_par = jax.random.split(key, 6)

    obs_embed = jax.random.normal(k_obs, (T, B, E), jnp.float32)
    prev_action = jax.random.normal(k_act, (T, B, A), jnp.float32)
    noise = jax.random.normal(k_noise, (T, B, S), jnp.float32)
    prev_state = (
        jax.random.normal(k_s0, (B, S), jnp.float32),
        jax.random.normal(k_d0, (B, H), jnp.float32),
    )
    params = make_params(k_par, E, A, S, H)

    outs = rssm_rollout(T, obs_embed, prev_action, noise, prev_state, params,
                        block_steps=8)
    outs = jax.block_until_ready(outs)
    prior_mean, prior_std, post_mean, post_std, deters, stochs = outs

    assert prior_mean.shape == (T, B, S)
    assert post_std.shape == (T, B, S)
    assert deters.shape == (T, B, H)
    assert stochs.shape == (T, B, S)
    assert bool(jnp.all(jnp.isfinite(deters)))
    assert bool(jnp.all(post_std > 0.1 - 1e-6))

    # Validate the fused/blocked kernel against an unfused pure-JAX reference.
    # bf16 matmul rounding compounds over the 8-step recurrence, so use a loose
    # tolerance; structural bugs would produce O(0.1..1) errors.
    refs = rssm_rollout_ref(obs_embed, prev_action, noise, prev_state, params)
    refs = jax.block_until_ready(refs)
    for got, want in zip(outs, refs):
        np.testing.assert_allclose(np.asarray(got), np.asarray(want),
                                   rtol=5e-2, atol=5e-2)

    print("KERNEL_OK")
</pallas_src>

<mosaic_0001>
module attributes {stable_mosaic.version = 11 : i64} {
  func.func @rssm_rollout_kernel(%arg0: i32, %arg1: i32, %arg2: memref<8x2x32xbf16, #tpu.memory_space<vmem>>, %arg3: memref<8x2x4xbf16, #tpu.memory_space<vmem>>, %arg4: memref<8x2x8xf32, #tpu.memory_space<vmem>>, %arg5: memref<2x8xf32, #tpu.memory_space<vmem>>, %arg6: memref<2x32xf32, #tpu.memory_space<vmem>>, %arg7: memref<8x32xbf16, #tpu.memory_space<vmem>>, %arg8: memref<4x32xbf16, #tpu.memory_space<vmem>>, %arg9: memref<1x32xf32, #tpu.memory_space<vmem>>, %arg10: memref<32x96xbf16, #tpu.memory_space<vmem>>, %arg11: memref<32x96xbf16, #tpu.memory_space<vmem>>, %arg12: memref<1x96xf32, #tpu.memory_space<vmem>>, %arg13: memref<1x96xf32, #tpu.memory_space<vmem>>, %arg14: memref<32x64xbf16, #tpu.memory_space<vmem>>, %arg15: memref<32x64xbf16, #tpu.memory_space<vmem>>, %arg16: memref<1x64xf32, #tpu.memory_space<vmem>>, %arg17: memref<64x256xbf16, #tpu.memory_space<vmem>>, %arg18: memref<1x256xf32, #tpu.memory_space<vmem>>, %arg19: memref<8x2x256xf32, #tpu.memory_space<vmem>>, %arg20: memref<8x2x256xf32, #tpu.memory_space<vmem>>, %arg21: memref<2x8xf32, #tpu.memory_space<vmem>>, %arg22: memref<2x32xf32, #tpu.memory_space<vmem>>) attributes {dimension_semantics = [#tpu.dimension_semantics<parallel>, #tpu.dimension_semantics<arbitrary>], iteration_bounds = array<i64: 1, 1>, scalar_prefetch = 0 : i64, scratch_operands = 2 : i64, tpu.core_type = #tpu.core_type<tc>, window_params = [{transform_indices = @transform_0, window_bounds = array<i64: 8, 2, 32>}, {transform_indices = @transform_1, window_bounds = array<i64: 8, 2, 4>}, {transform_indices = @transform_2, window_bounds = array<i64: 8, 2, 8>}, {transform_indices = @transform_3, window_bounds = array<i64: 2, 8>}, {transform_indices = @transform_4, window_bounds = array<i64: 2, 32>}, {pipeline_mode = #tpu.pipeline_mode<synchronous>, transform_indices = @transform_5, window_bounds = array<i64: 8, 32>}, {pipeline_mode = #tpu.pipeline_mode<synchronous>, transform_indices = @transform_6, window_bounds = array<i64: 4, 32>}, {pipeline_mode = #tpu.pipeline_mode<synchronous>, transform_indices = @transform_7, window_bounds = array<i64: 1, 32>}, {pipeline_mode = #tpu.pipeline_mode<synchronous>, transform_indices = @transform_8, window_bounds = array<i64: 32, 96>}, {pipeline_mode = #tpu.pipeline_mode<synchronous>, transform_indices = @transform_9, window_bounds = array<i64: 32, 96>}, {pipeline_mode = #tpu.pipeline_mode<synchronous>, transform_indices = @transform_10, window_bounds = array<i64: 1, 96>}, {pipeline_mode = #tpu.pipeline_mode<synchronous>, transform_indices = @transform_11, window_bounds = array<i64: 1, 96>}, {pipeline_mode = #tpu.pipeline_mode<synchronous>, transform_indices = @transform_12, window_bounds = array<i64: 32, 64>}, {pipeline_mode = #tpu.pipeline_mode<synchronous>, transform_indices = @transform_13, window_bounds = array<i64: 32, 64>}, {pipeline_mode = #tpu.pipeline_mode<synchronous>, transform_indices = @transform_14, window_bounds = array<i64: 1, 64>}, {pipeline_mode = #tpu.pipeline_mode<synchronous>, transform_indices = @transform_15, window_bounds = array<i64: 64, 256>}, {pipeline_mode = #tpu.pipeline_mode<synchronous>, transform_indices = @transform_16, window_bounds = array<i64: 1, 256>}, {transform_indices = @transform_17, window_bounds = array<i64: 8, 2, 256>}, {transform_indices = @transform_18, window_bounds = array<i64: 8, 2, 256>}]} {
    %c0_i32 = arith.constant 0 : i32
    %0 = arith.cmpi eq, %arg1, %c0_i32 : i32
    %1 = arith.extui %0 : i1 to i32
    %c0_i32_0 = arith.constant 0 : i32
    %2 = arith.cmpi ne, %1, %c0_i32_0 : i32
    scf.if %2 {
      %c0_313 = arith.constant 0 : index
      %c0_314 = arith.constant 0 : index
      %855 = vector.load %arg5[%c0_313, %c0_314] : memref<2x8xf32, #tpu.memory_space<vmem>>, vector<2x8xf32>
      %c0_315 = arith.constant 0 : index
      %c0_316 = arith.constant 0 : index
      %856 = vector.load %arg21[%c0_315, %c0_316] : memref<2x8xf32, #tpu.memory_space<vmem>>, vector<2x8xf32>
      tpu.vector_store %arg21[%c0_315, %c0_316], %855 {strides = array<i32>} : memref<2x8xf32, #tpu.memory_space<vmem>>, vector<2x8xf32>,
      %c0_317 = arith.constant 0 : index
      %c0_318 = arith.constant 0 : index
      %857 = vector.load %arg6[%c0_317, %c0_318] : memref<2x32xf32, #tpu.memory_space<vmem>>, vector<2x32xf32>
      %c0_319 = arith.constant 0 : index
      %c0_320 = arith.constant 0 : index
      %858 = vector.load %arg22[%c0_319, %c0_320] : memref<2x32xf32, #tpu.memory_space<vmem>>, vector<2x32xf32>
      tpu.vector_store %arg22[%c0_319, %c0_320], %857 {strides = array<i32>} : memref<2x32xf32, #tpu.memory_space<vmem>>, vector<2x32xf32>,
    } else {
    }
    %c0 = arith.constant 0 : index
    %c0_1 = arith.constant 0 : index
    %3 = vector.load %arg7[%c0, %c0_1] : memref<8x32xbf16, #tpu.memory_space<vmem>>, vector<8x32xbf16>
    %c0_2 = arith.constant 0 : index
    %c0_3 = arith.constant 0 : index
    %4 = vector.load %arg8[%c0_2, %c0_3] : memref<4x32xbf16, #tpu.memory_space<vmem>>, vector<4x32xbf16>
    %c0_4 = arith.constant 0 : index
    %c0_5 = arith.constant 0 : index
    %5 = vector.load %arg10[%c0_4, %c0_5] : memref<32x96xbf16, #tpu.memory_space<vmem>>, vector<32x96xbf16>
    %c0_6 = arith.constant 0 : index
    %c0_7 = arith.constant 0 : index
    %6 = vector.load %arg11[%c0_6, %c0_7] : memref<32x96xbf16, #tpu.memory_space<vmem>>, vector<32x96xbf16>
    %c0_8 = arith.constant 0 : index
    %c0_9 = arith.constant 0 : index
    %7 = vector.load %arg14[%c0_8, %c0_9] : memref<32x64xbf16, #tpu.memory_space<vmem>>, vector<32x64xbf16>
    %c0_10 = arith.constant 0 : index
    %c0_11 = arith.constant 0 : index
    %8 = vector.load %arg15[%c0_10, %c0_11] : memref<32x64xbf16, #tpu.memory_space<vmem>>, vector<32x64xbf16>
    %c0_12 = arith.constant 0 : index
    %c0_13 = arith.constant 0 : index
    %9 = vector.load %arg17[%c0_12, %c0_13] : memref<64x256xbf16, #tpu.memory_space<vmem>>, vector<64x256xbf16>
    %c0_14 = arith.constant 0 : index
    %c0_15 = arith.constant 0 : index
    %10 = vector.load %arg9[%c0_14, %c0_15] : memref<1x32xf32, #tpu.memory_space<vmem>>, vector<1x32xf32>
    %11 = vector.shape_cast %10 : vector<1x32xf32> to vector<1x32xf32>
    %12 = vector.broadcast %11 : vector<1x32xf32> to vector<2x32xf32>
    %c0_16 = arith.constant 0 : index
    %c0_17 = arith.constant 0 : index
    %13 = vector.load %arg12[%c0_16, %c0_17] : memref<1x96xf32, #tpu.memory_space<vmem>>, vector<1x96xf32>
    %14 = vector.shape_cast %13 : vector<1x96xf32> to vector<1x96xf32>
    %15 = vector.broadcast %14 : vector<1x96xf32> to vector<2x96xf32>
    %c0_18 = arith.constant 0 : index
    %c0_19 = arith.constant 0 : index
    %16 = vector.load %arg13[%c0_18, %c0_19] : memref<1x96xf32, #tpu.memory_space<vmem>>, vector<1x96xf32>
    %17 = vector.shape_cast %16 : vector<1x96xf32> to vector<1x96xf32>
    %18 = vector.broadcast %17 : vector<1x96xf32> to vector<2x96xf32>
    %c0_20 = arith.constant 0 : index
    %c0_21 = arith.constant 0 : index
    %19 = vector.load %arg16[%c0_20, %c0_21] : memref<1x64xf32, #tpu.memory_space<vmem>>, vector<1x64xf32>
    %20 = vector.shape_cast %19 : vector<1x64xf32> to vector<1x64xf32>
    %21 = vector.broadcast %20 : vector<1x64xf32> to vector<2x64xf32>
    %c0_22 = arith.constant 0 : index
    %c0_23 = arith.constant 0 : index
    %22 = vector.load %arg18[%c0_22, %c0_23] : memref<1x256xf32, #tpu.memory_space<vmem>>, vector<1x256xf32>
    %23 = vector.shape_cast %22 : vector<1x256xf32> to vector<1x256xf32>
    %24 = vector.broadcast %23 : vector<1x256xf32> to vector<2x256xf32>
    %cst = arith.constant 0.000000e+00 : f32
    %25 = vector.broadcast %cst : f32 to vector<2x96xf32>
    %cst_24 = arith.constant 0.000000e+00 : f32
    %26 = vector.broadcast %cst_24 : f32 to vector<2x120xf32>
    %c0_25 = arith.constant 0 : index
    %c0_26 = arith.constant 0 : index
    %27 = vector.load %arg21[%c0_25, %c0_26] : memref<2x8xf32, #tpu.memory_space<vmem>>, vector<2x8xf32>
    %c0_27 = arith.constant 0 : index
    %c0_28 = arith.constant 0 : index
    %28 = vector.load %arg22[%c0_27, %c0_28] : memref<2x32xf32, #tpu.memory_space<vmem>>, vector<2x32xf32>
    %c0_i32_29 = arith.constant 0 : i32
    %29 = arith.index_cast %c0_i32_29 : i32 to index
    %c0_30 = arith.constant 0 : index
    %c0_31 = arith.constant 0 : index
    %30 = vector.load %arg2[%29, %c0_30, %c0_31] : memref<8x2x32xbf16, #tpu.memory_space<vmem>>, vector<1x2x32xbf16>
    %31 = vector.shape_cast %30 : vector<1x2x32xbf16> to vector<2x32xbf16>
    %32 = arith.index_cast %c0_i32_29 : i32 to index
    %c0_32 = arith.constant 0 : index
    %c0_33 = arith.constant 0 : index
    %33 = vector.load %arg3[%32, %c0_32, %c0_33] : memref<8x2x4xbf16, #tpu.memory_space<vmem>>, vector<1x2x4xbf16>
    %34 = vector.shape_cast %33 : vector<1x2x4xbf16> to vector<2x4xbf16>
    %35 = arith.index_cast %c0_i32_29 : i32 to index
    %c0_34 = arith.constant 0 : index
    %c0_35 = arith.constant 0 : index
    %36 = vector.load %arg4[%35, %c0_34, %c0_35] : memref<8x2x8xf32, #tpu.memory_space<vmem>>, vector<1x2x8xf32>
    %37 = vector.shape_cast %36 : vector<1x2x8xf32> to vector<2x8xf32>
    %38 = arith.truncf %27 : vector<2x8xf32> to vector<2x8xbf16>
    %cst_36 = arith.constant dense<0.000000e+00> : vector<2x32xf32>
    %39 = tpu.matmul %38, %3, %cst_36 {dimension_numbers = #tpu.dot_dimension_numbers<[1], [0], [0], [1], [0, 0, 1, 1], [], []>} : vector<2x8xbf16>, vector<8x32xbf16>, vector<2x32xf32> -> vector<2x32xf32>
    %cst_37 = arith.constant dense<0.000000e+00> : vector<2x32xf32>
    %40 = tpu.matmul %34, %4, %cst_37 {dimension_numbers = #tpu.dot_dimension_numbers<[1], [0], [0], [1], [0, 0, 1, 1], [], []>} : vector<2x4xbf16>, vector<4x32xbf16>, vector<2x32xf32> -> vector<2x32xf32>
    %41 = arith.addf %39, %40 : vector<2x32xf32>
    %42 = arith.addf %41, %12 : vector<2x32xf32>
    %cst_38 = arith.constant 0.000000e+00 : f32
    %43 = vector.broadcast %cst_38 : f32 to vector<2x32xf32>
    %44 = arith.cmpf ogt, %42, %43 : vector<2x32xf32>
    %cst_39 = arith.constant 0.000000e+00 : f32
    %45 = vector.broadcast %cst_39 : f32 to vector<2x32xf32>
    %46 = arith.minimumf %42, %45 : vector<2x32xf32>
    %47 = math.exp %46 : vector<2x32xf32>
    %cst_40 = arith.constant 1.000000e+00 : f32
    %48 = vector.broadcast %cst_40 : f32 to vector<2x32xf32>
    %49 = arith.subf %47, %48 : vector<2x32xf32>
    %50 = arith.select %44, %42, %49 : vector<2x32xi1>, vector<2x32xf32>
    %51 = arith.truncf %50 : vector<2x32xf32> to vector<2x32xbf16>
    %cst_41 = arith.constant dense<0.000000e+00> : vector<2x96xf32>
    %52 = tpu.matmul %51, %5, %cst_41 {dimension_numbers = #tpu.dot_dimension_numbers<[1], [0], [0], [1], [0, 0, 1, 1], [], []>} : vector<2x32xbf16>, vector<32x96xbf16>, vector<2x96xf32> -> vector<2x96xf32>
    %53 = arith.addf %52, %15 : vector<2x96xf32>
    %54 = arith.truncf %28 : vector<2x32xf32> to vector<2x32xbf16>
    %cst_42 = arith.constant dense<0.000000e+00> : vector<2x96xf32>
    %55 = tpu.matmul %54, %6, %cst_42 {dimension_numbers = #tpu.dot_dimension_numbers<[1], [0], [0], [1], [0, 0, 1, 1], [], []>} : vector<2x32xbf16>, vector<32x96xbf16>, vector<2x96xf32> -> vector<2x96xf32>
    %56 = arith.addf %55, %18 : vector<2x96xf32>
    %57 = vector.extract_strided_slice %53 {offsets = [0, 0], sizes = [2, 32], strides = [1, 1]} : vector<2x96xf32> to vector<2x32xf32>
    %58 = vector.extract_strided_slice %56 {offsets = [0, 0], sizes = [2, 32], strides = [1, 1]} : vector<2x96xf32> to vector<2x32xf32>
    %59 = arith.addf %57, %58 : vector<2x32xf32>
    %cst_43 = arith.constant 5.000000e-01 : f32
    %60 = vector.broadcast %cst_43 : f32 to vector<2x32xf32>
    %61 = arith.mulf %60, %59 : vector<2x32xf32>
    %62 = math.tanh %61 : vector<2x32xf32>
    %cst_44 = arith.constant 1.000000e+00 : f32
    %63 = vector.broadcast %cst_44 : f32 to vector<2x32xf32>
    %64 = arith.addf %62, %63 : vector<2x32xf32>
    %cst_45 = arith.constant 5.000000e-01 : f32
    %65 = vector.broadcast %cst_45 : f32 to vector<2x32xf32>
    %66 = arith.mulf %65, %64 : vector<2x32xf32>
    %67 = vector.extract_strided_slice %53 {offsets = [0, 32], sizes = [2, 32], strides = [1, 1]} : vector<2x96xf32> to vector<2x32xf32>
    %68 = vector.extract_strided_slice %56 {offsets = [0, 32], sizes = [2, 32], strides = [1, 1]} : vector<2x96xf32> to vector<2x32xf32>
    %69 = arith.addf %67, %68 : vector<2x32xf32>
    %cst_46 = arith.constant 5.000000e-01 : f32
    %70 = vector.broadcast %cst_46 : f32 to vector<2x32xf32>
    %71 = arith.mulf %70, %69 : vector<2x32xf32>
    %72 = math.tanh %71 : vector<2x32xf32>
    %cst_47 = arith.constant 1.000000e+00 : f32
    %73 = vector.broadcast %cst_47 : f32 to vector<2x32xf32>
    %74 = arith.addf %72, %73 : vector<2x32xf32>
    %cst_48 = arith.constant 5.000000e-01 : f32
    %75 = vector.broadcast %cst_48 : f32 to vector<2x32xf32>
    %76 = arith.mulf %75, %74 : vector<2x32xf32>
    %77 = vector.extract_strided_slice %53 {offsets = [0, 64], sizes = [2, 32], strides = [1, 1]} : vector<2x96xf32> to vector<2x32xf32>
    %78 = vector.extract_strided_slice %56 {offsets = [0, 64], sizes = [2, 32], strides = [1, 1]} : vector<2x96xf32> to vector<2x32xf32>
    %79 = arith.mulf %66, %78 : vector<2x32xf32>
    %80 = arith.addf %77, %79 : vector<2x32xf32>
    %81 = math.tanh %80 : vector<2x32xf32>
    %cst_49 = arith.constant 1.000000e+00 : f32
    %82 = vector.broadcast %cst_49 : f32 to vector<2x32xf32>
    %83 = arith.subf %82, %76 : vector<2x32xf32>
    %84 = arith.mulf %83, %81 : vector<2x32xf32>
    %85 = arith.mulf %76, %28 : vector<2x32xf32>
    %86 = arith.addf %84, %85 : vector<2x32xf32>
    %87 = arith.truncf %86 : vector<2x32xf32> to vector<2x32xbf16>
    %cst_50 = arith.constant dense<0.000000e+00> : vector<2x64xf32>
    %88 = tpu.matmul %87, %7, %cst_50 {dimension_numbers = #tpu.dot_dimension_numbers<[1], [0], [0], [1], [0, 0, 1, 1], [], []>} : vector<2x32xbf16>, vector<32x64xbf16>, vector<2x64xf32> -> vector<2x64xf32>
    %cst_51 = arith.constant dense<0.000000e+00> : vector<2x64xf32>
    %89 = tpu.matmul %31, %8, %cst_51 {dimension_numbers = #tpu.dot_dimension_numbers<[1], [0], [0], [1], [0, 0, 1, 1], [], []>} : vector<2x32xbf16>, vector<32x64xbf16>, vector<2x64xf32> -> vector<2x64xf32>
    %90 = arith.addf %88, %89 : vector<2x64xf32>
    %91 = arith.addf %90, %21 : vector<2x64xf32>
    %cst_52 = arith.constant 0.000000e+00 : f32
    %92 = vector.broadcast %cst_52 : f32 to vector<2x64xf32>
    %93 = arith.cmpf ogt, %91, %92 : vector<2x64xf32>
    %cst_53 = arith.constant 0.000000e+00 : f32
    %94 = vector.broadcast %cst_53 : f32 to vector<2x64xf32>
    %95 = arith.minimumf %91, %94 : vector<2x64xf32>
    %96 = math.exp %95 : vector<2x64xf32>
    %cst_54 = arith.constant 1.000000e+00 : f32
    %97 = vector.broadcast %cst_54 : f32 to vector<2x64xf32>
    %98 = arith.subf %96, %97 : vector<2x64xf32>
    %99 = arith.select %93, %91, %98 : vector<2x64xi1>, vector<2x64xf32>
    %100 = arith.truncf %99 : vector<2x64xf32> to vector<2x64xbf16>
    %cst_55 = arith.constant dense<0.000000e+00> : vector<2x256xf32>
    %101 = tpu.matmul %100, %9, %cst_55 {dimension_numbers = #tpu.dot_dimension_numbers<[1], [0], [0], [1], [0, 0, 1, 1], [], []>} : vector<2x64xbf16>, vector<64x256xbf16>, vector<2x256xf32> -> vector<2x256xf32>
    %102 = arith.addf %101, %24 : vector<2x256xf32>
    %103 = vector.extract_strided_slice %102 {offsets = [0, 0], sizes = [2, 128], strides = [1, 1]} : vector<2x256xf32> to vector<2x128xf32>
    %104 = vector.extract_strided_slice %102 {offsets = [0, 128], sizes = [2, 128], strides = [1, 1]} : vector<2x256xf32> to vector<2x128xf32>
    %cst_56 = arith.constant 0.000000e+00 : f32
    %105 = vector.broadcast %cst_56 : f32 to vector<2x128xf32>
    %106 = arith.maximumf %104, %105 : vector<2x128xf32>
    %107 = math.absf %104 : vector<2x128xf32>
    %cst_57 = arith.constant 0.000000e+00 : f32
    %108 = vector.broadcast %cst_57 : f32 to vector<2x128xf32>
    %109 = arith.subf %108, %107 : vector<2x128xf32>
    %110 = math.exp %109 : vector<2x128xf32>
    %111 = math.log1p %110 : vector<2x128xf32>
    %112 = arith.addf %106, %111 : vector<2x128xf32>
    %cst_58 = arith.constant 1.000000e-01 : f32
    %113 = vector.broadcast %cst_58 : f32 to vector<2x128xf32>
    %114 = arith.addf %112, %113 : vector<2x128xf32>
    %115 = vector.extract_strided_slice %103 {offsets = [0, 8], sizes = [2, 8], strides = [1, 1]} : vector<2x128xf32> to vector<2x8xf32>
    %116 = vector.extract_strided_slice %114 {offsets = [0, 8], sizes = [2, 8], strides = [1, 1]} : vector<2x128xf32> to vector<2x8xf32>
    %117 = arith.mulf %116, %37 : vector<2x8xf32>
    %118 = arith.addf %115, %117 : vector<2x8xf32>
    %119 = arith.index_cast %c0_i32_29 : i32 to index
    %c0_59 = arith.constant 0 : index
    %c0_60 = arith.constant 0 : index
    %120 = vector.load %arg19[%119, %c0_59, %c0_60] : memref<8x2x256xf32, #tpu.memory_space<vmem>>, vector<1x2x128xf32>
    %121 = vector.shape_cast %120 : vector<1x2x128xf32> to vector<2x128xf32>
    %122 = vector.shape_cast %103 : vector<2x128xf32> to vector<1x2x128xf32>
    tpu.vector_store %arg19[%119, %c0_59, %c0_60], %122 {strides = array<i32>} : memref<8x2x256xf32, #tpu.memory_space<vmem>>, vector<1x2x128xf32>,
    %123 = arith.index_cast %c0_i32_29 : i32 to index
    %c0_61 = arith.constant 0 : index
    %c128 = arith.constant 128 : index
    %124 = vector.load %arg19[%123, %c0_61, %c128] : memref<8x2x256xf32, #tpu.memory_space<vmem>>, vector<1x2x128xf32>
    %125 = vector.shape_cast %124 : vector<1x2x128xf32> to vector<2x128xf32>
    %126 = vector.shape_cast %114 : vector<2x128xf32> to vector<1x2x128xf32>
    tpu.vector_store %arg19[%123, %c0_61, %c128], %126 {strides = array<i32>} : memref<8x2x256xf32, #tpu.memory_space<vmem>>, vector<1x2x128xf32>,
    %127 = tpu.concatenate %86, %25, %118, %26 in 1 : vector<2x32xf32>, vector<2x96xf32>, vector<2x8xf32>, vector<2x120xf32> -> vector<2x256xf32>
    %128 = arith.index_cast %c0_i32_29 : i32 to index
    %c0_62 = arith.constant 0 : index
    %c0_63 = arith.constant 0 : index
    %129 = vector.load %arg20[%128, %c0_62, %c0_63] : memref<8x2x256xf32, #tpu.memory_space<vmem>>, vector<1x2x256xf32>
    %130 = vector.shape_cast %129 : vector<1x2x256xf32> to vector<2x256xf32>
    %131 = vector.shape_cast %127 : vector<2x256xf32> to vector<1x2x256xf32>
    tpu.vector_store %arg20[%128, %c0_62, %c0_63], %131 {strides = array<i32>} : memref<8x2x256xf32, #tpu.memory_space<vmem>>, vector<1x2x256xf32>,
    %c1_i32 = arith.constant 1 : i32
    %132 = arith.index_cast %c1_i32 : i32 to index
    %c0_64 = arith.constant 0 : index
    %c0_65 = arith.constant 0 : index
    %133 = vector.load %arg2[%132, %c0_64, %c0_65] : memref<8x2x32xbf16, #tpu.memory_space<vmem>>, vector<1x2x32xbf16>
    %134 = vector.shape_cast %133 : vector<1x2x32xbf16> to vector<2x32xbf16>
    %135 = arith.index_cast %c1_i32 : i32 to index
    %c0_66 = arith.constant 0 : index
    %c0_67 = arith.constant 0 : index
    %136 = vector.load %arg3[%135, %c0_66, %c0_67] : memref<8x2x4xbf16, #tpu.memory_space<vmem>>, vector<1x2x4xbf16>
    %137 = vector.shape_cast %136 : vector<1x2x4xbf16> to vector<2x4xbf16>
    %138 = arith.index_cast %c1_i32 : i32 to index
    %c0_68 = arith.constant 0 : index
    %c0_69 = arith.constant 0 : index
    %139 = vector.load %arg4[%138, %c0_68, %c0_69] : memref<8x2x8xf32, #tpu.memory_space<vmem>>, vector<1x2x8xf32>
    %140 = vector.shape_cast %139 : vector<1x2x8xf32> to vector<2x8xf32>
    %141 = arith.truncf %118 : vector<2x8xf32> to vector<2x8xbf16>
    %cst_70 = arith.constant dense<0.000000e+00> : vector<2x32xf32>
    %142 = tpu.matmul %141, %3, %cst_70 {dimension_numbers = #tpu.dot_dimension_numbers<[1], [0], [0], [1], [0, 0, 1, 1], [], []>} : vector<2x8xbf16>, vector<8x32xbf16>, vector<2x32xf32> -> vector<2x32xf32>
    %cst_71 = arith.constant dense<0.000000e+00> : vector<2x32xf32>
    %143 = tpu.matmul %137, %4, %cst_71 {dimension_numbers = #tpu.dot_dimension_numbers<[1], [0], [0], [1], [0, 0, 1, 1], [], []>} : vector<2x4xbf16>, vector<4x32xbf16>, vector<2x32xf32> -> vector<2x32xf32>
    %144 = arith.addf %142, %143 : vector<2x32xf32>
    %145 = arith.addf %144, %12 : vector<2x32xf32>
    %cst_72 = arith.constant 0.000000e+00 : f32
    %146 = vector.broadcast %cst_72 : f32 to vector<2x32xf32>
    %147 = arith.cmpf ogt, %145, %146 : vector<2x32xf32>
    %cst_73 = arith.constant 0.000000e+00 : f32
    %148 = vector.broadcast %cst_73 : f32 to vector<2x32xf32>
    %149 = arith.minimumf %145, %148 : vector<2x32xf32>
    %150 = math.exp %149 : vector<2x32xf32>
    %cst_74 = arith.constant 1.000000e+00 : f32
    %151 = vector.broadcast %cst_74 : f32 to vector<2x32xf32>
    %152 = arith.subf %150, %151 : vector<2x32xf32>
    %153 = arith.select %147, %145, %152 : vector<2x32xi1>, vector<2x32xf32>
    %154 = arith.truncf %153 : vector<2x32xf32> to vector<2x32xbf16>
    %cst_75 = arith.constant dense<0.000000e+00> : vector<2x96xf32>
    %155 = tpu.matmul %154, %5, %cst_75 {dimension_numbers = #tpu.dot_dimension_numbers<[1], [0], [0], [1], [0, 0, 1, 1], [], []>} : vector<2x32xbf16>, vector<32x96xbf16>, vector<2x96xf32> -> vector<2x96xf32>
    %156 = arith.addf %155, %15 : vector<2x96xf32>
    %157 = arith.truncf %86 : vector<2x32xf32> to vector<2x32xbf16>
    %cst_76 = arith.constant dense<0.000000e+00> : vector<2x96xf32>
    %158 = tpu.matmul %157, %6, %cst_76 {dimension_numbers = #tpu.dot_dimension_numbers<[1], [0], [0], [1], [0, 0, 1, 1], [], []>} : vector<2x32xbf16>, vector<32x96xbf16>, vector<2x96xf32> -> vector<2x96xf32>
    %159 = arith.addf %158, %18 : vector<2x96xf32>
    %160 = vector.extract_strided_slice %156 {offsets = [0, 0], sizes = [2, 32], strides = [1, 1]} : vector<2x96xf32> to vector<2x32xf32>
    %161 = vector.extract_strided_slice %159 {offsets = [0, 0], sizes = [2, 32], strides = [1, 1]} : vector<2x96xf32> to vector<2x32xf32>
    %162 = arith.addf %160, %161 : vector<2x32xf32>
    %cst_77 = arith.constant 5.000000e-01 : f32
    %163 = vector.broadcast %cst_77 : f32 to vector<2x32xf32>
    %164 = arith.mulf %163, %162 : vector<2x32xf32>
    %165 = math.tanh %164 : vector<2x32xf32>
    %cst_78 = arith.constant 1.000000e+00 : f32
    %166 = vector.broadcast %cst_78 : f32 to vector<2x32xf32>
    %167 = arith.addf %165, %166 : vector<2x32xf32>
    %cst_79 = arith.constant 5.000000e-01 : f32
    %168 = vector.broadcast %cst_79 : f32 to vector<2x32xf32>
    %169 = arith.mulf %168, %167 : vector<2x32xf32>
    %170 = vector.extract_strided_slice %156 {offsets = [0, 32], sizes = [2, 32], strides = [1, 1]} : vector<2x96xf32> to vector<2x32xf32>
    %171 = vector.extract_strided_slice %159 {offsets = [0, 32], sizes = [2, 32], strides = [1, 1]} : vector<2x96xf32> to vector<2x32xf32>
    %172 = arith.addf %170, %171 : vector<2x32xf32>
    %cst_80 = arith.constant 5.000000e-01 : f32
    %173 = vector.broadcast %cst_80 : f32 to vector<2x32xf32>
    %174 = arith.mulf %173, %172 : vector<2x32xf32>
    %175 = math.tanh %174 : vector<2x32xf32>
    %cst_81 = arith.constant 1.000000e+00 : f32
    %176 = vector.broadcast %cst_81 : f32 to vector<2x32xf32>
    %177 = arith.addf %175, %176 : vector<2x32xf32>
    %cst_82 = arith.constant 5.000000e-01 : f32
    %178 = vector.broadcast %cst_82 : f32 to vector<2x32xf32>
    %179 = arith.mulf %178, %177 : vector<2x32xf32>
    %180 = vector.extract_strided_slice %156 {offsets = [0, 64], sizes = [2, 32], strides = [1, 1]} : vector<2x96xf32> to vector<2x32xf32>
    %181 = vector.extract_strided_slice %159 {offsets = [0, 64], sizes = [2, 32], strides = [1, 1]} : vector<2x96xf32> to vector<2x32xf32>
    %182 = arith.mulf %169, %181 : vector<2x32xf32>
    %183 = arith.addf %180, %182 : vector<2x32xf32>
    %184 = math.tanh %183 : vector<2x32xf32>
    %cst_83 = arith.constant 1.000000e+00 : f32
    %185 = vector.broadcast %cst_83 : f32 to vector<2x32xf32>
    %186 = arith.subf %185, %179 : vector<2x32xf32>
    %187 = arith.mulf %186, %184 : vector<2x32xf32>
    %188 = arith.mulf %179, %86 : vector<2x32xf32>
    %189 = arith.addf %187, %188 : vector<2x32xf32>
    %190 = arith.truncf %189 : vector<2x32xf32> to vector<2x32xbf16>
    %cst_84 = arith.constant dense<0.000000e+00> : vector<2x64xf32>
    %191 = tpu.matmul %190, %7, %cst_84 {dimension_numbers = #tpu.dot_dimension_numbers<[1], [0], [0], [1], [0, 0, 1, 1], [], []>} : vector<2x32xbf16>, vector<32x64xbf16>, vector<2x64xf32> -> vector<2x64xf32>
    %cst_85 = arith.constant dense<0.000000e+00> : vector<2x64xf32>
    %192 = tpu.matmul %134, %8, %cst_85 {dimension_numbers = #tpu.dot_dimension_numbers<[1], [0], [0], [1], [0, 0, 1, 1], [], []>} : vector<2x32xbf16>, vector<32x64xbf16>, vector<2x64xf32> -> vector<2x64xf32>
    %193 = arith.addf %191, %192 : vector<2x64xf32>
    %194 = arith.addf %193, %21 : vector<2x64xf32>
    %cst_86 = arith.constant 0.000000e+00 : f32
    %195 = vector.broadcast %cst_86 : f32 to vector<2x64xf32>
    %196 = arith.cmpf ogt, %194, %195 : vector<2x64xf32>
    %cst_87 = arith.constant 0.000000e+00 : f32
    %197 = vector.broadcast %cst_87 : f32 to vector<2x64xf32>
    %198 = arith.minimumf %194, %197 : vector<2x64xf32>
    %199 = math.exp %198 : vector<2x64xf32>
    %cst_88 = arith.constant 1.000000e+00 : f32
    %200 = vector.broadcast %cst_88 : f32 to vector<2x64xf32>
    %201 = arith.subf %199, %200 : vector<2x64xf32>
    %202 = arith.select %196, %194, %201 : vector<2x64xi1>, vector<2x64xf32>
    %203 = arith.truncf %202 : vector<2x64xf32> to vector<2x64xbf16>
    %cst_89 = arith.constant dense<0.000000e+00> : vector<2x256xf32>
    %204 = tpu.matmul %203, %9, %cst_89 {dimension_numbers = #tpu.dot_dimension_numbers<[1], [0], [0], [1], [0, 0, 1, 1], [], []>} : vector<2x64xbf16>, vector<64x256xbf16>, vector<2x256xf32> -> vector<2x256xf32>
    %205 = arith.addf %204, %24 : vector<2x256xf32>
    %206 = vector.extract_strided_slice %205 {offsets = [0, 0], sizes = [2, 128], strides = [1, 1]} : vector<2x256xf32> to vector<2x128xf32>
    %207 = vector.extract_strided_slice %205 {offsets = [0, 128], sizes = [2, 128], strides = [1, 1]} : vector<2x256xf32> to vector<2x128xf32>
    %cst_90 = arith.constant 0.000000e+00 : f32
    %208 = vector.broadcast %cst_90 : f32 to vector<2x128xf32>
    %209 = arith.maximumf %207, %208 : vector<2x128xf32>
    %210 = math.absf %207 : vector<2x128xf32>
    %cst_91 = arith.constant 0.000000e+00 : f32
    %211 = vector.broadcast %cst_91 : f32 to vector<2x128xf32>
    %212 = arith.subf %211, %210 : vector<2x128xf32>
    %213 = math.exp %212 : vector<2x128xf32>
    %214 = math.log1p %213 : vector<2x128xf32>
    %215 = arith.addf %209, %214 : vector<2x128xf32>
    %cst_92 = arith.constant 1.000000e-01 : f32
    %216 = vector.broadcast %cst_92 : f32 to vector<2x128xf32>
    %217 = arith.addf %215, %216 : vector<2x128xf32>
    %218 = vector.extract_strided_slice %206 {offsets = [0, 8], sizes = [2, 8], strides = [1, 1]} : vector<2x128xf32> to vector<2x8xf32>
    %219 = vector.extract_strided_slice %217 {offsets = [0, 8], sizes = [2, 8], strides = [1, 1]} : vector<2x128xf32> to vector<2x8xf32>
    %220 = arith.mulf %219, %140 : vector<2x8xf32>
    %221 = arith.addf %218, %220 : vector<2x8xf32>
    %222 = arith.index_cast %c1_i32 : i32 to index
    %c0_93 = arith.constant 0 : index
    %c0_94 = arith.constant 0 : index
    %223 = vector.load %arg19[%222, %c0_93, %c0_94] : memref<8x2x256xf32, #tpu.memory_space<vmem>>, vector<1x2x128xf32>
    %224 = vector.shape_cast %223 : vector<1x2x128xf32> to vector<2x128xf32>
    %225 = vector.shape_cast %206 : vector<2x128xf32> to vector<1x2x128xf32>
    tpu.vector_store %arg19[%222, %c0_93, %c0_94], %225 {strides = array<i32>} : memref<8x2x256xf32, #tpu.memory_space<vmem>>, vector<1x2x128xf32>,
    %226 = arith.index_cast %c1_i32 : i32 to index
    %c0_95 = arith.constant 0 : index
    %c128_96 = arith.constant 128 : index
    %227 = vector.load %arg19[%226, %c0_95, %c128_96] : memref<8x2x256xf32, #tpu.memory_space<vmem>>, vector<1x2x128xf32>
    %228 = vector.shape_cast %227 : vector<1x2x128xf32> to vector<2x128xf32>
    %229 = vector.shape_cast %217 : vector<2x128xf32> to vector<1x2x128xf32>
    tpu.vector_store %arg19[%226, %c0_95, %c128_96], %229 {strides = array<i32>} : memref<8x2x256xf32, #tpu.memory_space<vmem>>, vector<1x2x128xf32>,
    %230 = tpu.concatenate %189, %25, %221, %26 in 1 : vector<2x32xf32>, vector<2x96xf32>, vector<2x8xf32>, vector<2x120xf32> -> vector<2x256xf32>
    %231 = arith.index_cast %c1_i32 : i32 to index
    %c0_97 = arith.constant 0 : index
    %c0_98 = arith.constant 0 : index
    %232 = vector.load %arg20[%231, %c0_97, %c0_98] : memref<8x2x256xf32, #tpu.memory_space<vmem>>, vector<1x2x256xf32>
    %233 = vector.shape_cast %232 : vector<1x2x256xf32> to vector<2x256xf32>
    %234 = vector.shape_cast %230 : vector<2x256xf32> to vector<1x2x256xf32>
    tpu.vector_store %arg20[%231, %c0_97, %c0_98], %234 {strides = array<i32>} : memref<8x2x256xf32, #tpu.memory_space<vmem>>, vector<1x2x256xf32>,
    %c2_i32 = arith.constant 2 : i32
    %235 = arith.index_cast %c2_i32 : i32 to index
    %c0_99 = arith.constant 0 : index
    %c0_100 = arith.constant 0 : index
    %236 = vector.load %arg2[%235, %c0_99, %c0_100] : memref<8x2x32xbf16, #tpu.memory_space<vmem>>, vector<1x2x32xbf16>
    %237 = vector.shape_cast %236 : vector<1x2x32xbf16> to vector<2x32xbf16>
    %238 = arith.index_cast %c2_i32 : i32 to index
    %c0_101 = arith.constant 0 : index
    %c0_102 = arith.constant 0 : index
    %239 = vector.load %arg3[%238, %c0_101, %c0_102] : memref<8x2x4xbf16, #tpu.memory_space<vmem>>, vector<1x2x4xbf16>
    %240 = vector.shape_cast %239 : vector<1x2x4xbf16> to vector<2x4xbf16>
    %241 = arith.index_cast %c2_i32 : i32 to index
    %c0_103 = arith.constant 0 : index
    %c0_104 = arith.constant 0 : index
    %242 = vector.load %arg4[%241, %c0_103, %c0_104] : memref<8x2x8xf32, #tpu.memory_space<vmem>>, vector<1x2x8xf32>
    %243 = vector.shape_cast %242 : vector<1x2x8xf32> to vector<2x8xf32>
    %244 = arith.truncf %221 : vector<2x8xf32> to vector<2x8xbf16>
    %cst_105 = arith.constant dense<0.000000e+00> : vector<2x32xf32>
    %245 = tpu.matmul %244, %3, %cst_105 {dimension_numbers = #tpu.dot_dimension_numbers<[1], [0], [0], [1], [0, 0, 1, 1], [], []>} : vector<2x8xbf16>, vector<8x32xbf16>, vector<2x32xf32> -> vector<2x32xf32>
    %cst_106 = arith.constant dense<0.000000e+00> : vector<2x32xf32>
    %246 = tpu.matmul %240, %4, %cst_106 {dimension_numbers = #tpu.dot_dimension_numbers<[1], [0], [0], [1], [0, 0, 1, 1], [], []>} : vector<2x4xbf16>, vector<4x32xbf16>, vector<2x32xf32> -> vector<2x32xf32>
    %247 = arith.addf %245, %246 : vector<2x32xf32>
    %248 = arith.addf %247, %12 : vector<2x32xf32>
    %cst_107 = arith.constant 0.000000e+00 : f32
    %249 = vector.broadcast %cst_107 : f32 to vector<2x32xf32>
    %250 = arith.cmpf ogt, %248, %249 : vector<2x32xf32>
    %cst_108 = arith.constant 0.000000e+00 : f32
    %251 = vector.broadcast %cst_108 : f32 to vector<2x32xf32>
    %252 = arith.minimumf %248, %251 : vector<2x32xf32>
    %253 = math.exp %252 : vector<2x32xf32>
    %cst_109 = arith.constant 1.000000e+00 : f32
    %254 = vector.broadcast %cst_109 : f32 to vector<2x32xf32>
    %255 = arith.subf %253, %254 : vector<2x32xf32>
    %256 = arith.select %250, %248, %255 : vector<2x32xi1>, vector<2x32xf32>
    %257 = arith.truncf %256 : vector<2x32xf32> to vector<2x32xbf16>
    %cst_110 = arith.constant dense<0.000000e+00> : vector<2x96xf32>
    %258 = tpu.matmul %257, %5, %cst_110 {dimension_numbers = #tpu.dot_dimension_numbers<[1], [0], [0], [1], [0, 0, 1, 1], [], []>} : vector<2x32xbf16>, vector<32x96xbf16>, vector<2x96xf32> -> vector<2x96xf32>
    %259 = arith.addf %258, %15 : vector<2x96xf32>
    %260 = arith.truncf %189 : vector<2x32xf32> to vector<2x32xbf16>
    %cst_111 = arith.constant dense<0.000000e+00> : vector<2x96xf32>
    %261 = tpu.matmul %260, %6, %cst_111 {dimension_numbers = #tpu.dot_dimension_numbers<[1], [0], [0], [1], [0, 0, 1, 1], [], []>} : vector<2x32xbf16>, vector<32x96xbf16>, vector<2x96xf32> -> vector<2x96xf32>
    %262 = arith.addf %261, %18 : vector<2x96xf32>
    %263 = vector.extract_strided_slice %259 {offsets = [0, 0], sizes = [2, 32], strides = [1, 1]} : vector<2x96xf32> to vector<2x32xf32>
    %264 = vector.extract_strided_slice %262 {offsets = [0, 0], sizes = [2, 32], strides = [1, 1]} : vector<2x96xf32> to vector<2x32xf32>
    %265 = arith.addf %263, %264 : vector<2x32xf32>
    %cst_112 = arith.constant 5.000000e-01 : f32
    %266 = vector.broadcast %cst_112 : f32 to vector<2x32xf32>
    %267 = arith.mulf %266, %265 : vector<2x32xf32>
    %268 = math.tanh %267 : vector<2x32xf32>
    %cst_113 = arith.constant 1.000000e+00 : f32
    %269 = vector.broadcast %cst_113 : f32 to vector<2x32xf32>
    %270 = arith.addf %268, %269 : vector<2x32xf32>
    %cst_114 = arith.constant 5.000000e-01 : f32
    %271 = vector.broadcast %cst_114 : f32 to vector<2x32xf32>
    %272 = arith.mulf %271, %270 : vector<2x32xf32>
    %273 = vector.extract_strided_slice %259 {offsets = [0, 32], sizes = [2, 32], strides = [1, 1]} : vector<2x96xf32> to vector<2x32xf32>
    %274 = vector.extract_strided_slice %262 {offsets = [0, 32], sizes = [2, 32], strides = [1, 1]} : vector<2x96xf32> to vector<2x32xf32>
    %275 = arith.addf %273, %274 : vector<2x32xf32>
    %cst_115 = arith.constant 5.000000e-01 : f32
    %276 = vector.broadcast %cst_115 : f32 to vector<2x32xf32>
    %277 = arith.mulf %276, %275 : vector<2x32xf32>
    %278 = math.tanh %277 : vector<2x32xf32>
    %cst_116 = arith.constant 1.000000e+00 : f32
    %279 = vector.broadcast %cst_116 : f32 to vector<2x32xf32>
    %280 = arith.addf %278, %279 : vector<2x32xf32>
    %cst_117 = arith.constant 5.000000e-01 : f32
    %281 = vector.broadcast %cst_117 : f32 to vector<2x32xf32>
    %282 = arith.mulf %281, %280 : vector<2x32xf32>
    %283 = vector.extract_strided_slice %259 {offsets = [0, 64], sizes = [2, 32], strides = [1, 1]} : vector<2x96xf32> to vector<2x32xf32>
    %284 = vector.extract_strided_slice %262 {offsets = [0, 64], sizes = [2, 32], strides = [1, 1]} : vector<2x96xf32> to vector<2x32xf32>
    %285 = arith.mulf %272, %284 : vector<2x32xf32>
    %286 = arith.addf %283, %285 : vector<2x32xf32>
    %287 = math.tanh %286 : vector<2x32xf32>
    %cst_118 = arith.constant 1.000000e+00 : f32
    %288 = vector.broadcast %cst_118 : f32 to vector<2x32xf32>
    %289 = arith.subf %288, %282 : vector<2x32xf32>
    %290 = arith.mulf %289, %287 : vector<2x32xf32>
    %291 = arith.mulf %282, %189 : vector<2x32xf32>
    %292 = arith.addf %290, %291 : vector<2x32xf32>
    %293 = arith.truncf %292 : vector<2x32xf32> to vector<2x32xbf16>
    %cst_119 = arith.constant dense<0.000000e+00> : vector<2x64xf32>
    %294 = tpu.matmul %293, %7, %cst_119 {dimension_numbers = #tpu.dot_dimension_numbers<[1], [0], [0], [1], [0, 0, 1, 1], [], []>} : vector<2x32xbf16>, vector<32x64xbf16>, vector<2x64xf32> -> vector<2x64xf32>
    %cst_120 = arith.constant dense<0.000000e+00> : vector<2x64xf32>
    %295 = tpu.matmul %237, %8, %cst_120 {dimension_numbers = #tpu.dot_dimension_numbers<[1], [0], [0], [1], [0, 0, 1, 1], [], []>} : vector<2x32xbf16>, vector<32x64xbf16>, vector<2x64xf32> -> vector<2x64xf32>
    %296 = arith.addf %294, %295 : vector<2x64xf32>
    %297 = arith.addf %296, %21 : vector<2x64xf32>
    %cst_121 = arith.constant 0.000000e+00 : f32
    %298 = vector.broadcast %cst_121 : f32 to vector<2x64xf32>
    %299 = arith.cmpf ogt, %297, %298 : vector<2x64xf32>
    %cst_122 = arith.constant 0.000000e+00 : f32
    %300 = vector.broadcast %cst_122 : f32 to vector<2x64xf32>
    %301 = arith.minimumf %297, %300 : vector<2x64xf32>
    %302 = math.exp %301 : vector<2x64xf32>
    %cst_123 = arith.constant 1.000000e+00 : f32
    %303 = vector.broadcast %cst_123 : f32 to vector<2x64xf32>
    %304 = arith.subf %302, %303 : vector<2x64xf32>
    %305 = arith.select %299, %297, %304 : vector<2x64xi1>, vector<2x64xf32>
    %306 = arith.truncf %305 : vector<2x64xf32> to vector<2x64xbf16>
    %cst_124 = arith.constant dense<0.000000e+00> : vector<2x256xf32>
    %307 = tpu.matmul %306, %9, %cst_124 {dimension_numbers = #tpu.dot_dimension_numbers<[1], [0], [0], [1], [0, 0, 1, 1], [], []>} : vector<2x64xbf16>, vector<64x256xbf16>, vector<2x256xf32> -> vector<2x256xf32>
    %308 = arith.addf %307, %24 : vector<2x256xf32>
    %309 = vector.extract_strided_slice %308 {offsets = [0, 0], sizes = [2, 128], strides = [1, 1]} : vector<2x256xf32> to vector<2x128xf32>
    %310 = vector.extract_strided_slice %308 {offsets = [0, 128], sizes = [2, 128], strides = [1, 1]} : vector<2x256xf32> to vector<2x128xf32>
    %cst_125 = arith.constant 0.000000e+00 : f32
    %311 = vector.broadcast %cst_125 : f32 to vector<2x128xf32>
    %312 = arith.maximumf %310, %311 : vector<2x128xf32>
    %313 = math.absf %310 : vector<2x128xf32>
    %cst_126 = arith.constant 0.000000e+00 : f32
    %314 = vector.broadcast %cst_126 : f32 to vector<2x128xf32>
    %315 = arith.subf %314, %313 : vector<2x128xf32>
    %316 = math.exp %315 : vector<2x128xf32>
    %317 = math.log1p %316 : vector<2x128xf32>
    %318 = arith.addf %312, %317 : vector<2x128xf32>
    %cst_127 = arith.constant 1.000000e-01 : f32
    %319 = vector.broadcast %cst_127 : f32 to vector<2x128xf32>
    %320 = arith.addf %318, %319 : vector<2x128xf32>
    %321 = vector.extract_strided_slice %309 {offsets = [0, 8], sizes = [2, 8], strides = [1, 1]} : vector<2x128xf32> to vector<2x8xf32>
    %322 = vector.extract_strided_slice %320 {offsets = [0, 8], sizes = [2, 8], strides = [1, 1]} : vector<2x128xf32> to vector<2x8xf32>
    %323 = arith.mulf %322, %243 : vector<2x8xf32>
    %324 = arith.addf %321, %323 : vector<2x8xf32>
    %325 = arith.index_cast %c2_i32 : i32 to index
    %c0_128 = arith.constant 0 : index
    %c0_129 = arith.constant 0 : index
    %326 = vector.load %arg19[%325, %c0_128, %c0_129] : memref<8x2x256xf32, #tpu.memory_space<vmem>>, vector<1x2x128xf32>
    %327 = vector.shape_cast %326 : vector<1x2x128xf32> to vector<2x128xf32>
    %328 = vector.shape_cast %309 : vector<2x128xf32> to vector<1x2x128xf32>
    tpu.vector_store %arg19[%325, %c0_128, %c0_129], %328 {strides = array<i32>} : memref<8x2x256xf32, #tpu.memory_space<vmem>>, vector<1x2x128xf32>,
    %329 = arith.index_cast %c2_i32 : i32 to index
    %c0_130 = arith.constant 0 : index
    %c128_131 = arith.constant 128 : index
    %330 = vector.load %arg19[%329, %c0_130, %c128_131] : memref<8x2x256xf32, #tpu.memory_space<vmem>>, vector<1x2x128xf32>
    %331 = vector.shape_cast %330 : vector<1x2x128xf32> to vector<2x128xf32>
    %332 = vector.shape_cast %320 : vector<2x128xf32> to vector<1x2x128xf32>
    tpu.vector_store %arg19[%329, %c0_130, %c128_131], %332 {strides = array<i32>} : memref<8x2x256xf32, #tpu.memory_space<vmem>>, vector<1x2x128xf32>,
    %333 = tpu.concatenate %292, %25, %324, %26 in 1 : vector<2x32xf32>, vector<2x96xf32>, vector<2x8xf32>, vector<2x120xf32> -> vector<2x256xf32>
    %334 = arith.index_cast %c2_i32 : i32 to index
    %c0_132 = arith.constant 0 : index
    %c0_133 = arith.constant 0 : index
    %335 = vector.load %arg20[%334, %c0_132, %c0_133] : memref<8x2x256xf32, #tpu.memory_space<vmem>>, vector<1x2x256xf32>
    %336 = vector.shape_cast %335 : vector<1x2x256xf32> to vector<2x256xf32>
    %337 = vector.shape_cast %333 : vector<2x256xf32> to vector<1x2x256xf32>
    tpu.vector_store %arg20[%334, %c0_132, %c0_133], %337 {strides = array<i32>} : memref<8x2x256xf32, #tpu.memory_space<vmem>>, vector<1x2x256xf32>,
    %c3_i32 = arith.constant 3 : i32
    %338 = arith.index_cast %c3_i32 : i32 to index
    %c0_134 = arith.constant 0 : index
    %c0_135 = arith.constant 0 : index
    %339 = vector.load %arg2[%338, %c0_134, %c0_135] : memref<8x2x32xbf16, #tpu.memory_space<vmem>>, vector<1x2x32xbf16>
    %340 = vector.shape_cast %339 : vector<1x2x32xbf16> to vector<2x32xbf16>
    %341 = arith.index_cast %c3_i32 : i32 to index
    %c0_136 = arith.constant 0 : index
    %c0_137 = arith.constant 0 : index
    %342 = vector.load %arg3[%341, %c0_136, %c0_137] : memref<8x2x4xbf16, #tpu.memory_space<vmem>>, vector<1x2x4xbf16>
    %343 = vector.shape_cast %342 : vector<1x2x4xbf16> to vector<2x4xbf16>
    %344 = arith.index_cast %c3_i32 : i32 to index
    %c0_138 = arith.constant 0 : index
    %c0_139 = arith.constant 0 : index
    %345 = vector.load %arg4[%344, %c0_138, %c0_139] : memref<8x2x8xf32, #tpu.memory_space<vmem>>, vector<1x2x8xf32>
    %346 = vector.shape_cast %345 : vector<1x2x8xf32> to vector<2x8xf32>
    %347 = arith.truncf %324 : vector<2x8xf32> to vector<2x8xbf16>
    %cst_140 = arith.constant dense<0.000000e+00> : vector<2x32xf32>
    %348 = tpu.matmul %347, %3, %cst_140 {dimension_numbers = #tpu.dot_dimension_numbers<[1], [0], [0], [1], [0, 0, 1, 1], [], []>} : vector<2x8xbf16>, vector<8x32xbf16>, vector<2x32xf32> -> vector<2x32xf32>
    %cst_141 = arith.constant dense<0.000000e+00> : vector<2x32xf32>
    %349 = tpu.matmul %343, %4, %cst_141 {dimension_numbers = #tpu.dot_dimension_numbers<[1], [0], [0], [1], [0, 0, 1, 1], [], []>} : vector<2x4xbf16>, vector<4x32xbf16>, vector<2x32xf32> -> vector<2x32xf32>
    %350 = arith.addf %348, %349 : vector<2x32xf32>
    %351 = arith.addf %350, %12 : vector<2x32xf32>
    %cst_142 = arith.constant 0.000000e+00 : f32
    %352 = vector.broadcast %cst_142 : f32 to vector<2x32xf32>
    %353 = arith.cmpf ogt, %351, %352 : vector<2x32xf32>
    %cst_143 = arith.constant 0.000000e+00 : f32
    %354 = vector.broadcast %cst_143 : f32 to vector<2x32xf32>
    %355 = arith.minimumf %351, %354 : vector<2x32xf32>
    %356 = math.exp %355 : vector<2x32xf32>
    %cst_144 = arith.constant 1.000000e+00 : f32
    %357 = vector.broadcast %cst_144 : f32 to vector<2x32xf32>
    %358 = arith.subf %356, %357 : vector<2x32xf32>
    %359 = arith.select %353, %351, %358 : vector<2x32xi1>, vector<2x32xf32>
    %360 = arith.truncf %359 : vector<2x32xf32> to vector<2x32xbf16>
    %cst_145 = arith.constant dense<0.000000e+00> : vector<2x96xf32>
    %361 = tpu.matmul %360, %5, %cst_145 {dimension_numbers = #tpu.dot_dimension_numbers<[1], [0], [0], [1], [0, 0, 1, 1], [], []>} : vector<2x32xbf16>, vector<32x96xbf16>, vector<2x96xf32> -> vector<2x96xf32>
    %362 = arith.addf %361, %15 : vector<2x96xf32>
    %363 = arith.truncf %292 : vector<2x32xf32> to vector<2x32xbf16>
    %cst_146 = arith.constant dense<0.000000e+00> : vector<2x96xf32>
    %364 = tpu.matmul %363, %6, %cst_146 {dimension_numbers = #tpu.dot_dimension_numbers<[1], [0], [0], [1], [0, 0, 1, 1], [], []>} : vector<2x32xbf16>, vector<32x96xbf16>, vector<2x96xf32> -> vector<2x96xf32>
    %365 = arith.addf %364, %18 : vector<2x96xf32>
    %366 = vector.extract_strided_slice %362 {offsets = [0, 0], sizes = [2, 32], strides = [1, 1]} : vector<2x96xf32> to vector<2x32xf32>
    %367 = vector.extract_strided_slice %365 {offsets = [0, 0], sizes = [2, 32], strides = [1, 1]} : vector<2x96xf32> to vector<2x32xf32>
    %368 = arith.addf %366, %367 : vector<2x32xf32>
    %cst_147 = arith.constant 5.000000e-01 : f32
    %369 = vector.broadcast %cst_147 : f32 to vector<2x32xf32>
    %370 = arith.mulf %369, %368 : vector<2x32xf32>
    %371 = math.tanh %370 : vector<2x32xf32>
    %cst_148 = arith.constant 1.000000e+00 : f32
    %372 = vector.broadcast %cst_148 : f32 to vector<2x32xf32>
    %373 = arith.addf %371, %372 : vector<2x32xf32>
    %cst_149 = arith.constant 5.000000e-01 : f32
    %374 = vector.broadcast %cst_149 : f32 to vector<2x32xf32>
    %375 = arith.mulf %374, %373 : vector<2x32xf32>
    %376 = vector.extract_strided_slice %362 {offsets = [0, 32], sizes = [2, 32], strides = [1, 1]} : vector<2x96xf32> to vector<2x32xf32>
    %377 = vector.extract_strided_slice %365 {offsets = [0, 32], sizes = [2, 32], strides = [1, 1]} : vector<2x96xf32> to vector<2x32xf32>
    %378 = arith.addf %376, %377 : vector<2x32xf32>
    %cst_150 = arith.constant 5.000000e-01 : f32
    %379 = vector.broadcast %cst_150 : f32 to vector<2x32xf32>
    %380 = arith.mulf %379, %378 : vector<2x32xf32>
    %381 = math.tanh %380 : vector<2x32xf32>
    %cst_151 = arith.constant 1.000000e+00 : f32
    %382 = vector.broadcast %cst_151 : f32 to vector<2x32xf32>
    %383 = arith.addf %381, %382 : vector<2x32xf32>
    %cst_152 = arith.constant 5.000000e-01 : f32
    %384 = vector.broadcast %cst_152 : f32 to vector<2x32xf32>
    %385 = arith.mulf %384, %383 : vector<2x32xf32>
    %386 = vector.extract_strided_slice %362 {offsets = [0, 64], sizes = [2, 32], strides = [1, 1]} : vector<2x96xf32> to vector<2x32xf32>
    %387 = vector.extract_strided_slice %365 {offsets = [0, 64], sizes = [2, 32], strides = [1, 1]} : vector<2x96xf32> to vector<2x32xf32>
    %388 = arith.mulf %375, %387 : vector<2x32xf32>
    %389 = arith.addf %386, %388 : vector<2x32xf32>
    %390 = math.tanh %389 : vector<2x32xf32>
    %cst_153 = arith.constant 1.000000e+00 : f32
    %391 = vector.broadcast %cst_153 : f32 to vector<2x32xf32>
    %392 = arith.subf %391, %385 : vector<2x32xf32>
    %393 = arith.mulf %392, %390 : vector<2x32xf32>
    %394 = arith.mulf %385, %292 : vector<2x32xf32>
    %395 = arith.addf %393, %394 : vector<2x32xf32>
    %396 = arith.truncf %395 : vector<2x32xf32> to vector<2x32xbf16>
    %cst_154 = arith.constant dense<0.000000e+00> : vector<2x64xf32>
    %397 = tpu.matmul %396, %7, %cst_154 {dimension_numbers = #tpu.dot_dimension_numbers<[1], [0], [0], [1], [0, 0, 1, 1], [], []>} : vector<2x32xbf16>, vector<32x64xbf16>, vector<2x64xf32> -> vector<2x64xf32>
    %cst_155 = arith.constant dense<0.000000e+00> : vector<2x64xf32>
    %398 = tpu.matmul %340, %8, %cst_155 {dimension_numbers = #tpu.dot_dimension_numbers<[1], [0], [0], [1], [0, 0, 1, 1], [], []>} : vector<2x32xbf16>, vector<32x64xbf16>, vector<2x64xf32> -> vector<2x64xf32>
    %399 = arith.addf %397, %398 : vector<2x64xf32>
    %400 = arith.addf %399, %21 : vector<2x64xf32>
    %cst_156 = arith.constant 0.000000e+00 : f32
    %401 = vector.broadcast %cst_156 : f32 to vector<2x64xf32>
    %402 = arith.cmpf ogt, %400, %401 : vector<2x64xf32>
    %cst_157 = arith.constant 0.000000e+00 : f32
    %403 = vector.broadcast %cst_157 : f32 to vector<2x64xf32>
    %404 = arith.minimumf %400, %403 : vector<2x64xf32>
    %405 = math.exp %404 : vector<2x64xf32>
    %cst_158 = arith.constant 1.000000e+00 : f32
    %406 = vector.broadcast %cst_158 : f32 to vector<2x64xf32>
    %407 = arith.subf %405, %406 : vector<2x64xf32>
    %408 = arith.select %402, %400, %407 : vector<2x64xi1>, vector<2x64xf32>
    %409 = arith.truncf %408 : vector<2x64xf32> to vector<2x64xbf16>
    %cst_159 = arith.constant dense<0.000000e+00> : vector<2x256xf32>
    %410 = tpu.matmul %409, %9, %cst_159 {dimension_numbers = #tpu.dot_dimension_numbers<[1], [0], [0], [1], [0, 0, 1, 1], [], []>} : vector<2x64xbf16>, vector<64x256xbf16>, vector<2x256xf32> -> vector<2x256xf32>
    %411 = arith.addf %410, %24 : vector<2x256xf32>
    %412 = vector.extract_strided_slice %411 {offsets = [0, 0], sizes = [2, 128], strides = [1, 1]} : vector<2x256xf32> to vector<2x128xf32>
    %413 = vector.extract_strided_slice %411 {offsets = [0, 128], sizes = [2, 128], strides = [1, 1]} : vector<2x256xf32> to vector<2x128xf32>
    %cst_160 = arith.constant 0.000000e+00 : f32
    %414 = vector.broadcast %cst_160 : f32 to vector<2x128xf32>
    %415 = arith.maximumf %413, %414 : vector<2x128xf32>
    %416 = math.absf %413 : vector<2x128xf32>
    %cst_161 = arith.constant 0.000000e+00 : f32
    %417 = vector.broadcast %cst_161 : f32 to vector<2x128xf32>
    %418 = arith.subf %417, %416 : vector<2x128xf32>
    %419 = math.exp %418 : vector<2x128xf32>
    %420 = math.log1p %419 : vector<2x128xf32>
    %421 = arith.addf %415, %420 : vector<2x128xf32>
    %cst_162 = arith.constant 1.000000e-01 : f32
    %422 = vector.broadcast %cst_162 : f32 to vector<2x128xf32>
    %423 = arith.addf %421, %422 : vector<2x128xf32>
    %424 = vector.extract_strided_slice %412 {offsets = [0, 8], sizes = [2, 8], strides = [1, 1]} : vector<2x128xf32> to vector<2x8xf32>
    %425 = vector.extract_strided_slice %423 {offsets = [0, 8], sizes = [2, 8], strides = [1, 1]} : vector<2x128xf32> to vector<2x8xf32>
    %426 = arith.mulf %425, %346 : vector<2x8xf32>
    %427 = arith.addf %424, %426 : vector<2x8xf32>
    %428 = arith.index_cast %c3_i32 : i32 to index
    %c0_163 = arith.constant 0 : index
    %c0_164 = arith.constant 0 : index
    %429 = vector.load %arg19[%428, %c0_163, %c0_164] : memref<8x2x256xf32, #tpu.memory_space<vmem>>, vector<1x2x128xf32>
    %430 = vector.shape_cast %429 : vector<1x2x128xf32> to vector<2x128xf32>
    %431 = vector.shape_cast %412 : vector<2x128xf32> to vector<1x2x128xf32>
    tpu.vector_store %arg19[%428, %c0_163, %c0_164], %431 {strides = array<i32>} : memref<8x2x256xf32, #tpu.memory_space<vmem>>, vector<1x2x128xf32>,
    %432 = arith.index_cast %c3_i32 : i32 to index
    %c0_165 = arith.constant 0 : index
    %c128_166 = arith.constant 128 : index
    %433 = vector.load %arg19[%432, %c0_165, %c128_166] : memref<8x2x256xf32, #tpu.memory_space<vmem>>, vector<1x2x128xf32>
    %434 = vector.shape_cast %433 : vector<1x2x128xf32> to vector<2x128xf32>
    %435 = vector.shape_cast %423 : vector<2x128xf32> to vector<1x2x128xf32>
    tpu.vector_store %arg19[%432, %c0_165, %c128_166], %435 {strides = array<i32>} : memref<8x2x256xf32, #tpu.memory_space<vmem>>, vector<1x2x128xf32>,
    %436 = tpu.concatenate %395, %25, %427, %26 in 1 : vector<2x32xf32>, vector<2x96xf32>, vector<2x8xf32>, vector<2x120xf32> -> vector<2x256xf32>
    %437 = arith.index_cast %c3_i32 : i32 to index
    %c0_167 = arith.constant 0 : index
    %c0_168 = arith.constant 0 : index
    %438 = vector.load %arg20[%437, %c0_167, %c0_168] : memref<8x2x256xf32, #tpu.memory_space<vmem>>, vector<1x2x256xf32>
    %439 = vector.shape_cast %438 : vector<1x2x256xf32> to vector<2x256xf32>
    %440 = vector.shape_cast %436 : vector<2x256xf32> to vector<1x2x256xf32>
    tpu.vector_store %arg20[%437, %c0_167, %c0_168], %440 {strides = array<i32>} : memref<8x2x256xf32, #tpu.memory_space<vmem>>, vector<1x2x256xf32>,
    %c4_i32 = arith.constant 4 : i32
    %441 = arith.index_cast %c4_i32 : i32 to index
    %c0_169 = arith.constant 0 : index
    %c0_170 = arith.constant 0 : index
    %442 = vector.load %arg2[%441, %c0_169, %c0_170] : memref<8x2x32xbf16, #tpu.memory_space<vmem>>, vector<1x2x32xbf16>
    %443 = vector.shape_cast %442 : vector<1x2x32xbf16> to vector<2x32xbf16>
    %444 = arith.index_cast %c4_i32 : i32 to index
    %c0_171 = arith.constant 0 : index
    %c0_172 = arith.constant 0 : index
    %445 = vector.load %arg3[%444, %c0_171, %c0_172] : memref<8x2x4xbf16, #tpu.memory_space<vmem>>, vector<1x2x4xbf16>
    %446 = vector.shape_cast %445 : vector<1x2x4xbf16> to vector<2x4xbf16>
    %447 = arith.index_cast %c4_i32 : i32 to index
    %c0_173 = arith.constant 0 : index
    %c0_174 = arith.constant 0 : index
    %448 = vector.load %arg4[%447, %c0_173, %c0_174] : memref<8x2x8xf32, #tpu.memory_space<vmem>>, vector<1x2x8xf32>
    %449 = vector.shape_cast %448 : vector<1x2x8xf32> to vector<2x8xf32>
    %450 = arith.truncf %427 : vector<2x8xf32> to vector<2x8xbf16>
    %cst_175 = arith.constant dense<0.000000e+00> : vector<2x32xf32>
    %451 = tpu.matmul %450, %3, %cst_175 {dimension_numbers = #tpu.dot_dimension_numbers<[1], [0], [0], [1], [0, 0, 1, 1], [], []>} : vector<2x8xbf16>, vector<8x32xbf16>, vector<2x32xf32> -> vector<2x32xf32>
    %cst_176 = arith.constant dense<0.000000e+00> : vector<2x32xf32>
    %452 = tpu.matmul %446, %4, %cst_176 {dimension_numbers = #tpu.dot_dimension_numbers<[1], [0], [0], [1], [0, 0, 1, 1], [], []>} : vector<2x4xbf16>, vector<4x32xbf16>, vector<2x32xf32> -> vector<2x32xf32>
    %453 = arith.addf %451, %452 : vector<2x32xf32>
    %454 = arith.addf %453, %12 : vector<2x32xf32>
    %cst_177 = arith.constant 0.000000e+00 : f32
    %455 = vector.broadcast %cst_177 : f32 to vector<2x32xf32>
    %456 = arith.cmpf ogt, %454, %455 : vector<2x32xf32>
    %cst_178 = arith.constant 0.000000e+00 : f32
    %457 = vector.broadcast %cst_178 : f32 to vector<2x32xf32>
    %458 = arith.minimumf %454, %457 : vector<2x32xf32>
    %459 = math.exp %458 : vector<2x32xf32>
    %cst_179 = arith.constant 1.000000e+00 : f32
    %460 = vector.broadcast %cst_179 : f32 to vector<2x32xf32>
    %461 = arith.subf %459, %460 : vector<2x32xf32>
    %462 = arith.select %456, %454, %461 : vector<2x32xi1>, vector<2x32xf32>
    %463 = arith.truncf %462 : vector<2x32xf32> to vector<2x32xbf16>
    %cst_180 = arith.constant dense<0.000000e+00> : vector<2x96xf32>
    %464 = tpu.matmul %463, %5, %cst_180 {dimension_numbers = #tpu.dot_dimension_numbers<[1], [0], [0], [1], [0, 0, 1, 1], [], []>} : vector<2x32xbf16>, vector<32x96xbf16>, vector<2x96xf32> -> vector<2x96xf32>
    %465 = arith.addf %464, %15 : vector<2x96xf32>
    %466 = arith.truncf %395 : vector<2x32xf32> to vector<2x32xbf16>
    %cst_181 = arith.constant dense<0.000000e+00> : vector<2x96xf32>
    %467 = tpu.matmul %466, %6, %cst_181 {dimension_numbers = #tpu.dot_dimension_numbers<[1], [0], [0], [1], [0, 0, 1, 1], [], []>} : vector<2x32xbf16>, vector<32x96xbf16>, vector<2x96xf32> -> vector<2x96xf32>
    %468 = arith.addf %467, %18 : vector<2x96xf32>
    %469 = vector.extract_strided_slice %465 {offsets = [0, 0], sizes = [2, 32], strides = [1, 1]} : vector<2x96xf32> to vector<2x32xf32>
    %470 = vector.extract_strided_slice %468 {offsets = [0, 0], sizes = [2, 32], strides = [1, 1]} : vector<2x96xf32> to vector<2x32xf32>
    %471 = arith.addf %469, %470 : vector<2x32xf32>
    %cst_182 = arith.constant 5.000000e-01 : f32
    %472 = vector.broadcast %cst_182 : f32 to vector<2x32xf32>
    %473 = arith.mulf %472, %471 : vector<2x32xf32>
    %474 = math.tanh %473 : vector<2x32xf32>
    %cst_183 = arith.constant 1.000000e+00 : f32
    %475 = vector.broadcast %cst_183 : f32 to vector<2x32xf32>
    %476 = arith.addf %474, %475 : vector<2x32xf32>
    %cst_184 = arith.constant 5.000000e-01 : f32
    %477 = vector.broadcast %cst_184 : f32 to vector<2x32xf32>
    %478 = arith.mulf %477, %476 : vector<2x32xf32>
    %479 = vector.extract_strided_slice %465 {offsets = [0, 32], sizes = [2, 32], strides = [1, 1]} : vector<2x96xf32> to vector<2x32xf32>
    %480 = vector.extract_strided_slice %468 {offsets = [0, 32], sizes = [2, 32], strides = [1, 1]} : vector<2x96xf32> to vector<2x32xf32>
    %481 = arith.addf %479, %480 : vector<2x32xf32>
    %cst_185 = arith.constant 5.000000e-01 : f32
    %482 = vector.broadcast %cst_185 : f32 to vector<2x32xf32>
    %483 = arith.mulf %482, %481 : vector<2x32xf32>
    %484 = math.tanh %483 : vector<2x32xf32>
    %cst_186 = arith.constant 1.000000e+00 : f32
    %485 = vector.broadcast %cst_186 : f32 to vector<2x32xf32>
    %486 = arith.addf %484, %485 : vector<2x32xf32>
    %cst_187 = arith.constant 5.000000e-01 : f32
    %487 = vector.broadcast %cst_187 : f32 to vector<2x32xf32>
    %488 = arith.mulf %487, %486 : vector<2x32xf32>
    %489 = vector.extract_strided_slice %465 {offsets = [0, 64], sizes = [2, 32], strides = [1, 1]} : vector<2x96xf32> to vector<2x32xf32>
    %490 = vector.extract_strided_slice %468 {offsets = [0, 64], sizes = [2, 32], strides = [1, 1]} : vector<2x96xf32> to vector<2x32xf32>
    %491 = arith.mulf %478, %490 : vector<2x32xf32>
    %492 = arith.addf %489, %491 : vector<2x32xf32>
    %493 = math.tanh %492 : vector<2x32xf32>
    %cst_188 = arith.constant 1.000000e+00 : f32
    %494 = vector.broadcast %cst_188 : f32 to vector<2x32xf32>
    %495 = arith.subf %494, %488 : vector<2x32xf32>
    %496 = arith.mulf %495, %493 : vector<2x32xf32>
    %497 = arith.mulf %488, %395 : vector<2x32xf32>
    %498 = arith.addf %496, %497 : vector<2x32xf32>
    %499 = arith.truncf %498 : vector<2x32xf32> to vector<2x32xbf16>
    %cst_189 = arith.constant dense<0.000000e+00> : vector<2x64xf32>
    %500 = tpu.matmul %499, %7, %cst_189 {dimension_numbers = #tpu.dot_dimension_numbers<[1], [0], [0], [1], [0, 0, 1, 1], [], []>} : vector<2x32xbf16>, vector<32x64xbf16>, vector<2x64xf32> -> vector<2x64xf32>
    %cst_190 = arith.constant dense<0.000000e+00> : vector<2x64xf32>
    %501 = tpu.matmul %443, %8, %cst_190 {dimension_numbers = #tpu.dot_dimension_numbers<[1], [0], [0], [1], [0, 0, 1, 1], [], []>} : vector<2x32xbf16>, vector<32x64xbf16>, vector<2x64xf32> -> vector<2x64xf32>
    %502 = arith.addf %500, %501 : vector<2x64xf32>
    %503 = arith.addf %502, %21 : vector<2x64xf32>
    %cst_191 = arith.constant 0.000000e+00 : f32
    %504 = vector.broadcast %cst_191 : f32 to vector<2x64xf32>
    %505 = arith.cmpf ogt, %503, %504 : vector<2x64xf32>
    %cst_192 = arith.constant 0.000000e+00 : f32
    %506 = vector.broadcast %cst_192 : f32 to vector<2x64xf32>
    %507 = arith.minimumf %503, %506 : vector<2x64xf32>
    %508 = math.exp %507 : vector<2x64xf32>
    %cst_193 = arith.constant 1.000000e+00 : f32
    %509 = vector.broadcast %cst_193 : f32 to vector<2x64xf32>
    %510 = arith.subf %508, %509 : vector<2x64xf32>
    %511 = arith.select %505, %503, %510 : vector<2x64xi1>, vector<2x64xf32>
    %512 = arith.truncf %511 : vector<2x64xf32> to vector<2x64xbf16>
    %cst_194 = arith.constant dense<0.000000e+00> : vector<2x256xf32>
    %513 = tpu.matmul %512, %9, %cst_194 {dimension_numbers = #tpu.dot_dimension_numbers<[1], [0], [0], [1], [0, 0, 1, 1], [], []>} : vector<2x64xbf16>, vector<64x256xbf16>, vector<2x256xf32> -> vector<2x256xf32>
    %514 = arith.addf %513, %24 : vector<2x256xf32>
    %515 = vector.extract_strided_slice %514 {offsets = [0, 0], sizes = [2, 128], strides = [1, 1]} : vector<2x256xf32> to vector<2x128xf32>
    %516 = vector.extract_strided_slice %514 {offsets = [0, 128], sizes = [2, 128], strides = [1, 1]} : vector<2x256xf32> to vector<2x128xf32>
    %cst_195 = arith.constant 0.000000e+00 : f32
    %517 = vector.broadcast %cst_195 : f32 to vector<2x128xf32>
    %518 = arith.maximumf %516, %517 : vector<2x128xf32>
    %519 = math.absf %516 : vector<2x128xf32>
    %cst_196 = arith.constant 0.000000e+00 : f32
    %520 = vector.broadcast %cst_196 : f32 to vector<2x128xf32>
    %521 = arith.subf %520, %519 : vector<2x128xf32>
    %522 = math.exp %521 : vector<2x128xf32>
    %523 = math.log1p %522 : vector<2x128xf32>
    %524 = arith.addf %518, %523 : vector<2x128xf32>
    %cst_197 = arith.constant 1.000000e-01 : f32
    %525 = vector.broadcast %cst_197 : f32 to vector<2x128xf32>
    %526 = arith.addf %524, %525 : vector<2x128xf32>
    %527 = vector.extract_strided_slice %515 {offsets = [0, 8], sizes = [2, 8], strides = [1, 1]} : vector<2x128xf32> to vector<2x8xf32>
    %528 = vector.extract_strided_slice %526 {offsets = [0, 8], sizes = [2, 8], strides = [1, 1]} : vector<2x128xf32> to vector<2x8xf32>
    %529 = arith.mulf %528, %449 : vector<2x8xf32>
    %530 = arith.addf %527, %529 : vector<2x8xf32>
    %531 = arith.index_cast %c4_i32 : i32 to index
    %c0_198 = arith.constant 0 : index
    %c0_199 = arith.constant 0 : index
    %532 = vector.load %arg19[%531, %c0_198, %c0_199] : memref<8x2x256xf32, #tpu.memory_space<vmem>>, vector<1x2x128xf32>
    %533 = vector.shape_cast %532 : vector<1x2x128xf32> to vector<2x128xf32>
    %534 = vector.shape_cast %515 : vector<2x128xf32> to vector<1x2x128xf32>
    tpu.vector_store %arg19[%531, %c0_198, %c0_199], %534 {strides = array<i32>} : memref<8x2x256xf32, #tpu.memory_space<vmem>>, vector<1x2x128xf32>,
    %535 = arith.index_cast %c4_i32 : i32 to index
    %c0_200 = arith.constant 0 : index
    %c128_201 = arith.constant 128 : index
    %536 = vector.load %arg19[%535, %c0_200, %c128_201] : memref<8x2x256xf32, #tpu.memory_space<vmem>>, vector<1x2x128xf32>
    %537 = vector.shape_cast %536 : vector<1x2x128xf32> to vector<2x128xf32>
    %538 = vector.shape_cast %526 : vector<2x128xf32> to vector<1x2x128xf32>
    tpu.vector_store %arg19[%535, %c0_200, %c128_201], %538 {strides = array<i32>} : memref<8x2x256xf32, #tpu.memory_space<vmem>>, vector<1x2x128xf32>,
    %539 = tpu.concatenate %498, %25, %530, %26 in 1 : vector<2x32xf32>, vector<2x96xf32>, vector<2x8xf32>, vector<2x120xf32> -> vector<2x256xf32>
    %540 = arith.index_cast %c4_i32 : i32 to index
    %c0_202 = arith.constant 0 : index
    %c0_203 = arith.constant 0 : index
    %541 = vector.load %arg20[%540, %c0_202, %c0_203] : memref<8x2x256xf32, #tpu.memory_space<vmem>>, vector<1x2x256xf32>
    %542 = vector.shape_cast %541 : vector<1x2x256xf32> to vector<2x256xf32>
    %543 = vector.shape_cast %539 : vector<2x256xf32> to vector<1x2x256xf32>
    tpu.vector_store %arg20[%540, %c0_202, %c0_203], %543 {strides = array<i32>} : memref<8x2x256xf32, #tpu.memory_space<vmem>>, vector<1x2x256xf32>,
    %c5_i32 = arith.constant 5 : i32
    %544 = arith.index_cast %c5_i32 : i32 to index
    %c0_204 = arith.constant 0 : index
    %c0_205 = arith.constant 0 : index
    %545 = vector.load %arg2[%544, %c0_204, %c0_205] : memref<8x2x32xbf16, #tpu.memory_space<vmem>>, vector<1x2x32xbf16>
    %546 = vector.shape_cast %545 : vector<1x2x32xbf16> to vector<2x32xbf16>
    %547 = arith.index_cast %c5_i32 : i32 to index
    %c0_206 = arith.constant 0 : index
    %c0_207 = arith.constant 0 : index
    %548 = vector.load %arg3[%547, %c0_206, %c0_207] : memref<8x2x4xbf16, #tpu.memory_space<vmem>>, vector<1x2x4xbf16>
    %549 = vector.shape_cast %548 : vector<1x2x4xbf16> to vector<2x4xbf16>
    %550 = arith.index_cast %c5_i32 : i32 to index
    %c0_208 = arith.constant 0 : index
    %c0_209 = arith.constant 0 : index
    %551 = vector.load %arg4[%550, %c0_208, %c0_209] : memref<8x2x8xf32, #tpu.memory_space<vmem>>, vector<1x2x8xf32>
    %552 = vector.shape_cast %551 : vector<1x2x8xf32> to vector<2x8xf32>
    %553 = arith.truncf %530 : vector<2x8xf32> to vector<2x8xbf16>
    %cst_210 = arith.constant dense<0.000000e+00> : vector<2x32xf32>
    %554 = tpu.matmul %553, %3, %cst_210 {dimension_numbers = #tpu.dot_dimension_numbers<[1], [0], [0], [1], [0, 0, 1, 1], [], []>} : vector<2x8xbf16>, vector<8x32xbf16>, vector<2x32xf32> -> vector<2x32xf32>
    %cst_211 = arith.constant dense<0.000000e+00> : vector<2x32xf32>
    %555 = tpu.matmul %549, %4, %cst_211 {dimension_numbers = #tpu.dot_dimension_numbers<[1], [0], [0], [1], [0, 0, 1, 1], [], []>} : vector<2x4xbf16>, vector<4x32xbf16>, vector<2x32xf32> -> vector<2x32xf32>
    %556 = arith.addf %554, %555 : vector<2x32xf32>
    %557 = arith.addf %556, %12 : vector<2x32xf32>
    %cst_212 = arith.constant 0.000000e+00 : f32
    %558 = vector.broadcast %cst_212 : f32 to vector<2x32xf32>
    %559 = arith.cmpf ogt, %557, %558 : vector<2x32xf32>
    %cst_213 = arith.constant 0.000000e+00 : f32
    %560 = vector.broadcast %cst_213 : f32 to vector<2x32xf32>
    %561 = arith.minimumf %557, %560 : vector<2x32xf32>
    %562 = math.exp %561 : vector<2x32xf32>
    %cst_214 = arith.constant 1.000000e+00 : f32
    %563 = vector.broadcast %cst_214 : f32 to vector<2x32xf32>
    %564 = arith.subf %562, %563 : vector<2x32xf32>
    %565 = arith.select %559, %557, %564 : vector<2x32xi1>, vector<2x32xf32>
    %566 = arith.truncf %565 : vector<2x32xf32> to vector<2x32xbf16>
    %cst_215 = arith.constant dense<0.000000e+00> : vector<2x96xf32>
    %567 = tpu.matmul %566, %5, %cst_215 {dimension_numbers = #tpu.dot_dimension_numbers<[1], [0], [0], [1], [0, 0, 1, 1], [], []>} : vector<2x32xbf16>, vector<32x96xbf16>, vector<2x96xf32> -> vector<2x96xf32>
    %568 = arith.addf %567, %15 : vector<2x96xf32>
    %569 = arith.truncf %498 : vector<2x32xf32> to vector<2x32xbf16>
    %cst_216 = arith.constant dense<0.000000e+00> : vector<2x96xf32>
    %570 = tpu.matmul %569, %6, %cst_216 {dimension_numbers = #tpu.dot_dimension_numbers<[1], [0], [0], [1], [0, 0, 1, 1], [], []>} : vector<2x32xbf16>, vector<32x96xbf16>, vector<2x96xf32> -> vector<2x96xf32>
    %571 = arith.addf %570, %18 : vector<2x96xf32>
    %572 = vector.extract_strided_slice %568 {offsets = [0, 0], sizes = [2, 32], strides = [1, 1]} : vector<2x96xf32> to vector<2x32xf32>
    %573 = vector.extract_strided_slice %571 {offsets = [0, 0], sizes = [2, 32], strides = [1, 1]} : vector<2x96xf32> to vector<2x32xf32>
    %574 = arith.addf %572, %573 : vector<2x32xf32>
    %cst_217 = arith.constant 5.000000e-01 : f32
    %575 = vector.broadcast %cst_217 : f32 to vector<2x32xf32>
    %576 = arith.mulf %575, %574 : vector<2x32xf32>
    %577 = math.tanh %576 : vector<2x32xf32>
    %cst_218 = arith.constant 1.000000e+00 : f32
    %578 = vector.broadcast %cst_218 : f32 to vector<2x32xf32>
    %579 = arith.addf %577, %578 : vector<2x32xf32>
    %cst_219 = arith.constant 5.000000e-01 : f32
    %580 = vector.broadcast %cst_219 : f32 to vector<2x32xf32>
    %581 = arith.mulf %580, %579 : vector<2x32xf32>
    %582 = vector.extract_strided_slice %568 {offsets = [0, 32], sizes = [2, 32], strides = [1, 1]} : vector<2x96xf32> to vector<2x32xf32>
    %583 = vector.extract_strided_slice %571 {offsets = [0, 32], sizes = [2, 32], strides = [1, 1]} : vector<2x96xf32> to vector<2x32xf32>
    %584 = arith.addf %582, %583 : vector<2x32xf32>
    %cst_220 = arith.constant 5.000000e-01 : f32
    %585 = vector.broadcast %cst_220 : f32 to vector<2x32xf32>
    %586 = arith.mulf %585, %584 : vector<2x32xf32>
    %587 = math.tanh %586 : vector<2x32xf32>
    %cst_221 = arith.constant 1.000000e+00 : f32
    %588 = vector.broadcast %cst_221 : f32 to vector<2x32xf32>
    %589 = arith.addf %587, %588 : vector<2x32xf32>
    %cst_222 = arith.constant 5.000000e-01 : f32
    %590 = vector.broadcast %cst_222 : f32 to vector<2x32xf32>
    %591 = arith.mulf %590, %589 : vector<2x32xf32>
    %592 = vector.extract_strided_slice %568 {offsets = [0, 64], sizes = [2, 32], strides = [1, 1]} : vector<2x96xf32> to vector<2x32xf32>
    %593 = vector.extract_strided_slice %571 {offsets = [0, 64], sizes = [2, 32], strides = [1, 1]} : vector<2x96xf32> to vector<2x32xf32>
    %594 = arith.mulf %581, %593 : vector<2x32xf32>
    %595 = arith.addf %592, %594 : vector<2x32xf32>
    %596 = math.tanh %595 : vector<2x32xf32>
    %cst_223 = arith.constant 1.000000e+00 : f32
    %597 = vector.broadcast %cst_223 : f32 to vector<2x32xf32>
    %598 = arith.subf %597, %591 : vector<2x32xf32>
    %599 = arith.mulf %598, %596 : vector<2x32xf32>
    %600 = arith.mulf %591, %498 : vector<2x32xf32>
    %601 = arith.addf %599, %600 : vector<2x32xf32>
    %602 = arith.truncf %601 : vector<2x32xf32> to vector<2x32xbf16>
    %cst_224 = arith.constant dense<0.000000e+00> : vector<2x64xf32>
    %603 = tpu.matmul %602, %7, %cst_224 {dimension_numbers = #tpu.dot_dimension_numbers<[1], [0], [0], [1], [0, 0, 1, 1], [], []>} : vector<2x32xbf16>, vector<32x64xbf16>, vector<2x64xf32> -> vector<2x64xf32>
    %cst_225 = arith.constant dense<0.000000e+00> : vector<2x64xf32>
    %604 = tpu.matmul %546, %8, %cst_225 {dimension_numbers = #tpu.dot_dimension_numbers<[1], [0], [0], [1], [0, 0, 1, 1], [], []>} : vector<2x32xbf16>, vector<32x64xbf16>, vector<2x64xf32> -> vector<2x64xf32>
    %605 = arith.addf %603, %604 : vector<2x64xf32>
    %606 = arith.addf %605, %21 : vector<2x64xf32>
    %cst_226 = arith.constant 0.000000e+00 : f32
    %607 = vector.broadcast %cst_226 : f32 to vector<2x64xf32>
    %608 = arith.cmpf ogt, %606, %607 : vector<2x64xf32>
    %cst_227 = arith.constant 0.000000e+00 : f32
    %609 = vector.broadcast %cst_227 : f32 to vector<2x64xf32>
    %610 = arith.minimumf %606, %609 : vector<2x64xf32>
    %611 = math.exp %610 : vector<2x64xf32>
    %cst_228 = arith.constant 1.000000e+00 : f32
    %612 = vector.broadcast %cst_228 : f32 to vector<2x64xf32>
    %613 = arith.subf %611, %612 : vector<2x64xf32>
    %614 = arith.select %608, %606, %613 : vector<2x64xi1>, vector<2x64xf32>
    %615 = arith.truncf %614 : vector<2x64xf32> to vector<2x64xbf16>
    %cst_229 = arith.constant dense<0.000000e+00> : vector<2x256xf32>
    %616 = tpu.matmul %615, %9, %cst_229 {dimension_numbers = #tpu.dot_dimension_numbers<[1], [0], [0], [1], [0, 0, 1, 1], [], []>} : vector<2x64xbf16>, vector<64x256xbf16>, vector<2x256xf32> -> vector<2x256xf32>
    %617 = arith.addf %616, %24 : vector<2x256xf32>
    %618 = vector.extract_strided_slice %617 {offsets = [0, 0], sizes = [2, 128], strides = [1, 1]} : vector<2x256xf32> to vector<2x128xf32>
    %619 = vector.extract_strided_slice %617 {offsets = [0, 128], sizes = [2, 128], strides = [1, 1]} : vector<2x256xf32> to vector<2x128xf32>
    %cst_230 = arith.constant 0.000000e+00 : f32
    %620 = vector.broadcast %cst_230 : f32 to vector<2x128xf32>
    %621 = arith.maximumf %619, %620 : vector<2x128xf32>
    %622 = math.absf %619 : vector<2x128xf32>
    %cst_231 = arith.constant 0.000000e+00 : f32
    %623 = vector.broadcast %cst_231 : f32 to vector<2x128xf32>
    %624 = arith.subf %623, %622 : vector<2x128xf32>
    %625 = math.exp %624 : vector<2x128xf32>
    %626 = math.log1p %625 : vector<2x128xf32>
    %627 = arith.addf %621, %626 : vector<2x128xf32>
    %cst_232 = arith.constant 1.000000e-01 : f32
    %628 = vector.broadcast %cst_232 : f32 to vector<2x128xf32>
    %629 = arith.addf %627, %628 : vector<2x128xf32>
    %630 = vector.extract_strided_slice %618 {offsets = [0, 8], sizes = [2, 8], strides = [1, 1]} : vector<2x128xf32> to vector<2x8xf32>
    %631 = vector.extract_strided_slice %629 {offsets = [0, 8], sizes = [2, 8], strides = [1, 1]} : vector<2x128xf32> to vector<2x8xf32>
    %632 = arith.mulf %631, %552 : vector<2x8xf32>
    %633 = arith.addf %630, %632 : vector<2x8xf32>
    %634 = arith.index_cast %c5_i32 : i32 to index
    %c0_233 = arith.constant 0 : index
    %c0_234 = arith.constant 0 : index
    %635 = vector.load %arg19[%634, %c0_233, %c0_234] : memref<8x2x256xf32, #tpu.memory_space<vmem>>, vector<1x2x128xf32>
    %636 = vector.shape_cast %635 : vector<1x2x128xf32> to vector<2x128xf32>
    %637 = vector.shape_cast %618 : vector<2x128xf32> to vector<1x2x128xf32>
    tpu.vector_store %arg19[%634, %c0_233, %c0_234], %637 {strides = array<i32>} : memref<8x2x256xf32, #tpu.memory_space<vmem>>, vector<1x2x128xf32>,
    %638 = arith.index_cast %c5_i32 : i32 to index
    %c0_235 = arith.constant 0 : index
    %c128_236 = arith.constant 128 : index
    %639 = vector.load %arg19[%638, %c0_235, %c128_236] : memref<8x2x256xf32, #tpu.memory_space<vmem>>, vector<1x2x128xf32>
    %640 = vector.shape_cast %639 : vector<1x2x128xf32> to vector<2x128xf32>
    %641 = vector.shape_cast %629 : vector<2x128xf32> to vector<1x2x128xf32>
    tpu.vector_store %arg19[%638, %c0_235, %c128_236], %641 {strides = array<i32>} : memref<8x2x256xf32, #tpu.memory_space<vmem>>, vector<1x2x128xf32>,
    %642 = tpu.concatenate %601, %25, %633, %26 in 1 : vector<2x32xf32>, vector<2x96xf32>, vector<2x8xf32>, vector<2x120xf32> -> vector<2x256xf32>
    %643 = arith.index_cast %c5_i32 : i32 to index
    %c0_237 = arith.constant 0 : index
    %c0_238 = arith.constant 0 : index
    %644 = vector.load %arg20[%643, %c0_237, %c0_238] : memref<8x2x256xf32, #tpu.memory_space<vmem>>, vector<1x2x256xf32>
    %645 = vector.shape_cast %644 : vector<1x2x256xf32> to vector<2x256xf32>
    %646 = vector.shape_cast %642 : vector<2x256xf32> to vector<1x2x256xf32>
    tpu.vector_store %arg20[%643, %c0_237, %c0_238], %646 {strides = array<i32>} : memref<8x2x256xf32, #tpu.memory_space<vmem>>, vector<1x2x256xf32>,
    %c6_i32 = arith.constant 6 : i32
    %647 = arith.index_cast %c6_i32 : i32 to index
    %c0_239 = arith.constant 0 : index
    %c0_240 = arith.constant 0 : index
    %648 = vector.load %arg2[%647, %c0_239, %c0_240] : memref<8x2x32xbf16, #tpu.memory_space<vmem>>, vector<1x2x32xbf16>
    %649 = vector.shape_cast %648 : vector<1x2x32xbf16> to vector<2x32xbf16>
    %650 = arith.index_cast %c6_i32 : i32 to index
    %c0_241 = arith.constant 0 : index
    %c0_242 = arith.constant 0 : index
    %651 = vector.load %arg3[%650, %c0_241, %c0_242] : memref<8x2x4xbf16, #tpu.memory_space<vmem>>, vector<1x2x4xbf16>
    %652 = vector.shape_cast %651 : vector<1x2x4xbf16> to vector<2x4xbf16>
    %653 = arith.index_cast %c6_i32 : i32 to index
    %c0_243 = arith.constant 0 : index
    %c0_244 = arith.constant 0 : index
    %654 = vector.load %arg4[%653, %c0_243, %c0_244] : memref<8x2x8xf32, #tpu.memory_space<vmem>>, vector<1x2x8xf32>
    %655 = vector.shape_cast %654 : vector<1x2x8xf32> to vector<2x8xf32>
    %656 = arith.truncf %633 : vector<2x8xf32> to vector<2x8xbf16>
    %cst_245 = arith.constant dense<0.000000e+00> : vector<2x32xf32>
    %657 = tpu.matmul %656, %3, %cst_245 {dimension_numbers = #tpu.dot_dimension_numbers<[1], [0], [0], [1], [0, 0, 1, 1], [], []>} : vector<2x8xbf16>, vector<8x32xbf16>, vector<2x32xf32> -> vector<2x32xf32>
    %cst_246 = arith.constant dense<0.000000e+00> : vector<2x32xf32>
    %658 = tpu.matmul %652, %4, %cst_246 {dimension_numbers = #tpu.dot_dimension_numbers<[1], [0], [0], [1], [0, 0, 1, 1], [], []>} : vector<2x4xbf16>, vector<4x32xbf16>, vector<2x32xf32> -> vector<2x32xf32>
    %659 = arith.addf %657, %658 : vector<2x32xf32>
    %660 = arith.addf %659, %12 : vector<2x32xf32>
    %cst_247 = arith.constant 0.000000e+00 : f32
    %661 = vector.broadcast %cst_247 : f32 to vector<2x32xf32>
    %662 = arith.cmpf ogt, %660, %661 : vector<2x32xf32>
    %cst_248 = arith.constant 0.000000e+00 : f32
    %663 = vector.broadcast %cst_248 : f32 to vector<2x32xf32>
    %664 = arith.minimumf %660, %663 : vector<2x32xf32>
    %665 = math.exp %664 : vector<2x32xf32>
    %cst_249 = arith.constant 1.000000e+00 : f32
    %666 = vector.broadcast %cst_249 : f32 to vector<2x32xf32>
    %667 = arith.subf %665, %666 : vector<2x32xf32>
    %668 = arith.select %662, %660, %667 : vector<2x32xi1>, vector<2x32xf32>
    %669 = arith.truncf %668 : vector<2x32xf32> to vector<2x32xbf16>
    %cst_250 = arith.constant dense<0.000000e+00> : vector<2x96xf32>
    %670 = tpu.matmul %669, %5, %cst_250 {dimension_numbers = #tpu.dot_dimension_numbers<[1], [0], [0], [1], [0, 0, 1, 1], [], []>} : vector<2x32xbf16>, vector<32x96xbf16>, vector<2x96xf32> -> vector<2x96xf32>
    %671 = arith.addf %670, %15 : vector<2x96xf32>
    %672 = arith.truncf %601 : vector<2x32xf32> to vector<2x32xbf16>
    %cst_251 = arith.constant dense<0.000000e+00> : vector<2x96xf32>
    %673 = tpu.matmul %672, %6, %cst_251 {dimension_numbers = #tpu.dot_dimension_numbers<[1], [0], [0], [1], [0, 0, 1, 1], [], []>} : vector<2x32xbf16>, vector<32x96xbf16>, vector<2x96xf32> -> vector<2x96xf32>
    %674 = arith.addf %673, %18 : vector<2x96xf32>
    %675 = vector.extract_strided_slice %671 {offsets = [0, 0], sizes = [2, 32], strides = [1, 1]} : vector<2x96xf32> to vector<2x32xf32>
    %676 = vector.extract_strided_slice %674 {offsets = [0, 0], sizes = [2, 32], strides = [1, 1]} : vector<2x96xf32> to vector<2x32xf32>
    %677 = arith.addf %675, %676 : vector<2x32xf32>
    %cst_252 = arith.constant 5.000000e-01 : f32
    %678 = vector.broadcast %cst_252 : f32 to vector<2x32xf32>
    %679 = arith.mulf %678, %677 : vector<2x32xf32>
    %680 = math.tanh %679 : vector<2x32xf32>
    %cst_253 = arith.constant 1.000000e+00 : f32
    %681 = vector.broadcast %cst_253 : f32 to vector<2x32xf32>
    %682 = arith.addf %680, %681 : vector<2x32xf32>
    %cst_254 = arith.constant 5.000000e-01 : f32
    %683 = vector.broadcast %cst_254 : f32 to vector<2x32xf32>
    %684 = arith.mulf %683, %682 : vector<2x32xf32>
    %685 = vector.extract_strided_slice %671 {offsets = [0, 32], sizes = [2, 32], strides = [1, 1]} : vector<2x96xf32> to vector<2x32xf32>
    %686 = vector.extract_strided_slice %674 {offsets = [0, 32], sizes = [2, 32], strides = [1, 1]} : vector<2x96xf32> to vector<2x32xf32>
    %687 = arith.addf %685, %686 : vector<2x32xf32>
    %cst_255 = arith.constant 5.000000e-01 : f32
    %688 = vector.broadcast %cst_255 : f32 to vector<2x32xf32>
    %689 = arith.mulf %688, %687 : vector<2x32xf32>
    %690 = math.tanh %689 : vector<2x32xf32>
    %cst_256 = arith.constant 1.000000e+00 : f32
    %691 = vector.broadcast %cst_256 : f32 to vector<2x32xf32>
    %692 = arith.addf %690, %691 : vector<2x32xf32>
    %cst_257 = arith.constant 5.000000e-01 : f32
    %693 = vector.broadcast %cst_257 : f32 to vector<2x32xf32>
    %694 = arith.mulf %693, %692 : vector<2x32xf32>
    %695 = vector.extract_strided_slice %671 {offsets = [0, 64], sizes = [2, 32], strides = [1, 1]} : vector<2x96xf32> to vector<2x32xf32>
    %696 = vector.extract_strided_slice %674 {offsets = [0, 64], sizes = [2, 32], strides = [1, 1]} : vector<2x96xf32> to vector<2x32xf32>
    %697 = arith.mulf %684, %696 : vector<2x32xf32>
    %698 = arith.addf %695, %697 : vector<2x32xf32>
    %699 = math.tanh %698 : vector<2x32xf32>
    %cst_258 = arith.constant 1.000000e+00 : f32
    %700 = vector.broadcast %cst_258 : f32 to vector<2x32xf32>
    %701 = arith.subf %700, %694 : vector<2x32xf32>
    %702 = arith.mulf %701, %699 : vector<2x32xf32>
    %703 = arith.mulf %694, %601 : vector<2x32xf32>
    %704 = arith.addf %702, %703 : vector<2x32xf32>
    %705 = arith.truncf %704 : vector<2x32xf32> to vector<2x32xbf16>
    %cst_259 = arith.constant dense<0.000000e+00> : vector<2x64xf32>
    %706 = tpu.matmul %705, %7, %cst_259 {dimension_numbers = #tpu.dot_dimension_numbers<[1], [0], [0], [1], [0, 0, 1, 1], [], []>} : vector<2x32xbf16>, vector<32x64xbf16>, vector<2x64xf32> -> vector<2x64xf32>
    %cst_260 = arith.constant dense<0.000000e+00> : vector<2x64xf32>
    %707 = tpu.matmul %649, %8, %cst_260 {dimension_numbers = #tpu.dot_dimension_numbers<[1], [0], [0], [1], [0, 0, 1, 1], [], []>} : vector<2x32xbf16>, vector<32x64xbf16>, vector<2x64xf32> -> vector<2x64xf32>
    %708 = arith.addf %706, %707 : vector<2x64xf32>
    %709 = arith.addf %708, %21 : vector<2x64xf32>
    %cst_261 = arith.constant 0.000000e+00 : f32
    %710 = vector.broadcast %cst_261 : f32 to vector<2x64xf32>
    %711 = arith.cmpf ogt, %709, %710 : vector<2x64xf32>
    %cst_262 = arith.constant 0.000000e+00 : f32
    %712 = vector.broadcast %cst_262 : f32 to vector<2x64xf32>
    %713 = arith.minimumf %709, %712 : vector<2x64xf32>
    %714 = math.exp %713 : vector<2x64xf32>
    %cst_263 = arith.constant 1.000000e+00 : f32
    %715 = vector.broadcast %cst_263 : f32 to vector<2x64xf32>
    %716 = arith.subf %714, %715 : vector<2x64xf32>
    %717 = arith.select %711, %709, %716 : vector<2x64xi1>, vector<2x64xf32>
    %718 = arith.truncf %717 : vector<2x64xf32> to vector<2x64xbf16>
    %cst_264 = arith.constant dense<0.000000e+00> : vector<2x256xf32>
    %719 = tpu.matmul %718, %9, %cst_264 {dimension_numbers = #tpu.dot_dimension_numbers<[1], [0], [0], [1], [0, 0, 1, 1], [], []>} : vector<2x64xbf16>, vector<64x256xbf16>, vector<2x256xf32> -> vector<2x256xf32>
    %720 = arith.addf %719, %24 : vector<2x256xf32>
    %721 = vector.extract_strided_slice %720 {offsets = [0, 0], sizes = [2, 128], strides = [1, 1]} : vector<2x256xf32> to vector<2x128xf32>
    %722 = vector.extract_strided_slice %720 {offsets = [0, 128], sizes = [2, 128], strides = [1, 1]} : vector<2x256xf32> to vector<2x128xf32>
    %cst_265 = arith.constant 0.000000e+00 : f32
    %723 = vector.broadcast %cst_265 : f32 to vector<2x128xf32>
    %724 = arith.maximumf %722, %723 : vector<2x128xf32>
    %725 = math.absf %722 : vector<2x128xf32>
    %cst_266 = arith.constant 0.000000e+00 : f32
    %726 = vector.broadcast %cst_266 : f32 to vector<2x128xf32>
    %727 = arith.subf %726, %725 : vector<2x128xf32>
    %728 = math.exp %727 : vector<2x128xf32>
    %729 = math.log1p %728 : vector<2x128xf32>
    %730 = arith.addf %724, %729 : vector<2x128xf32>
    %cst_267 = arith.constant 1.000000e-01 : f32
    %731 = vector.broadcast %cst_267 : f32 to vector<2x128xf32>
    %732 = arith.addf %730, %731 : vector<2x128xf32>
    %733 = vector.extract_strided_slice %721 {offsets = [0, 8], sizes = [2, 8], strides = [1, 1]} : vector<2x128xf32> to vector<2x8xf32>
    %734 = vector.extract_strided_slice %732 {offsets = [0, 8], sizes = [2, 8], strides = [1, 1]} : vector<2x128xf32> to vector<2x8xf32>
    %735 = arith.mulf %734, %655 : vector<2x8xf32>
    %736 = arith.addf %733, %735 : vector<2x8xf32>
    %737 = arith.index_cast %c6_i32 : i32 to index
    %c0_268 = arith.constant 0 : index
    %c0_269 = arith.constant 0 : index
    %738 = vector.load %arg19[%737, %c0_268, %c0_269] : memref<8x2x256xf32, #tpu.memory_space<vmem>>, vector<1x2x128xf32>
    %739 = vector.shape_cast %738 : vector<1x2x128xf32> to vector<2x128xf32>
    %740 = vector.shape_cast %721 : vector<2x128xf32> to vector<1x2x128xf32>
    tpu.vector_store %arg19[%737, %c0_268, %c0_269], %740 {strides = array<i32>} : memref<8x2x256xf32, #tpu.memory_space<vmem>>, vector<1x2x128xf32>,
    %741 = arith.index_cast %c6_i32 : i32 to index
    %c0_270 = arith.constant 0 : index
    %c128_271 = arith.constant 128 : index
    %742 = vector.load %arg19[%741, %c0_270, %c128_271] : memref<8x2x256xf32, #tpu.memory_space<vmem>>, vector<1x2x128xf32>
    %743 = vector.shape_cast %742 : vector<1x2x128xf32> to vector<2x128xf32>
    %744 = vector.shape_cast %732 : vector<2x128xf32> to vector<1x2x128xf32>
    tpu.vector_store %arg19[%741, %c0_270, %c128_271], %744 {strides = array<i32>} : memref<8x2x256xf32, #tpu.memory_space<vmem>>, vector<1x2x128xf32>,
    %745 = tpu.concatenate %704, %25, %736, %26 in 1 : vector<2x32xf32>, vector<2x96xf32>, vector<2x8xf32>, vector<2x120xf32> -> vector<2x256xf32>
    %746 = arith.index_cast %c6_i32 : i32 to index
    %c0_272 = arith.constant 0 : index
    %c0_273 = arith.constant 0 : index
    %747 = vector.load %arg20[%746, %c0_272, %c0_273] : memref<8x2x256xf32, #tpu.memory_space<vmem>>, vector<1x2x256xf32>
    %748 = vector.shape_cast %747 : vector<1x2x256xf32> to vector<2x256xf32>
    %749 = vector.shape_cast %745 : vector<2x256xf32> to vector<1x2x256xf32>
    tpu.vector_store %arg20[%746, %c0_272, %c0_273], %749 {strides = array<i32>} : memref<8x2x256xf32, #tpu.memory_space<vmem>>, vector<1x2x256xf32>,
    %c7_i32 = arith.constant 7 : i32
    %750 = arith.index_cast %c7_i32 : i32 to index
    %c0_274 = arith.constant 0 : index
    %c0_275 = arith.constant 0 : index
    %751 = vector.load %arg2[%750, %c0_274, %c0_275] : memref<8x2x32xbf16, #tpu.memory_space<vmem>>, vector<1x2x32xbf16>
    %752 = vector.shape_cast %751 : vector<1x2x32xbf16> to vector<2x32xbf16>
    %753 = arith.index_cast %c7_i32 : i32 to index
    %c0_276 = arith.constant 0 : index
    %c0_277 = arith.constant 0 : index
    %754 = vector.load %arg3[%753, %c0_276, %c0_277] : memref<8x2x4xbf16, #tpu.memory_space<vmem>>, vector<1x2x4xbf16>
    %755 = vector.shape_cast %754 : vector<1x2x4xbf16> to vector<2x4xbf16>
    %756 = arith.index_cast %c7_i32 : i32 to index
    %c0_278 = arith.constant 0 : index
    %c0_279 = arith.constant 0 : index
    %757 = vector.load %arg4[%756, %c0_278, %c0_279] : memref<8x2x8xf32, #tpu.memory_space<vmem>>, vector<1x2x8xf32>
    %758 = vector.shape_cast %757 : vector<1x2x8xf32> to vector<2x8xf32>
    %759 = arith.truncf %736 : vector<2x8xf32> to vector<2x8xbf16>
    %cst_280 = arith.constant dense<0.000000e+00> : vector<2x32xf32>
    %760 = tpu.matmul %759, %3, %cst_280 {dimension_numbers = #tpu.dot_dimension_numbers<[1], [0], [0], [1], [0, 0, 1, 1], [], []>} : vector<2x8xbf16>, vector<8x32xbf16>, vector<2x32xf32> -> vector<2x32xf32>
    %cst_281 = arith.constant dense<0.000000e+00> : vector<2x32xf32>
    %761 = tpu.matmul %755, %4, %cst_281 {dimension_numbers = #tpu.dot_dimension_numbers<[1], [0], [0], [1], [0, 0, 1, 1], [], []>} : vector<2x4xbf16>, vector<4x32xbf16>, vector<2x32xf32> -> vector<2x32xf32>
    %762 = arith.addf %760, %761 : vector<2x32xf32>
    %763 = arith.addf %762, %12 : vector<2x32xf32>
    %cst_282 = arith.constant 0.000000e+00 : f32
    %764 = vector.broadcast %cst_282 : f32 to vector<2x32xf32>
    %765 = arith.cmpf ogt, %763, %764 : vector<2x32xf32>
    %cst_283 = arith.constant 0.000000e+00 : f32
    %766 = vector.broadcast %cst_283 : f32 to vector<2x32xf32>
    %767 = arith.minimumf %763, %766 : vector<2x32xf32>
    %768 = math.exp %767 : vector<2x32xf32>
    %cst_284 = arith.constant 1.000000e+00 : f32
    %769 = vector.broadcast %cst_284 : f32 to vector<2x32xf32>
    %770 = arith.subf %768, %769 : vector<2x32xf32>
    %771 = arith.select %765, %763, %770 : vector<2x32xi1>, vector<2x32xf32>
    %772 = arith.truncf %771 : vector<2x32xf32> to vector<2x32xbf16>
    %cst_285 = arith.constant dense<0.000000e+00> : vector<2x96xf32>
    %773 = tpu.matmul %772, %5, %cst_285 {dimension_numbers = #tpu.dot_dimension_numbers<[1], [0], [0], [1], [0, 0, 1, 1], [], []>} : vector<2x32xbf16>, vector<32x96xbf16>, vector<2x96xf32> -> vector<2x96xf32>
    %774 = arith.addf %773, %15 : vector<2x96xf32>
    %775 = arith.truncf %704 : vector<2x32xf32> to vector<2x32xbf16>
    %cst_286 = arith.constant dense<0.000000e+00> : vector<2x96xf32>
    %776 = tpu.matmul %775, %6, %cst_286 {dimension_numbers = #tpu.dot_dimension_numbers<[1], [0], [0], [1], [0, 0, 1, 1], [], []>} : vector<2x32xbf16>, vector<32x96xbf16>, vector<2x96xf32> -> vector<2x96xf32>
    %777 = arith.addf %776, %18 : vector<2x96xf32>
    %778 = vector.extract_strided_slice %774 {offsets = [0, 0], sizes = [2, 32], strides = [1, 1]} : vector<2x96xf32> to vector<2x32xf32>
    %779 = vector.extract_strided_slice %777 {offsets = [0, 0], sizes = [2, 32], strides = [1, 1]} : vector<2x96xf32> to vector<2x32xf32>
    %780 = arith.addf %778, %779 : vector<2x32xf32>
    %cst_287 = arith.constant 5.000000e-01 : f32
    %781 = vector.broadcast %cst_287 : f32 to vector<2x32xf32>
    %782 = arith.mulf %781, %780 : vector<2x32xf32>
    %783 = math.tanh %782 : vector<2x32xf32>
    %cst_288 = arith.constant 1.000000e+00 : f32
    %784 = vector.broadcast %cst_288 : f32 to vector<2x32xf32>
    %785 = arith.addf %783, %784 : vector<2x32xf32>
    %cst_289 = arith.constant 5.000000e-01 : f32
    %786 = vector.broadcast %cst_289 : f32 to vector<2x32xf32>
    %787 = arith.mulf %786, %785 : vector<2x32xf32>
    %788 = vector.extract_strided_slice %774 {offsets = [0, 32], sizes = [2, 32], strides = [1, 1]} : vector<2x96xf32> to vector<2x32xf32>
    %789 = vector.extract_strided_slice %777 {offsets = [0, 32], sizes = [2, 32], strides = [1, 1]} : vector<2x96xf32> to vector<2x32xf32>
    %790 = arith.addf %788, %789 : vector<2x32xf32>
    %cst_290 = arith.constant 5.000000e-01 : f32
    %791 = vector.broadcast %cst_290 : f32 to vector<2x32xf32>
    %792 = arith.mulf %791, %790 : vector<2x32xf32>
    %793 = math.tanh %792 : vector<2x32xf32>
    %cst_291 = arith.constant 1.000000e+00 : f32
    %794 = vector.broadcast %cst_291 : f32 to vector<2x32xf32>
    %795 = arith.addf %793, %794 : vector<2x32xf32>
    %cst_292 = arith.constant 5.000000e-01 : f32
    %796 = vector.broadcast %cst_292 : f32 to vector<2x32xf32>
    %797 = arith.mulf %796, %795 : vector<2x32xf32>
    %798 = vector.extract_strided_slice %774 {offsets = [0, 64], sizes = [2, 32], strides = [1, 1]} : vector<2x96xf32> to vector<2x32xf32>
    %799 = vector.extract_strided_slice %777 {offsets = [0, 64], sizes = [2, 32], strides = [1, 1]} : vector<2x96xf32> to vector<2x32xf32>
    %800 = arith.mulf %787, %799 : vector<2x32xf32>
    %801 = arith.addf %798, %800 : vector<2x32xf32>
    %802 = math.tanh %801 : vector<2x32xf32>
    %cst_293 = arith.constant 1.000000e+00 : f32
    %803 = vector.broadcast %cst_293 : f32 to vector<2x32xf32>
    %804 = arith.subf %803, %797 : vector<2x32xf32>
    %805 = arith.mulf %804, %802 : vector<2x32xf32>
    %806 = arith.mulf %797, %704 : vector<2x32xf32>
    %807 = arith.addf %805, %806 : vector<2x32xf32>
    %808 = arith.truncf %807 : vector<2x32xf32> to vector<2x32xbf16>
    %cst_294 = arith.constant dense<0.000000e+00> : vector<2x64xf32>
    %809 = tpu.matmul %808, %7, %cst_294 {dimension_numbers = #tpu.dot_dimension_numbers<[1], [0], [0], [1], [0, 0, 1, 1], [], []>} : vector<2x32xbf16>, vector<32x64xbf16>, vector<2x64xf32> -> vector<2x64xf32>
    %cst_295 = arith.constant dense<0.000000e+00> : vector<2x64xf32>
    %810 = tpu.matmul %752, %8, %cst_295 {dimension_numbers = #tpu.dot_dimension_numbers<[1], [0], [0], [1], [0, 0, 1, 1], [], []>} : vector<2x32xbf16>, vector<32x64xbf16>, vector<2x64xf32> -> vector<2x64xf32>
    %811 = arith.addf %809, %810 : vector<2x64xf32>
    %812 = arith.addf %811, %21 : vector<2x64xf32>
    %cst_296 = arith.constant 0.000000e+00 : f32
    %813 = vector.broadcast %cst_296 : f32 to vector<2x64xf32>
    %814 = arith.cmpf ogt, %812, %813 : vector<2x64xf32>
    %cst_297 = arith.constant 0.000000e+00 : f32
    %815 = vector.broadcast %cst_297 : f32 to vector<2x64xf32>
    %816 = arith.minimumf %812, %815 : vector<2x64xf32>
    %817 = math.exp %816 : vector<2x64xf32>
    %cst_298 = arith.constant 1.000000e+00 : f32
    %818 = vector.broadcast %cst_298 : f32 to vector<2x64xf32>
    %819 = arith.subf %817, %818 : vector<2x64xf32>
    %820 = arith.select %814, %812, %819 : vector<2x64xi1>, vector<2x64xf32>
    %821 = arith.truncf %820 : vector<2x64xf32> to vector<2x64xbf16>
    %cst_299 = arith.constant dense<0.000000e+00> : vector<2x256xf32>
    %822 = tpu.matmul %821, %9, %cst_299 {dimension_numbers = #tpu.dot_dimension_numbers<[1], [0], [0], [1], [0, 0, 1, 1], [], []>} : vector<2x64xbf16>, vector<64x256xbf16>, vector<2x256xf32> -> vector<2x256xf32>
    %823 = arith.addf %822, %24 : vector<2x256xf32>
    %824 = vector.extract_strided_slice %823 {offsets = [0, 0], sizes = [2, 128], strides = [1, 1]} : vector<2x256xf32> to vector<2x128xf32>
    %825 = vector.extract_strided_slice %823 {offsets = [0, 128], sizes = [2, 128], strides = [1, 1]} : vector<2x256xf32> to vector<2x128xf32>
    %cst_300 = arith.constant 0.000000e+00 : f32
    %826 = vector.broadcast %cst_300 : f32 to vector<2x128xf32>
    %827 = arith.maximumf %825, %826 : vector<2x128xf32>
    %828 = math.absf %825 : vector<2x128xf32>
    %cst_301 = arith.constant 0.000000e+00 : f32
    %829 = vector.broadcast %cst_301 : f32 to vector<2x128xf32>
    %830 = arith.subf %829, %828 : vector<2x128xf32>
    %831 = math.exp %830 : vector<2x128xf32>
    %832 = math.log1p %831 : vector<2x128xf32>
    %833 = arith.addf %827, %832 : vector<2x128xf32>
    %cst_302 = arith.constant 1.000000e-01 : f32
    %834 = vector.broadcast %cst_302 : f32 to vector<2x128xf32>
    %835 = arith.addf %833, %834 : vector<2x128xf32>
    %836 = vector.extract_strided_slice %824 {offsets = [0, 8], sizes = [2, 8], strides = [1, 1]} : vector<2x128xf32> to vector<2x8xf32>
    %837 = vector.extract_strided_slice %835 {offsets = [0, 8], sizes = [2, 8], strides = [1, 1]} : vector<2x128xf32> to vector<2x8xf32>
    %838 = arith.mulf %837, %758 : vector<2x8xf32>
    %839 = arith.addf %836, %838 : vector<2x8xf32>
    %840 = arith.index_cast %c7_i32 : i32 to index
    %c0_303 = arith.constant 0 : index
    %c0_304 = arith.constant 0 : index
    %841 = vector.load %arg19[%840, %c0_303, %c0_304] : memref<8x2x256xf32, #tpu.memory_space<vmem>>, vector<1x2x128xf32>
    %842 = vector.shape_cast %841 : vector<1x2x128xf32> to vector<2x128xf32>
    %843 = vector.shape_cast %824 : vector<2x128xf32> to vector<1x2x128xf32>
    tpu.vector_store %arg19[%840, %c0_303, %c0_304], %843 {strides = array<i32>} : memref<8x2x256xf32, #tpu.memory_space<vmem>>, vector<1x2x128xf32>,
    %844 = arith.index_cast %c7_i32 : i32 to index
    %c0_305 = arith.constant 0 : index
    %c128_306 = arith.constant 128 : index
    %845 = vector.load %arg19[%844, %c0_305, %c128_306] : memref<8x2x256xf32, #tpu.memory_space<vmem>>, vector<1x2x128xf32>
    %846 = vector.shape_cast %845 : vector<1x2x128xf32> to vector<2x128xf32>
    %847 = vector.shape_cast %835 : vector<2x128xf32> to vector<1x2x128xf32>
    tpu.vector_store %arg19[%844, %c0_305, %c128_306], %847 {strides = array<i32>} : memref<8x2x256xf32, #tpu.memory_space<vmem>>, vector<1x2x128xf32>,
    %848 = tpu.concatenate %807, %25, %839, %26 in 1 : vector<2x32xf32>, vector<2x96xf32>, vector<2x8xf32>, vector<2x120xf32> -> vector<2x256xf32>
    %849 = arith.index_cast %c7_i32 : i32 to index
    %c0_307 = arith.constant 0 : index
    %c0_308 = arith.constant 0 : index
    %850 = vector.load %arg20[%849, %c0_307, %c0_308] : memref<8x2x256xf32, #tpu.memory_space<vmem>>, vector<1x2x256xf32>
    %851 = vector.shape_cast %850 : vector<1x2x256xf32> to vector<2x256xf32>
    %852 = vector.shape_cast %848 : vector<2x256xf32> to vector<1x2x256xf32>
    tpu.vector_store %arg20[%849, %c0_307, %c0_308], %852 {strides = array<i32>} : memref<8x2x256xf32, #tpu.memory_space<vmem>>, vector<1x2x256xf32>,
    %c8_i32 = arith.constant 8 : i32
    %c0_309 = arith.constant 0 : index
    %c0_310 = arith.constant 0 : index
    %853 = vector.load %arg21[%c0_309, %c0_310] : memref<2x8xf32, #tpu.memory_space<vmem>>, vector<2x8xf32>
    tpu.vector_store %arg21[%c0_309, %c0_310], %839 {strides = array<i32>} : memref<2x8xf32, #tpu.memory_space<vmem>>, vector<2x8xf32>,
    %c0_311 = arith.constant 0 : index
    %c0_312 = arith.constant 0 : index
    %854 = vector.load %arg22[%c0_311, %c0_312] : memref<2x32xf32, #tpu.memory_space<vmem>>, vector<2x32xf32>
    tpu.vector_store %arg22[%c0_311, %c0_312], %807 {strides = array<i32>} : memref<2x32xf32, #tpu.memory_space<vmem>>, vector<2x32xf32>,
    return
  }
  func.func @transform_0(%arg0: i32, %arg1: i32) -> (i32, i32, i32) {
    %c0_i32 = arith.constant 0 : i32
    %c0_i32_0 = arith.constant 0 : i32
    return %arg1, %arg0, %c0_i32 : i32, i32, i32
  }
  func.func @transform_1(%arg0: i32, %arg1: i32) -> (i32, i32, i32) {
    %c0_i32 = arith.constant 0 : i32
    %c0_i32_0 = arith.constant 0 : i32
    return %arg1, %arg0, %c0_i32 : i32, i32, i32
  }
  func.func @transform_2(%arg0: i32, %arg1: i32) -> (i32, i32, i32) {
    %c0_i32 = arith.constant 0 : i32
    %c0_i32_0 = arith.constant 0 : i32
    return %arg1, %arg0, %c0_i32 : i32, i32, i32
  }
  func.func @transform_3(%arg0: i32, %arg1: i32) -> (i32, i32) {
    %c0_i32 = arith.constant 0 : i32
    %c0_i32_0 = arith.constant 0 : i32
    return %arg0, %c0_i32 : i32, i32
  }
  func.func @transform_4(%arg0: i32, %arg1: i32) -> (i32, i32) {
    %c0_i32 = arith.constant 0 : i32
    %c0_i32_0 = arith.constant 0 : i32
    return %arg0, %c0_i32 : i32, i32
  }
  func.func @transform_5(%arg0: i32, %arg1: i32) -> (i32, i32) {
    %c0_i32 = arith.constant 0 : i32
    %c0_i32_0 = arith.constant 0 : i32
    %c0_i32_1 = arith.constant 0 : i32
    return %c0_i32, %c0_i32_0 : i32, i32
  }
  func.func @transform_6(%arg0: i32, %arg1: i32) -> (i32, i32) {
    %c0_i32 = arith.constant 0 : i32
    %c0_i32_0 = arith.constant 0 : i32
    %c0_i32_1 = arith.constant 0 : i32
    return %c0_i32, %c0_i32_0 : i32, i32
  }
  func.func @transform_7(%arg0: i32, %arg1: i32) -> (i32, i32) {
    %c0_i32 = arith.constant 0 : i32
    %c0_i32_0 = arith.constant 0 : i32
    %c0_i32_1 = arith.constant 0 : i32
    return %c0_i32, %c0_i32_0 : i32, i32
  }
  func.func @transform_8(%arg0: i32, %arg1: i32) -> (i32, i32) {
    %c0_i32 = arith.constant 0 : i32
    %c0_i32_0 = arith.constant 0 : i32
    %c0_i32_1 = arith.constant 0 : i32
    return %c0_i32, %c0_i32_0 : i32, i32
  }
  func.func @transform_9(%arg0: i32, %arg1: i32) -> (i32, i32) {
    %c0_i32 = arith.constant 0 : i32
    %c0_i32_0 = arith.constant 0 : i32
    %c0_i32_1 = arith.constant 0 : i32
    return %c0_i32, %c0_i32_0 : i32, i32
  }
  func.func @transform_10(%arg0: i32, %arg1: i32) -> (i32, i32) {
    %c0_i32 = arith.constant 0 : i32
    %c0_i32_0 = arith.constant 0 : i32
    %c0_i32_1 = arith.constant 0 : i32
    return %c0_i32, %c0_i32_0 : i32, i32
  }
  func.func @transform_11(%arg0: i32, %arg1: i32) -> (i32, i32) {
    %c0_i32 = arith.constant 0 : i32
    %c0_i32_0 = arith.constant 0 : i32
    %c0_i32_1 = arith.constant 0 : i32
    return %c0_i32, %c0_i32_0 : i32, i32
  }
  func.func @transform_12(%arg0: i32, %arg1: i32) -> (i32, i32) {
    %c0_i32 = arith.constant 0 : i32
    %c0_i32_0 = arith.constant 0 : i32
    %c0_i32_1 = arith.constant 0 : i32
    return %c0_i32, %c0_i32_0 : i32, i32
  }
  func.func @transform_13(%arg0: i32, %arg1: i32) -> (i32, i32) {
    %c0_i32 = arith.constant 0 : i32
    %c0_i32_0 = arith.constant 0 : i32
    %c0_i32_1 = arith.constant 0 : i32
    return %c0_i32, %c0_i32_0 : i32, i32
  }
  func.func @transform_14(%arg0: i32, %arg1: i32) -> (i32, i32) {
    %c0_i32 = arith.constant 0 : i32
    %c0_i32_0 = arith.constant 0 : i32
    %c0_i32_1 = arith.constant 0 : i32
    return %c0_i32, %c0_i32_0 : i32, i32
  }
  func.func @transform_15(%arg0: i32, %arg1: i32) -> (i32, i32) {
    %c0_i32 = arith.constant 0 : i32
    %c0_i32_0 = arith.constant 0 : i32
    %c0_i32_1 = arith.constant 0 : i32
    return %c0_i32, %c0_i32_0 : i32, i32
  }
  func.func @transform_16(%arg0: i32, %arg1: i32) -> (i32, i32) {
    %c0_i32 = arith.constant 0 : i32
    %c0_i32_0 = arith.constant 0 : i32
    %c0_i32_1 = arith.constant 0 : i32
    return %c0_i32, %c0_i32_0 : i32, i32
  }
  func.func @transform_17(%arg0: i32, %arg1: i32) -> (i32, i32, i32) {
    %c0_i32 = arith.constant 0 : i32
    %c0_i32_0 = arith.constant 0 : i32
    return %arg1, %arg0, %c0_i32 : i32, i32, i32
  }
  func.func @transform_18(%arg0: i32, %arg1: i32) -> (i32, i32, i32) {
    %c0_i32 = arith.constant 0 : i32
    %c0_i32_0 = arith.constant 0 : i32
    return %arg1, %arg0, %c0_i32 : i32, i32, i32
  }
}

</mosaic_0001>

<bundles_post_ra>
// kernel: tpu_custom_call.1
= control target key start
LH: loop header
LB: loop body
LE: loop exit
PB: predicated region body
PF: predicated region fallthrough
CT: control target
= control target key end

     0   :  { %s5635_s0 = inlined_call_operand.hbm [shape: bf16[8,2,32], index: 0, kind: input, shape index: {}]   ;;  %s5636_s1 = inlined_call_operand.vmem [shape: bf16[8,2,4], index: 1, kind: input, shape index: {}]   ;;  %s5637_s2 = inlined_call_operand.hbm [shape: f32[8,2,8], index: 2, kind: input, shape index: {}]   ;;  %s5638_s3 = inlined_call_operand.hbm [shape: f32[2,8], index: 3, kind: input, shape index: {}]   ;;  %s5639_s4 = inlined_call_operand.hbm [shape: f32[2,32], index: 4, kind: input, shape index: {}]   ;;  %s5640_s5 = inlined_call_operand.hbm [shape: bf16[8,32], index: 5, kind: input, shape index: {}]   ;;  %s5641_s6 = inlined_call_operand.hbm [shape: bf16[4,32], index: 6, kind: input, shape index: {}]   ;;  %s5642_s7 = inlined_call_operand.hbm [shape: f32[1,32], index: 7, kind: input, shape index: {}]   ;;  %s5643_s8 = inlined_call_operand.vmem [shape: bf16[32,96], index: 8, kind: input, shape index: {}]   ;;  %s5644_s9 = inlined_call_operand.hbm [shape: bf16[32,96], index: 9, kind: input, shape index: {}]   ;;  %s5645_s10 = inlined_call_operand.hbm [shape: f32[1,96], index: 10, kind: input, shape index: {}]   ;;  %s5646_s11 = inlined_call_operand.hbm [shape: f32[1,96], index: 11, kind: input, shape index: {}]   ;;  %s5647_s12 = inlined_call_operand.vmem [shape: bf16[32,64], index: 12, kind: input, shape index: {}]   ;;  %s5648_s13 = inlined_call_operand.hbm [shape: bf16[32,64], index: 13, kind: input, shape index: {}]   ;;  %s5649_s14 = inlined_call_operand.vmem [shape: f32[1,64], index: 14, kind: input, shape index: {}]   ;;  %s5650_s15 = inlined_call_operand.hbm [shape: bf16[64,256], index: 15, kind: input, shape index: {}]   ;;  %s5651_s16 = inlined_call_operand.vmem [shape: f32[1,256], index: 16, kind: input, shape index: {}]   ;;  %s5652_s17 = inlined_call_operand.hbm [shape: f32[8,2,256], index: 17, kind: output, shape index: {0}]   ;;  %s5653_s18 = inlined_call_operand.hbm [shape: f32[8,2,256], index: 18, kind: output, shape index: {1}]  }
   0x1   :  { %5655 = sst [smem:[#allocation36_spill]] %s5635_s0 }
   0x2   :  { %5656 = sst [smem:[#allocation37_spill]] %s5636_s1 }
   0x3   :  { %5657 = sst [smem:[#allocation38_spill]] %s5637_s2 }
   0x4   :  { %24 = vsyncpa [#allocation5], 0 }
   0x5   :  { %25 = vsyncpa [#allocation8], 0 }
   0x6   :  { %26 = vsyncpa [#allocation11], 0 }
   0x7   :  { %27 = vsyncpa [#allocation14], 0 }
   0x8   :  { %28 = vsyncpa [#allocation17], 0 }
   0x9   :  { %29 = vsyncpa [#allocation20], 0 }
   0xa   :  { %30 = vsyncpa [#allocation23], 0 }
   0xb   :  { %31 = vsyncpa [#allocation6], 0 }
   0xc   :  { %32 = vsyncpa [#allocation26], 0  ;;  %s4687_s27 = smov [#allocation7]  }
   0xd   :  { %s52_s28 = sshll.u32 %s4687_s27, 4  ;;  %s53_s28 = int_to_ptr.vmem [resolvable:$true] %s52_s28 }
   0xe   :  { %s4397_s29 = scalar_lea.vmem %s53_s28, 256  ;;  %p4402_p1 = scmp.lt.s32.totalorder %s53_s28, %s53_s28 }
   0xf   :  { %p4398_p0 = scmp.ne.s32.totalorder %s53_s28, %s4397_s29  ;;  %p4403_p2 = scmp.lt.s32.totalorder %s4397_s29, %s4397_s29 }
  0x11   :  { %p4404_p3 = por %p4403_p2, %p4402_p1 }
  0x13   :  { %p4405_p4 = pnand %p4404_p3, %p4398_p0 }
  0x15   :  { %4408 = shalt.err (!%p4405_p4)
}
  0x16   :  { %s4688_s30 = smov 32   ;;  %s4689_s0 = smov 2  }
  0x17   :  { %s5658_s20 = sld [smem:[#allocation38_spill]]  ;;  %s4690_s21 = smov [#allocation10]  }
  0x18   :  { %s75_s22 = sshll.u32 %s4690_s21, 4  ;;  %s4691_s2 = smov [#allocation13]   ;;  %s76_s22 = int_to_ptr.vmem [resolvable:$true] %s75_s22 }
  0x19   :  { %s95_s23 = sshll.u32 %s4691_s2, 4  ;;  %s4417_s24 = scalar_lea.vmem %s76_s22, 32  ;;  %s96_s23 = int_to_ptr.vmem [resolvable:$true] %s95_s23 }
  0x1a   :  { %p4418_p5 = scmp.ne.s32.totalorder %s76_s22, %s4417_s24  ;;  %p4422_p6 = scmp.lt.s32.totalorder %s76_s22, %s76_s22 }
  0x1b   :  { %p4423_p7 = scmp.lt.s32.totalorder %s4417_s24, %s4417_s24 }
  0x1d   :  { %58 = dma.hbm_to_vmem [thread:$0]  %s5658_s20, 256, %s53_s28, [#allocation8], %s4688_s30, %s4688_s30, %s4689_s0  }
  0x1e   :  { %p4424_p8 = por %p4423_p7, %p4422_p6 }
  0x20   :  { %p4425_p9 = pnand %p4424_p8, %p4418_p5 }
  0x22   :  { %4428 = shalt.err (!%p4425_p9)
}
  0x23   :  { %78 = dma.hbm_to_vmem [thread:$0]  %s5639_s4, 32, %s76_s22, [#allocation11]  }
  0x24   :  { %s4437_s27 = scalar_lea.vmem %s96_s23, 32  ;;  %p4442_p11 = scmp.lt.s32.totalorder %s96_s23, %s96_s23 }
  0x25   :  { %p4438_p10 = scmp.ne.s32.totalorder %s96_s23, %s4437_s27  ;;  %p4443_p12 = scmp.lt.s32.totalorder %s4437_s27, %s4437_s27 }
  0x27   :  { %p4444_p13 = por %p4443_p12, %p4442_p11 }
  0x29   :  { %p4445_p0 = pnand %p4444_p13, %p4438_p10 }
  0x2b   :  { %4448 = shalt.err (!%p4445_p0)
}
  0x2c   :  { %98 = dma.hbm_to_vmem [thread:$0]  %s5641_s6, 32, %s96_s23, [#allocation14]  }
  0x2d   :  { %s4692_s0 = smov [#allocation16]  }
  0x2e   :  { %s116_s19 = sshll.u32 %s4692_s0, 4  ;;  %s117_s19 = int_to_ptr.vmem [resolvable:$true] %s116_s19 }
  0x2f   :  { %s4457_s1 = scalar_lea.vmem %s117_s19, 256  ;;  %p4462_p2 = scmp.lt.s32.totalorder %s117_s19, %s117_s19 }
  0x30   :  { %p4458_p1 = scmp.ne.s32.totalorder %s117_s19, %s4457_s1  ;;  %p4463_p3 = scmp.lt.s32.totalorder %s4457_s1, %s4457_s1 }
  0x32   :  { %p4464_p4 = por %p4463_p3, %p4462_p2 }
  0x34   :  { %p4465_p5 = pnand %p4464_p4, %p4458_p1 }
  0x36   :  { %4468 = shalt.err (!%p4465_p5)
}
  0x37   :  { %s4693_s4 = smov 64   ;;  %s4694_s20 = smov 4  }
  0x38   :  { %122 = dma.hbm_to_vmem [thread:$0]  %s5644_s9, 256, %s117_s19, [#allocation17], %s4693_s4, %s4693_s4, %s4694_s20  }
  0x39   :  { %s4695_s6 = smov [#allocation19]   ;;  %s4696_s23 = smov [#allocation4]  }
  0x3a   :  { %s139_s2 = sshll.u32 %s4695_s6, 4  ;;  %s38_s24 = sshll.u32 %s4696_s23, 4  ;;  %s140_s2 = int_to_ptr.vmem [resolvable:$true] %s139_s2  ;;  %s39_s24 = int_to_ptr.vmem [resolvable:$true] %s38_s24 }
  0x3b   :  { %s4477_s25 = scalar_lea.vmem %s140_s2, 16  ;;  %s4481_s26 = scalar_lea.vmem %s140_s2, 32 }
  0x3c   :  { %p4478_p6 = scmp.ne.s32.totalorder %s140_s2, %s4477_s25  ;;  %p4482_p7 = scmp.lt.s32.totalorder %s140_s2, %s140_s2 }
  0x3d   :  { %p4483_p8 = scmp.lt.s32.totalorder %s4481_s26, %s4477_s25 }
  0x3f   :  { %p4484_p9 = por %p4483_p8, %p4482_p7 }
  0x41   :  { %p4485_p10 = pnand %p4484_p9, %p4478_p6 }
  0x43   :  { %4488 = shalt.err (!%p4485_p10)
}
  0x44   :  { %142 = dma.hbm_to_vmem [thread:$0]  %s5646_s11, 16, %s140_s2, [#allocation20]  }
  0x45   :  { %s4497_s29 = scalar_lea.vmem %s39_s24, 128  ;;  %p4502_p12 = scmp.lt.s32.totalorder %s39_s24, %s39_s24 }
  0x46   :  { %p4498_p11 = scmp.ne.s32.totalorder %s39_s24, %s4497_s29  ;;  %p4503_p13 = scmp.lt.s32.totalorder %s4497_s29, %s4497_s29 }
  0x48   :  { %p4504_p0 = por %p4503_p13, %p4502_p12 }
  0x4a   :  { %p4505_p1 = pnand %p4504_p0, %p4498_p11 }
  0x4c   :  { %4508 = shalt.err (!%p4505_p1)
}
  0x4d   :  { %s4697_s9 = smov 16   ;;  %s4698_s0 = smov 1  }
  0x4e   :  { %s5659_s21 = sld [smem:[#allocation36_spill]]  ;;  %s4699_s22 = smov [#allocation9]  }
  0x4f   :  { %s65_s6 = sshll.u32 %s4699_s22, 4  ;;  %s4700_s23 = smov [#allocation12]   ;;  %s66_s6 = int_to_ptr.vmem [resolvable:$true] %s65_s6 }
  0x50   :  { %s85_s25 = sshll.u32 %s4700_s23, 4  ;;  %s4517_s11 = scalar_lea.vmem %s66_s6, 32  ;;  %s86_s25 = int_to_ptr.vmem [resolvable:$true] %s85_s25 }
  0x51   :  { %p4518_p2 = scmp.ne.s32.totalorder %s66_s6, %s4517_s11  ;;  %p4522_p3 = scmp.lt.s32.totalorder %s66_s6, %s66_s6 }
  0x52   :  { %p4523_p4 = scmp.lt.s32.totalorder %s4517_s11, %s4517_s11 }
  0x54   :  { %44 = dma.hbm_to_vmem [thread:$0]  %s5659_s21, 128, %s39_s24, [#allocation5], %s4697_s9, %s4697_s9, %s4698_s0  }
  0x55   :  { %p4524_p5 = por %p4523_p4, %p4522_p3 }
  0x57   :  { %p4525_p6 = pnand %p4524_p5, %p4518_p2 }
  0x59   :  { %4528 = shalt.err (!%p4525_p6)
}
  0x5a   :  { %68 = dma.hbm_to_vmem [thread:$0]  %s5638_s3, 32, %s66_s6, [#allocation8]  }
  0x5b   :  { %s4537_s27 = scalar_lea.vmem %s86_s25, 64  ;;  %p4542_p8 = scmp.lt.s32.totalorder %s86_s25, %s86_s25 }
  0x5c   :  { %p4538_p7 = scmp.ne.s32.totalorder %s86_s25, %s4537_s27  ;;  %p4543_p9 = scmp.lt.s32.totalorder %s4537_s27, %s4537_s27 }
  0x5e   :  { %p4544_p10 = por %p4543_p9, %p4542_p8 }
  0x60   :  { %p4545_p11 = pnand %p4544_p10, %p4538_p7 }
  0x62   :  { %4548 = shalt.err (!%p4545_p11)
}
  0x63   :  { %88 = dma.hbm_to_vmem [thread:$0]  %s5640_s5, 64, %s86_s25, [#allocation11]  }
  0x64   :  { %s4701_s29 = smov [#allocation15]   ;;  %s4702_s0 = smov [#allocation18]  }
  0x65   :  { %s105_s9 = sshll.u32 %s4701_s29, 4  ;;  %s129_s19 = sshll.u32 %s4702_s0, 4  ;;  %s106_s9 = int_to_ptr.vmem [resolvable:$true] %s105_s9  ;;  %s130_s19 = int_to_ptr.vmem [resolvable:$true] %s129_s19 }
  0x66   :  { %s4557_s1 = scalar_lea.vmem %s106_s9, 16  ;;  %s4561_s3 = scalar_lea.vmem %s106_s9, 32 }
  0x67   :  { %p4558_p12 = scmp.ne.s32.totalorder %s106_s9, %s4557_s1  ;;  %p4562_p13 = scmp.lt.s32.totalorder %s106_s9, %s106_s9 }
  0x68   :  { %p4563_p0 = scmp.lt.s32.totalorder %s4561_s3, %s4557_s1 }
  0x6a   :  { %p4564_p1 = por %p4563_p0, %p4562_p13 }
  0x6c   :  { %p4565_p2 = pnand %p4564_p1, %p4558_p12 }
  0x6e   :  { %4568 = shalt.err (!%p4565_p2)
}
  0x6f   :  { %108 = dma.hbm_to_vmem [thread:$0]  %s5642_s7, 16, %s106_s9, [#allocation14]  }
  0x70   :  { %s4577_s6 = scalar_lea.vmem %s130_s19, 16  ;;  %s4581_s5 = scalar_lea.vmem %s130_s19, 32 }
  0x71   :  { %p4578_p3 = scmp.ne.s32.totalorder %s130_s19, %s4577_s6  ;;  %p4582_p4 = scmp.lt.s32.totalorder %s130_s19, %s130_s19 }
  0x72   :  { %p4583_p5 = scmp.lt.s32.totalorder %s4581_s5, %s4577_s6 }
  0x74   :  { %p4584_p6 = por %p4583_p5, %p4582_p4 }
  0x76   :  { %p4585_p7 = pnand %p4584_p6, %p4578_p3 }
  0x78   :  { %4588 = shalt.err (!%p4585_p7)
}
  0x79   :  { %132 = dma.hbm_to_vmem [thread:$0]  %s5645_s10, 16, %s130_s19, [#allocation17]  }
  0x7a   :  { %s4703_s11 = smov [#allocation21]   ;;  %s4704_s26 = smov [#allocation22]  }
  0x7b   :  { %s150_s2 = sshll.u32 %s4703_s11, 4  ;;  %s164_s27 = sshll.u32 %s4704_s26, 4  ;;  %s151_s2 = int_to_ptr.vmem [resolvable:$true] %s150_s2  ;;  %s165_s27 = int_to_ptr.vmem [resolvable:$true] %s164_s27 }
  0x7c   :  { %s4597_s24 = scalar_lea.vmem %s151_s2, 256  ;;  %p4602_p9 = scmp.lt.s32.totalorder %s151_s2, %s151_s2 }
  0x7d   :  { %p4598_p8 = scmp.ne.s32.totalorder %s151_s2, %s4597_s24  ;;  %p4603_p10 = scmp.lt.s32.totalorder %s4597_s24, %s4597_s24 }
  0x7f   :  { %p4604_p11 = por %p4603_p10, %p4602_p9 }
  0x81   :  { %p4605_p12 = pnand %p4604_p11, %p4598_p8 }
  0x83   :  { %4608 = shalt.err (!%p4605_p12)
}
  0x84   :  { %156 = dma.hbm_to_vmem [thread:$0]  %s5648_s13, 256, %s151_s2, [#allocation20], %s4693_s4, %s4693_s4, %s4694_s20  }
  0x85   :  { %s4617_s10 = scalar_lea.vmem %s165_s27, 1024  ;;  %p4622_p0 = scmp.lt.s32.totalorder %s165_s27, %s165_s27 }
  0x86   :  { %p4618_p13 = scmp.ne.s32.totalorder %s165_s27, %s4617_s10  ;;  %p4623_p1 = scmp.lt.s32.totalorder %s4617_s10, %s4617_s10 }
  0x88   :  { %p4624_p2 = por %p4623_p1, %p4622_p0 }
  0x8a   :  { %p4625_p3 = pnand %p4624_p2, %p4618_p13 }
  0x8c   :  { %4628 = shalt.err (!%p4625_p3)
}
  0x8d   :  { %s4705_s29 = smov 128   ;;  %s4706_s9 = smov 8  }
  0x8e   :  { %170 = dma.hbm_to_vmem [thread:$0]  %s5650_s15, 1024, %s165_s27, [#allocation23], %s4705_s29, %s4705_s29, %s4706_s9  }
  0x8f   :  { %4669 = dma.done.wait [#allocation5], 128  }
  0x90   :  { %4670 = vsyncadd [#allocation5], 4294967168 }
  0x91   :  { %4671 = dma.done.wait [#allocation8], 288  }
  0x92   :  { %4672 = vsyncadd [#allocation8], 4294967008 }
  0x93   :  { %4673 = dma.done.wait [#allocation11], 96  }
  0x94   :  { %4674 = vsyncadd [#allocation11], 4294967200 }
  0x95   :  { %4675 = dma.done.wait [#allocation14], 48  }
  0x96   :  { %4676 = vsyncadd [#allocation14], 4294967248 }
  0x97   :  { %4677 = dma.done.wait [#allocation17], 272  }
  0x98   :  { %4678 = vsyncadd [#allocation17], 4294967024 }
  0x99   :  { %4679 = dma.done.wait [#allocation20], 272  }
  0x9a   :  { %4680 = vsyncadd [#allocation20], 4294967024 }
  0x9b   :  { %4681 = dma.done.wait [#allocation23], 1024  }
  0x9c   :  { %4682 = vsyncadd [#allocation23], 4294966272  ;;  %v4707_v0 = vmov 0.0   ;;  %vm4708_vm0 = vmmov 0   ;;  %vm296_vm1 = vcmask 1041408   ;;  %vm344_vm2 = vcmask 1043456  }
  0x9d   :  { %3874 = vmatprep.subr.bf16.mxu0 %v4707_v0  ;;  %3876 = vmatprep.mubr.msk.bf16.mxu0 %vm4708_vm0, %v4707_v0  ;;  %vm292_vm3 = vcmask 31744   ;;  %vm215_vm4 = vcmask 58368   ;;  %v221_v1 = vld [vmem:[#allocation13] sm:$0x3]  ;;  %s5660_s1 = sld [smem:[#allocation37_spill]]  ;;  %vm340_vm5 = vcmask 64512  }
  0x9e   :  { %3880 = vmatprep.subr.bf16.mxu1 %v4707_v0  ;;  %3882 = vmatprep.mubr.msk.bf16.mxu1 %vm4708_vm0, %v4707_v0  ;;  %v220_v3 = vld [vmem:[#allocation12] sm:$0xf]  ;;  %v4863_v4 = vsel %vm296_vm1, %v221_v1, 0  ;;  %v214_v6 = vld [vmem:[#allocation9] sm:$0x3]  ;;  %v4881_v9 = vld [vmem:[%s5643_s8 + $0x8] sm:$0xff]  }
  0x9f   :  { %v4865_v5 = vsel %vm344_vm2, %v220_v3, 0  ;;  %3875 = vmatpush3.bf16.msra.mxu0 %v4863_v4  ;;  %216 = vst.msk [vmem:[#allocation2] sm:$0x3] %vm215_vm4, %v214_v6  ;;  %v4888_v10 = vld [vmem:[%s5643_s8] sm:$0xff]   ;;  %v217_v11 = vld [vmem:[#allocation10] sm:$0x3] }
  0xa0   :  { %3881 = vmatpush3.bf16.msra.mxu1 %v4865_v5  ;;  %3902 = vmatprep.subr.bf16.mxu0 %v4707_v0  ;;  %vm218_vm6 = vcmask 254976   ;;  %v4893_v16 = vld [vmem:[#allocation15] ss:$0 sm:$0xff]  ;;  %vm408_vm8 = vcmask 261120   ;;  %v4896_v28 = vld [vmem:[#allocation16 + $0x8] sm:$0xff]   ;;  %v4900_v30 = vld [vmem:[#allocation16] sm:$0xff]  }
  0xa1   :  { %3886 = vmatprep.subr.bf16.mxu1 %v4707_v0  ;;  %219 = vst.msk [vmem:[#allocation3] sm:$0x3] %vm218_vm6, %v217_v11  ;;  %v4910_v37 = vld [vmem:[#allocation19] ss:$0 sm:$0xff]  ;;  %v4914_v43 = vld [vmem:[#allocation18] ss:$0 sm:$0xff] }
  0xa2   :  { %v4918_v54 = vld [vmem:[#allocation21 + $0x8] sm:$0xff]   ;;  %v4926_v57 = vld [vmem:[#allocation21] sm:$0xff]   ;;  %s4709_s2 = smov 96   ;;  %vm698_vm10 = vcmask 523264  }
  0xa3   :  { %v289_v2 = vld [vmem:[%s5660_s1] sm:$0x1]  ;;  %v4923_v55 = vld [vmem:[%s5647_s12 + $0x8] sm:$0xff]   ;;  %v288_v59 = vld [vmem:[#allocation4] sm:$0x1] }
  0xa4   :  { %3877 = vmatmul.mubr.msk.bf16.vlgmr.msra.gmra.mxu0 %vm292_vm3, %v289_v2  ;;  %v4932_v58 = vld [vmem:[%s5647_s12] sm:$0xff]  }
  0xa5   :  { %3906 = vmatprep.mubr.msk.bf16.mxu0 %vm4708_vm0, %v4707_v0  ;;  %3903 = vmatpush3.bf16.msra.mxu0 %v4918_v54 }
  0xa6   :  { %v286_v7 = vld [vmem:[#allocation2] sm:$0x3]  ;;  %3904 = vmatprep.subr.bf16.mxu0 %v4707_v0 }
  0xa7   :  { %v291_v8 = vpack.c.bf16 %v286_v7, %v286_v7 }
  0xa8   :  { %v287_v31 = vld [vmem:[#allocation3] sm:$0x3] }
  0xa9   :  { %3883 = vmatmul.mubr.msk.bf16.vlgmr.msra.gmra.mxu1 %vm340_vm5, %v291_v8  ;;  %v452_v32 = vpack.c.bf16 %v287_v31, %v287_v31  ;;  %3905 = vmatpush3.bf16.msra.mxu0 %v4926_v57 }
  0xaa   :  { %3890 = vmatprep.mubr.msk.bf16.mxu1 %vm4708_vm0, %v4707_v0  ;;  %3887 = vmatpush3.bf16.msra.mxu1 %v4881_v9 }
  0xab   :  { %3888 = vmatprep.subr.bf16.mxu1 %v4707_v0 }
  0xac   :  { %3907 = vmatmul.mubr.msk.bf16.vlgmr.msra.gmra.mxu0 %vm408_vm8, %v288_v59 }
  0xae   :  { %3889 = vmatpush3.bf16.msra.mxu1 %v4888_v10 }
  0xaf   :  { %3894 = vmatprep.subr.bf16.mxu1 %v4707_v0 }
 0x164   :  { %v334_v12 = vpop.f32.mrf.mxu0 }
 0x166   :  { %v3878_v13 = vpop.f32.mrf.mxu0 }
 0x167   :  { %v4955_v13 = vld [vmem:[#allocation22 + $0x34] ss:$8 sps:$4 sm:$0xff]  }
 0x168   :  { %v337_v14 = vpop.f32.mrf.mxu0  ;;  %710 = vmatprep.subr.bf16.mxu0 %v4955_v13 }
 0x169   :  { %v382_v17 = vpop.f32.mrf.mxu1  ;;  %v4957_v14 = vld [vmem:[#allocation22 + $0x30] ss:$8 sps:$4 sm:$0xff]  }
 0x16a   :  { %v3879_v15 = vpop.f32.mrf.mxu0  ;;  %v383_v18 = vadd.f32 %v382_v17, %v334_v12  ;;  %711 = vmatpush1.bf16.msra.mxu0 %v4957_v14  ;;  %v4963_v17 = vld [vmem:[#allocation22 + $0x20] ss:$8 sps:$4 sm:$0xff]  }
 0x16b   :  { %v3884_v19 = vpop.f32.mrf.mxu1  ;;  %v4961_v15 = vld [vmem:[#allocation22 + $0x24] ss:$8 sps:$4 sm:$0xff]  }
 0x16c   :  { %v388_v20 = vadd.f32 %v4893_v16, %v383_v18  ;;  %v586_v6 = vpop.f32.mrf.mxu0  ;;  %712 = vmatprep.subr.bf16.mxu0 %v4961_v15  ;;  %v4967_v18 = vld [vmem:[#allocation22 + $0x14] ss:$8 sps:$4 sm:$0xff]   ;;  %v4969_v19 = vld [vmem:[#allocation22 + $0x10] ss:$8 sps:$4 sm:$0xff]  }
 0x16d   :  { %v385_v21 = vpop.f32.mrf.mxu1 }
 0x16e   :  { %v390_v22 = vmin.f32 %v388_v20, 0.0  ;;  %vm389_vm7 = vcmp.gt.f32.partialorder %v388_v20, 0.0  ;;  %v3908_v7 = vpop.f32.mrf.mxu0  ;;  %713 = vmatpush1.bf16.msra.mxu0 %v4963_v17  ;;  %v4975_v21 = vld [vmem:[#allocation22] ss:$8 sps:$4 sm:$0xff]  }
 0x16f   :  { %v3885_v23 = vpop.f32.mrf.mxu1  ;;  %714 = vmatprep.subr.bf16.mxu0 %v4967_v18 }
 0x170   :  { %v391_v24 = vmul.f32 1.442695, %v390_v22  ;;  %v589_v8 = vpop.f32.mrf.mxu0  ;;  %v4710_v22 = vmov 0   ;;  %v290_v23 = vld [vmem:[#allocation7] sm:$0x3] }
 0x171   :  { %734 = vmatprep.mubr.bf16.mxu0 %v4710_v22 }
 0x172   :  { %4273 = vpow2.f32 %v391_v24  ;;  %v3909_v11 = vpop.f32.mrf.mxu0  ;;  %715 = vmatpush1.bf16.msra.mxu0 %v4969_v19  ;;  %v4985_v24 = vld [vmem:[%s5649_s14] ss:$0 sm:$0xff] }
 0x17f   :  { %v4274_v25 = vpop.eup %4273 }
 0x180   :  { %v3645_v26 = vadd.f32 -1.0, %v4274_v25 }
 0x182   :  { %v394_v27 = vsel %vm389_vm7, %v388_v20, %v3645_v26  ;;  %v4973_v20 = vld [vmem:[#allocation22 + $0x4] ss:$8 sps:$4 sm:$0xff]  }
 0x183   :  { %v395_v29 = vpack.c.bf16 %v394_v27, %v394_v27  ;;  %716 = vmatprep.subr.bf16.mxu0 %v4973_v20 }
 0x184   :  { %717 = vmatpush1.bf16.msra.mxu0 %v4975_v21 }
 0x185   :  { %3891 = vmatmul.mubr.msk.bf16.vlgmr.msra.gmra.mxu1 %vm408_vm8, %v395_v29  ;;  %3930 = vmatprep.subr.bf16.mxu0 %v4707_v0 }
 0x186   :  { %3895 = vmatpush3.bf16.msra.mxu1 %v4896_v28  ;;  %3898 = vmatprep.mubr.msk.bf16.mxu1 %vm4708_vm0, %v4707_v0 }
 0x187   :  { %3896 = vmatprep.subr.bf16.mxu1 %v4707_v0 }
 0x18a   :  { %3897 = vmatpush3.bf16.msra.mxu1 %v4900_v30 }
 0x18b   :  { %3910 = vmatprep.subr.bf16.mxu1 %v4707_v0 }
 0x18d   :  { %3899 = vmatmul.mubr.msk.bf16.vlgmr.msra.gmra.mxu1 %vm408_vm8, %v452_v32 }
 0x18e   :  { %3914 = vmatprep.mubr.msk.bf16.mxu1 %vm4708_vm0, %v4707_v0  ;;  %3911 = vmatpush3.bf16.msra.mxu1 %v4923_v55 }
 0x18f   :  { %3912 = vmatprep.subr.bf16.mxu1 %v4707_v0 }
 0x192   :  { %3913 = vmatpush3.bf16.msra.mxu1 %v4932_v58 }
 0x193   :  { %3918 = vmatprep.subr.bf16.mxu1 %v4707_v0 }
 0x245   :  { %v446_v33 = vpop.f32.mrf.mxu1 }
 0x246   :  { %v447_v44 = vadd.f32 %v4914_v43, %v446_v33 }
 0x247   :  { %v3892_v34 = vpop.f32.mrf.mxu1 }
 0x249   :  { %v449_v35 = vpop.f32.mrf.mxu1 }
 0x24b   :  { %v3893_v36 = vpop.f32.mrf.mxu1 }
 0x24d   :  { %v502_v38 = vpop.f32.mrf.mxu1 }
 0x24e   :  { %v503_v39 = vadd.f32 %v4910_v37, %v502_v38 }
 0x24f   :  { %v3900_v40 = vpop.f32.mrf.mxu1 }
 0x250   :  { %514 = vrot.lane.b32.xlu0 %v503_v39, %s4693_s4  ;;  %v508_v45 = vadd.f32 %v503_v39, %v447_v44  ;;  %v3669_v40 = vld [vmem:[%s5660_s1 + $0x1] sm:$0x1] }
 0x251   :  { %v505_v41 = vpop.f32.mrf.mxu1 }
 0x252   :  { %v509_v46 = vmul.f32 0.5, %v508_v45  ;;  %v276_v41 = vlaneseq  ;;  %v274_v45 = vld [vmem:[%s5651_s16] sm:$0x3]  ;;  %s4711_s16 = smov 120  }
 0x253   :  { %v3901_v42 = vpop.f32.mrf.mxu1 }
 0x254   :  { %4275 = vtanh.f32 %v509_v46  ;;  %v277_v42 = vshrl.u32 %v276_v41, 7 }
 0x256   :  { %v282_v46 = vsub.s32 1, %v277_v42 }
 0x261   :  { %v4276_v47 = vpop.eup %4275 }
 0x262   :  { %v511_v48 = vadd.f32 1.0, %v4276_v47 }
 0x264   :  { %v512_v49 = vmul.f32 0.5, %v511_v48  ;;  %v5008_v48 = vrot.slane %v274_v45, %v282_v46 }
 0x266   :  { %v524_v61 = vsub.f32 1.0, %v512_v49 }
 0x2c2   :  { %v515_v50 = vpop.permute.xlu0 %514 }
 0x2c3   :  { %v517_v51 = vmul.f32 %v515_v50, %v512_v49 }
 0x2c5   :  { %519 = vrot.lane.b32.xlu0 %v517_v51, %s4693_s4 }
 0x337   :  { %v520_v52 = vpop.permute.xlu0 %519 }
 0x338   :  { %v522_v53 = vadd.f32 %v520_v52, %v447_v44  ;;  %v278_v44 = vsub.s32 0, %v277_v42 }
 0x33a   :  { %4277 = vtanh.f32 %v522_v53  ;;  %v5006_v47 = vrot.slane %v274_v45, %v278_v44 }
 0x347   :  { %v4278_v56 = vpop.eup %4277 }
 0x348   :  { %526 = vrot.lane.b32.xlu1 %v4278_v56, %s4709_s2 }
 0x34c   :  { %531 = vrot.lane.b32.xlu1 %v287_v31, %s4688_s30 }
 0x350   :  { %760 = vrot.lane.b32.xlu1 %v290_v23, %s4706_s9 }
 0x3ba   :  { %v527_v60 = vpop.permute.xlu1 %526 }
 0x3bb   :  { %v529_v63 = vmul.f32 %v527_v60, %v524_v61 }
 0x3be   :  { %v532_v62 = vpop.permute.xlu1 %531 }
 0x3bf   :  { %v534_v1 = vmul.f32 %v532_v62, %v512_v49 }
 0x3c1   :  { %v4942_v2 = vadd.f32 %v534_v1, %v529_v63 }
 0x3c3   :  { %v536_v3 = vpack.c.bf16 %v4942_v2, %v4942_v2 }
 0x3c5   :  { %593 = vrot.lane.b32.xlu0 %v536_v3, %s4709_s2 }
 0x437   :  { %v4947_v12 = vpop.permute.xlu0 %593 }
 0x438   :  { %3915 = vmatmul.mubr.msk.bf16.vlgmr.msra.gmra.mxu1 %vm408_vm8, %v4947_v12 }
 0x439   :  { %3919 = vmatpush3.bf16.msra.mxu1 %v4863_v4  ;;  %3920 = vmatprep.mubr.msk.bf16.mxu1 %vm4708_vm0, %v4707_v0 }
 0x43a   :  { %3924 = vmatprep.subr.bf16.mxu1 %v4707_v0 }
 0x440   :  { %3921 = vmatmul.mubr.msk.bf16.vlgmr.msra.gmra.mxu1 %vm292_vm3, %v3669_v40 }
 0x441   :  { %3925 = vmatpush3.bf16.msra.mxu1 %v4865_v5  ;;  %3926 = vmatprep.mubr.msk.bf16.mxu1 %vm4708_vm0, %v4707_v0 }
 0x442   :  { %3938 = vmatprep.subr.bf16.mxu1 %v4707_v0 }
 0x4f8   :  { %v644_v25 = vpop.f32.mrf.mxu1 }
 0x4f9   :  { %v645_v26 = vadd.f32 %v644_v25, %v586_v6 }
 0x4fa   :  { %v3916_v27 = vpop.f32.mrf.mxu1 }
 0x4fb   :  { %v650_v29 = vadd.f32 %v4985_v24, %v645_v26  ;;  %v761_v27 = vpop.permute.xlu1 %760 }
 0x4fc   :  { %v647_v31 = vpop.f32.mrf.mxu1 }
 0x4fd   :  { %v652_v32 = vmin.f32 %v650_v29, 0.0  ;;  %vm651_vm9 = vcmp.gt.f32.partialorder %v650_v29, 0.0 }
 0x4fe   :  { %v3917_v33 = vpop.f32.mrf.mxu1 }
 0x4ff   :  { %v653_v34 = vmul.f32 1.442695, %v652_v32 }
 0x501   :  { %4279 = vpow2.f32 %v653_v34  ;;  %v833_v34 = vpop.f32.mrf.mxu1 }
 0x50e   :  { %v4280_v35 = vpop.eup %4279 }
 0x50f   :  { %v3658_v36 = vadd.f32 -1.0, %v4280_v35  ;;  %v3922_v35 = vpop.f32.mrf.mxu1 }
 0x511   :  { %v656_v38 = vsel %vm651_vm9, %v650_v29, %v3658_v36  ;;  %v836_v36 = vpop.f32.mrf.mxu1 }
 0x512   :  { %v657_v39 = vpack.c.bf16 %v656_v38, %v656_v38 }
 0x513   :  { %v3923_v38 = vpop.f32.mrf.mxu1 }
 0x514   :  { %3667 = vmatmul.mubr.msk.bf16.vlgmr.msra.gmra.mxu0 %vm698_vm10, %v657_v39 }
 0x515   :  { %3931 = vmatpush3.bf16.msra.mxu0 %v4881_v9  ;;  %3934 = vmatprep.mubr.msk.bf16.mxu0 %vm4708_vm0, %v4707_v0 }
 0x516   :  { %3932 = vmatprep.subr.bf16.mxu0 %v4707_v0 }
 0x519   :  { %3933 = vmatpush3.bf16.msra.mxu0 %v4888_v10 }
 0x51a   :  { %3946 = vmatprep.subr.bf16.mxu0 %v4707_v0 }
 0x5d4   :  { %v736_v49 = vpop.f32.mrf.mxu0 }
 0x5d5   :  { %v737_v50 = vadd.f32 %v736_v49, %v5006_v47 }
 0x5d6   :  { %v738_v51 = vpop.f32.mrf.mxu0 }
 0x5d7   :  { %765 = vst [vmem:[#allocation24] sm:$0x3] %v737_v50  ;;  %v739_v52 = vadd.f32 %v738_v51, %v5008_v48 }
 0x5d8   :  { %v740_v53 = vpop.f32.mrf.mxu0 }
 0x5d9   :  { %v744_v56 = vand.u32 2147483647, %v739_v52  ;;  %v743_v23 = vmax.f32 %v739_v52, 0.0 }
 0x5da   :  { %v741_v59 = vpop.f32.mrf.mxu0 }
 0x5db   :  { %v745_v60 = vsub.f32 0.0, %v744_v56 }
 0x5dd   :  { %v746_v61 = vmul.f32 1.442695, %v745_v60 }
 0x5df   :  { %4281 = vpow2.f32 %v746_v61 }
 0x5ec   :  { %v4282_v62 = vpop.eup %4281 }
 0x5ed   :  { %v748_v63 = vadd.f32 1.0, %v4282_v62  ;;  %v751_v1 = vmul.f32 -0.5, %v4282_v62  ;;  %v754_v6 = vand.u32 2147483647, %v4282_v62 }
 0x5ef   :  { %4283 = vlog2.f32 %v748_v63  ;;  %v752_v3 = vadd.f32 1.0, %v751_v1  ;;  %vm755_vm11 = vcmp.lt.f32.partialorder %v754_v6, 0.0004427343 }
 0x5f1   :  { %v753_v11 = vmul.f32 %v4282_v62, %v752_v3 }
 0x5fc   :  { %v4284_v7 = vpop.eup %4283 }
 0x5fd   :  { %v750_v8 = vmul.f32 0.6931472, %v4284_v7 }
 0x5ff   :  { %v756_v25 = vsel %vm755_vm11, %v753_v11, %v750_v8 }
 0x600   :  { %v757_v26 = vadd.f32 %v756_v25, %v743_v23 }
 0x602   :  { %v758_v29 = vadd.f32 0.1, %v757_v26 }
 0x604   :  { %v763_v31 = vmul.f32 %v761_v27, %v758_v29  ;;  %766 = vst [vmem:[#allocation24 + $0x2] sm:$0x3] %v758_v29 }
 0x606   :  { %v5012_v32 = vadd.f32 %v763_v31, %v737_v50 }
 0x608   :  { %v795_v33 = vpack.c.bf16 %v5012_v32, %v5012_v32 }
 0x60a   :  { %840 = vrot.lane.b32.xlu0 %v795_v33, %s4711_s16 }
 0x67c   :  { %v841_v39 = vpop.permute.xlu0 %840 }
 0x67d   :  { %3927 = vmatmul.mubr.msk.bf16.vlgmr.msra.gmra.mxu1 %vm340_vm5, %v841_v39 }
 0x67e   :  { %3939 = vmatpush3.bf16.msra.mxu1 %v4896_v28  ;;  %3942 = vmatprep.mubr.msk.bf16.mxu1 %vm4708_vm0, %v4707_v0 }
 0x67f   :  { %3940 = vmatprep.subr.bf16.mxu1 %v4707_v0 }
 0x682   :  { %3941 = vmatpush3.bf16.msra.mxu1 %v4900_v30 }
 0x683   :  { %3954 = vmatprep.subr.bf16.mxu1 %v4707_v0 }
 0x685   :  { %3943 = vmatmul.mubr.msk.bf16.vlgmr.msra.gmra.mxu1 %vm408_vm8, %v4947_v12 }
 0x686   :  { %3955 = vmatpush3.bf16.msra.mxu1 %v4923_v55  ;;  %3958 = vmatprep.mubr.msk.bf16.mxu1 %vm4708_vm0, %v4707_v0 }
 0x687   :  { %3956 = vmatprep.subr.bf16.mxu1 %v4707_v0 }
 0x68a   :  { %3957 = vmatpush3.bf16.msra.mxu1 %v4932_v58 }
 0x68b   :  { %3962 = vmatprep.subr.bf16.mxu1 %v4707_v0 }
 0x73d   :  { %v879_v40 = vpop.f32.mrf.mxu1 }
 0x73e   :  { %v880_v41 = vadd.f32 %v879_v40, %v833_v34  ;;  %v790_v34 = vld [vmem:[#allocation4 + $0x1] sm:$0x1] }
 0x73f   :  { %v3928_v42 = vpop.f32.mrf.mxu1 }
 0x740   :  { %v885_v44 = vadd.f32 %v4893_v16, %v880_v41 }
 0x741   :  { %v882_v45 = vpop.f32.mrf.mxu1 }
 0x742   :  { %v887_v46 = vmin.f32 %v885_v44, 0.0  ;;  %vm886_vm12 = vcmp.gt.f32.partialorder %v885_v44, 0.0 }
 0x743   :  { %v3929_v49 = vpop.f32.mrf.mxu1 }
 0x744   :  { %v888_v12 = vmul.f32 1.442695, %v887_v46 }
 0x745   :  { %v970_v50 = vpop.f32.mrf.mxu1 }
 0x746   :  { %4285 = vpow2.f32 %v888_v12  ;;  %v971_v51 = vadd.f32 %v4910_v37, %v970_v50  ;;  %v794_v50 = vld [vmem:[#allocation7 + $0x2] sm:$0x3] }
 0x747   :  { %v3944_v52 = vpop.f32.mrf.mxu1 }
 0x748   :  { %982 = vrot.lane.b32.xlu1 %v971_v51, %s4693_s4 }
 0x749   :  { %v973_v53 = vpop.f32.mrf.mxu1 }
 0x74b   :  { %v3945_v56 = vpop.f32.mrf.mxu1 }
 0x753   :  { %v4286_v59 = vpop.eup %4285 }
 0x754   :  { %v3672_v60 = vadd.f32 -1.0, %v4286_v59 }
 0x756   :  { %v891_v61 = vsel %vm886_vm12, %v885_v44, %v3672_v60 }
 0x757   :  { %v892_v62 = vpack.c.bf16 %v891_v61, %v891_v61 }
 0x759   :  { %3935 = vmatmul.mubr.msk.bf16.vlgmr.msra.gmra.mxu0 %vm408_vm8, %v892_v62 }
 0x75a   :  { %3947 = vmatpush3.bf16.msra.mxu0 %v4918_v54  ;;  %3950 = vmatprep.mubr.msk.bf16.mxu0 %vm4708_vm0, %v4707_v0 }
 0x75b   :  { %3948 = vmatprep.subr.bf16.mxu0 %v4707_v0 }
 0x75e   :  { %3949 = vmatpush3.bf16.msra.mxu0 %v4926_v57 }
 0x75f   :  { %1109 = vmatprep.subr.bf16.mxu0 %v4955_v13 }
 0x761   :  { %3951 = vmatmul.mubr.msk.bf16.vlgmr.msra.gmra.mxu0 %vm408_vm8, %v790_v34 }
 0x762   :  { %1110 = vmatpush1.bf16.msra.mxu0 %v4957_v14  ;;  %1133 = vmatprep.mubr.bf16.mxu0 %v4710_v22 }
 0x763   :  { %1111 = vmatprep.subr.bf16.mxu0 %v4961_v15 }
 0x766   :  { %1112 = vmatpush1.bf16.msra.mxu0 %v4963_v17 }
 0x767   :  { %1113 = vmatprep.subr.bf16.mxu0 %v4967_v18 }
 0x76a   :  { %1114 = vmatpush1.bf16.msra.mxu0 %v4969_v19 }
 0x76b   :  { %1115 = vmatprep.subr.bf16.mxu0 %v4973_v20 }
 0x76e   :  { %1116 = vmatpush1.bf16.msra.mxu0 %v4975_v21 }
 0x76f   :  { %3974 = vmatprep.subr.bf16.mxu0 %v4707_v0 }
 0x7ba   :  { %v983_v27 = vpop.permute.xlu1 %982 }
 0x819   :  { %v930_v63 = vpop.f32.mrf.mxu0 }
 0x81a   :  { %v931_v1 = vadd.f32 %v4914_v43, %v930_v63 }
 0x81b   :  { %v3936_v3 = vpop.f32.mrf.mxu0 }
 0x81c   :  { %v976_v6 = vadd.f32 %v971_v51, %v931_v1 }
 0x81d   :  { %v933_v7 = vpop.f32.mrf.mxu0 }
 0x81e   :  { %v977_v8 = vmul.f32 0.5, %v976_v6  ;;  %v3680_v7 = vld [vmem:[%s5660_s1 + $0x2] sm:$0x1] }
 0x81f   :  { %v3937_v11 = vpop.f32.mrf.mxu0 }
 0x820   :  { %4287 = vtanh.f32 %v977_v8 }
 0x821   :  { %v1038_v44 = vpop.f32.mrf.mxu0 }
 0x823   :  { %v3952_v45 = vpop.f32.mrf.mxu0 }
 0x825   :  { %v1041_v46 = vpop.f32.mrf.mxu0 }
 0x827   :  { %v3953_v49 = vpop.f32.mrf.mxu0 }
 0x82d   :  { %v4288_v23 = vpop.eup %4287 }
 0x82e   :  { %v979_v25 = vadd.f32 1.0, %v4288_v23 }
 0x830   :  { %v980_v26 = vmul.f32 0.5, %v979_v25 }
 0x832   :  { %v985_v29 = vmul.f32 %v983_v27, %v980_v26  ;;  %v992_v36 = vsub.f32 1.0, %v980_v26  ;;  %v998_v39 = vmul.f32 %v980_v26, %v4942_v2 }
 0x834   :  { %987 = vrot.lane.b32.xlu0 %v985_v29, %s4693_s4 }
 0x8a6   :  { %v988_v31 = vpop.permute.xlu0 %987 }
 0x8a7   :  { %v990_v33 = vadd.f32 %v988_v31, %v931_v1 }
 0x8a9   :  { %4289 = vtanh.f32 %v990_v33 }
 0x8b6   :  { %v4290_v35 = vpop.eup %4289 }
 0x8b7   :  { %994 = vrot.lane.b32.xlu1 %v4290_v35, %s4709_s2 }
 0x8bb   :  { %1159 = vrot.lane.b32.xlu1 %v794_v50, %s4706_s9 }
 0x929   :  { %v995_v38 = vpop.permute.xlu1 %994 }
 0x92a   :  { %v997_v40 = vmul.f32 %v995_v38, %v992_v36 }
 0x92c   :  { %v5056_v41 = vadd.f32 %v998_v39, %v997_v40 }
 0x92d   :  { %v1160_v50 = vpop.permute.xlu1 %1159 }
 0x92e   :  { %v1000_v42 = vpack.c.bf16 %v5056_v41, %v5056_v41 }
 0x930   :  { %1045 = vrot.lane.b32.xlu0 %v1000_v42, %s4709_s2 }
 0x9a2   :  { %v5061_v12 = vpop.permute.xlu0 %1045 }
 0x9a3   :  { %3959 = vmatmul.mubr.msk.bf16.vlgmr.msra.gmra.mxu1 %vm408_vm8, %v5061_v12 }
 0x9a4   :  { %3963 = vmatpush3.bf16.msra.mxu1 %v4863_v4  ;;  %3964 = vmatprep.mubr.msk.bf16.mxu1 %vm4708_vm0, %v4707_v0 }
 0x9a5   :  { %3968 = vmatprep.subr.bf16.mxu1 %v4707_v0 }
 0x9ab   :  { %3965 = vmatmul.mubr.msk.bf16.vlgmr.msra.gmra.mxu1 %vm292_vm3, %v3680_v7 }
 0x9ac   :  { %3969 = vmatpush3.bf16.msra.mxu1 %v4865_v5  ;;  %3970 = vmatprep.mubr.msk.bf16.mxu1 %vm4708_vm0, %v4707_v0 }
 0x9ad   :  { %3982 = vmatprep.subr.bf16.mxu1 %v4707_v0 }
 0xa63   :  { %v1084_v51 = vpop.f32.mrf.mxu1 }
 0xa64   :  { %v1085_v52 = vadd.f32 %v1084_v51, %v1038_v44 }
 0xa65   :  { %v3960_v53 = vpop.f32.mrf.mxu1 }
 0xa66   :  { %v1090_v56 = vadd.f32 %v4985_v24, %v1085_v52 }
 0xa67   :  { %v1087_v59 = vpop.f32.mrf.mxu1 }
 0xa68   :  { %v1092_v60 = vmin.f32 %v1090_v56, 0.0  ;;  %vm1091_vm13 = vcmp.gt.f32.partialorder %v1090_v56, 0.0 }
 0xa69   :  { %v3961_v61 = vpop.f32.mrf.mxu1 }
 0xa6a   :  { %v1093_v62 = vmul.f32 1.442695, %v1092_v60 }
 0xa6b   :  { %v1234_v59 = vpop.f32.mrf.mxu1 }
 0xa6c   :  { %4291 = vpow2.f32 %v1093_v62 }
 0xa6d   :  { %v3966_v60 = vpop.f32.mrf.mxu1 }
 0xa6f   :  { %v1237_v61 = vpop.f32.mrf.mxu1 }
 0xa70   :  { %v1191_v61 = vld [vmem:[#allocation4 + $0x2] sm:$0x1] }
 0xa71   :  { %v3967_v62 = vpop.f32.mrf.mxu1 }
 0xa79   :  { %v4292_v63 = vpop.eup %4291 }
 0xa7a   :  { %v3677_v1 = vadd.f32 -1.0, %v4292_v63 }
 0xa7c   :  { %v1096_v3 = vsel %vm1091_vm13, %v1090_v56, %v3677_v1 }
 0xa7d   :  { %v1097_v6 = vpack.c.bf16 %v1096_v3, %v1096_v3 }
 0xa7f   :  { %3678 = vmatmul.mubr.msk.bf16.vlgmr.msra.gmra.mxu0 %vm698_vm10, %v1097_v6 }
 0xa80   :  { %3975 = vmatpush3.bf16.msra.mxu0 %v4881_v9  ;;  %3978 = vmatprep.mubr.msk.bf16.mxu0 %vm4708_vm0, %v4707_v0 }
 0xa81   :  { %3976 = vmatprep.subr.bf16.mxu0 %v4707_v0 }
 0xa84   :  { %3977 = vmatpush3.bf16.msra.mxu0 %v4888_v10 }
 0xa85   :  { %3990 = vmatprep.subr.bf16.mxu0 %v4707_v0 }
 0xb3f   :  { %v1135_v8 = vpop.f32.mrf.mxu0 }
 0xb40   :  { %v1136_v11 = vadd.f32 %v1135_v8, %v5006_v47 }
 0xb41   :  { %v1137_v23 = vpop.f32.mrf.mxu0 }
 0xb42   :  { %1165 = vst [vmem:[#allocation24 + $0x4] sm:$0x3] %v1136_v11  ;;  %v1138_v25 = vadd.f32 %v1137_v23, %v5008_v48 }
 0xb43   :  { %v1139_v26 = vpop.f32.mrf.mxu0 }
 0xb44   :  { %v1143_v27 = vand.u32 2147483647, %v1138_v25  ;;  %v1142_v45 = vmax.f32 %v1138_v25, 0.0 }
 0xb45   :  { %v1140_v29 = vpop.f32.mrf.mxu0 }
 0xb46   :  { %v1144_v31 = vsub.f32 0.0, %v1143_v27 }
 0xb48   :  { %v1145_v33 = vmul.f32 1.442695, %v1144_v31 }
 0xb4a   :  { %4293 = vpow2.f32 %v1145_v33 }
 0xb57   :  { %v4294_v34 = vpop.eup %4293 }
 0xb58   :  { %v1147_v35 = vadd.f32 1.0, %v4294_v34  ;;  %v1150_v36 = vmul.f32 -0.5, %v4294_v34  ;;  %v1153_v39 = vand.u32 2147483647, %v4294_v34 }
 0xb5a   :  { %4295 = vlog2.f32 %v1147_v35  ;;  %v1151_v38 = vadd.f32 1.0, %v1150_v36  ;;  %vm1154_vm14 = vcmp.lt.f32.partialorder %v1153_v39, 0.0004427343 }
 0xb5c   :  { %v1152_v44 = vmul.f32 %v4294_v34, %v1151_v38 }
 0xb67   :  { %v4296_v40 = vpop.eup %4295 }
 0xb68   :  { %v1149_v42 = vmul.f32 0.6931472, %v4296_v40 }
 0xb6a   :  { %v1155_v46 = vsel %vm1154_vm14, %v1152_v44, %v1149_v42 }
 0xb6b   :  { %v1156_v49 = vadd.f32 %v1155_v46, %v1142_v45 }
 0xb6d   :  { %v1157_v51 = vadd.f32 0.1, %v1156_v49 }
 0xb6f   :  { %v1162_v52 = vmul.f32 %v1160_v50, %v1157_v51  ;;  %1166 = vst [vmem:[#allocation24 + $0x6] sm:$0x3] %v1157_v51 }
 0xb71   :  { %v5088_v53 = vadd.f32 %v1162_v52, %v1136_v11 }
 0xb73   :  { %v1196_v56 = vpack.c.bf16 %v5088_v53, %v5088_v53 }
 0xb75   :  { %1241 = vrot.lane.b32.xlu0 %v1196_v56, %s4711_s16 }
 0xbe7   :  { %v1242_v63 = vpop.permute.xlu0 %1241 }
 0xbe8   :  { %3971 = vmatmul.mubr.msk.bf16.vlgmr.msra.gmra.mxu1 %vm340_vm5, %v1242_v63 }
 0xbe9   :  { %3983 = vmatpush3.bf16.msra.mxu1 %v4896_v28  ;;  %3986 = vmatprep.mubr.msk.bf16.mxu1 %vm4708_vm0, %v4707_v0 }
 0xbea   :  { %3984 = vmatprep.subr.bf16.mxu1 %v4707_v0 }
 0xbed   :  { %3985 = vmatpush3.bf16.msra.mxu1 %v4900_v30 }
 0xbee   :  { %3998 = vmatprep.subr.bf16.mxu1 %v4707_v0 }
 0xbf0   :  { %3987 = vmatmul.mubr.msk.bf16.vlgmr.msra.gmra.mxu1 %vm408_vm8, %v5061_v12 }
 0xbf1   :  { %3999 = vmatpush3.bf16.msra.mxu1 %v4923_v55  ;;  %4002 = vmatprep.mubr.msk.bf16.mxu1 %vm4708_vm0, %v4707_v0 }
 0xbf2   :  { %4000 = vmatprep.subr.bf16.mxu1 %v4707_v0 }
 0xbf5   :  { %4001 = vmatpush3.bf16.msra.mxu1 %v4932_v58 }
 0xbf6   :  { %4006 = vmatprep.subr.bf16.mxu1 %v4707_v0 }
 0xca8   :  { %v1280_v1 = vpop.f32.mrf.mxu1 }
 0xca9   :  { %v1281_v3 = vadd.f32 %v1280_v1, %v1234_v59 }
 0xcaa   :  { %v3972_v6 = vpop.f32.mrf.mxu1 }
 0xcab   :  { %v1286_v7 = vadd.f32 %v4893_v16, %v1281_v3 }
 0xcac   :  { %v1283_v8 = vpop.f32.mrf.mxu1 }
 0xcad   :  { %v1288_v11 = vmin.f32 %v1286_v7, 0.0  ;;  %vm1287_vm15 = vcmp.gt.f32.partialorder %v1286_v7, 0.0 }
 0xcae   :  { %v3973_v23 = vpop.f32.mrf.mxu1 }
 0xcaf   :  { %v1289_v12 = vmul.f32 1.442695, %v1288_v11 }
 0xcb0   :  { %v1371_v25 = vpop.f32.mrf.mxu1 }
 0xcb1   :  { %4297 = vpow2.f32 %v1289_v12  ;;  %v1372_v26 = vadd.f32 %v4910_v37, %v1371_v25 }
 0xcb2   :  { %v3988_v27 = vpop.f32.mrf.mxu1 }
 0xcb3   :  { %1383 = vrot.lane.b32.xlu1 %v1372_v26, %s4693_s4  ;;  %v1195_v27 = vld [vmem:[#allocation7 + $0x4] sm:$0x3] }
 0xcb4   :  { %v1374_v29 = vpop.f32.mrf.mxu1 }
 0xcb6   :  { %v3989_v31 = vpop.f32.mrf.mxu1 }
 0xcbe   :  { %v4298_v33 = vpop.eup %4297 }
 0xcbf   :  { %v3683_v34 = vadd.f32 -1.0, %v4298_v33 }
 0xcc1   :  { %v1292_v35 = vsel %vm1287_vm15, %v1286_v7, %v3683_v34 }
 0xcc2   :  { %v1293_v36 = vpack.c.bf16 %v1292_v35, %v1292_v35 }
 0xcc4   :  { %3979 = vmatmul.mubr.msk.bf16.vlgmr.msra.gmra.mxu0 %vm408_vm8, %v1293_v36 }
 0xcc5   :  { %3991 = vmatpush3.bf16.msra.mxu0 %v4918_v54  ;;  %3994 = vmatprep.mubr.msk.bf16.mxu0 %vm4708_vm0, %v4707_v0 }
 0xcc6   :  { %3992 = vmatprep.subr.bf16.mxu0 %v4707_v0 }
 0xcc9   :  { %3993 = vmatpush3.bf16.msra.mxu0 %v4926_v57 }
 0xcca   :  { %1510 = vmatprep.subr.bf16.mxu0 %v4955_v13 }
 0xccc   :  { %3995 = vmatmul.mubr.msk.bf16.vlgmr.msra.gmra.mxu0 %vm408_vm8, %v1191_v61 }
 0xccd   :  { %1511 = vmatpush1.bf16.msra.mxu0 %v4957_v14  ;;  %1534 = vmatprep.mubr.bf16.mxu0 %v4710_v22 }
 0xcce   :  { %1512 = vmatprep.subr.bf16.mxu0 %v4961_v15 }
 0xcd1   :  { %1513 = vmatpush1.bf16.msra.mxu0 %v4963_v17 }
 0xcd2   :  { %1514 = vmatprep.subr.bf16.mxu0 %v4967_v18 }
 0xcd5   :  { %1515 = vmatpush1.bf16.msra.mxu0 %v4969_v19 }
 0xcd6   :  { %1516 = vmatprep.subr.bf16.mxu0 %v4973_v20 }
 0xcd9   :  { %1517 = vmatpush1.bf16.msra.mxu0 %v4975_v21 }
 0xcda   :  { %4018 = vmatprep.subr.bf16.mxu0 %v4707_v0 }
 0xd25   :  { %v1384_v52 = vpop.permute.xlu1 %1383 }
 0xd84   :  { %v1331_v38 = vpop.f32.mrf.mxu0 }
 0xd85   :  { %v1332_v39 = vadd.f32 %v4914_v43, %v1331_v38 }
 0xd86   :  { %v3980_v40 = vpop.f32.mrf.mxu0 }
 0xd87   :  { %v1377_v42 = vadd.f32 %v1372_v26, %v1332_v39 }
 0xd88   :  { %v1334_v44 = vpop.f32.mrf.mxu0 }
 0xd89   :  { %v1378_v45 = vmul.f32 0.5, %v1377_v42 }
 0xd8a   :  { %v3981_v46 = vpop.f32.mrf.mxu0 }
 0xd8b   :  { %4299 = vtanh.f32 %v1378_v45  ;;  %v3691_v46 = vld [vmem:[%s5660_s1 + $0x3] sm:$0x1] }
 0xd8c   :  { %v1439_v11 = vpop.f32.mrf.mxu0 }
 0xd8e   :  { %v3996_v23 = vpop.f32.mrf.mxu0 }
 0xd90   :  { %v1442_v12 = vpop.f32.mrf.mxu0 }
 0xd92   :  { %v3997_v25 = vpop.f32.mrf.mxu0 }
 0xd98   :  { %v4300_v49 = vpop.eup %4299 }
 0xd99   :  { %v1380_v50 = vadd.f32 1.0, %v4300_v49 }
 0xd9b   :  { %v1381_v51 = vmul.f32 0.5, %v1380_v50 }
 0xd9d   :  { %v1386_v56 = vmul.f32 %v1384_v52, %v1381_v51  ;;  %v1393_v63 = vsub.f32 1.0, %v1381_v51  ;;  %v1399_v3 = vmul.f32 %v1381_v51, %v5056_v41 }
 0xd9f   :  { %1388 = vrot.lane.b32.xlu0 %v1386_v56, %s4693_s4 }
 0xe11   :  { %v1389_v59 = vpop.permute.xlu0 %1388 }
 0xe12   :  { %v1391_v60 = vadd.f32 %v1389_v59, %v1332_v39 }
 0xe14   :  { %4301 = vtanh.f32 %v1391_v60 }
 0xe21   :  { %v4302_v62 = vpop.eup %4301 }
 0xe22   :  { %1395 = vrot.lane.b32.xlu1 %v4302_v62, %s4709_s2 }
 0xe26   :  { %1560 = vrot.lane.b32.xlu1 %v1195_v27, %s4706_s9 }
 0xe94   :  { %v1396_v1 = vpop.permute.xlu1 %1395 }
 0xe95   :  { %v1398_v6 = vmul.f32 %v1396_v1, %v1393_v63 }
 0xe97   :  { %v5132_v7 = vadd.f32 %v1399_v3, %v1398_v6 }
 0xe98   :  { %v1561_v27 = vpop.permute.xlu1 %1560 }
 0xe99   :  { %v1401_v8 = vpack.c.bf16 %v5132_v7, %v5132_v7 }
 0xe9b   :  { %1446 = vrot.lane.b32.xlu0 %v1401_v8, %s4709_s2 }
 0xf0d   :  { %v5137_v26 = vpop.permute.xlu0 %1446 }
 0xf0e   :  { %4003 = vmatmul.mubr.msk.bf16.vlgmr.msra.gmra.mxu1 %vm408_vm8, %v5137_v26 }
 0xf0f   :  { %4007 = vmatpush3.bf16.msra.mxu1 %v4863_v4  ;;  %4008 = vmatprep.mubr.msk.bf16.mxu1 %vm4708_vm0, %v4707_v0 }
 0xf10   :  { %4012 = vmatprep.subr.bf16.mxu1 %v4707_v0 }
 0xf16   :  { %4009 = vmatmul.mubr.msk.bf16.vlgmr.msra.gmra.mxu1 %vm292_vm3, %v3691_v46 }
 0xf17   :  { %4013 = vmatpush3.bf16.msra.mxu1 %v4865_v5  ;;  %4014 = vmatprep.mubr.msk.bf16.mxu1 %vm4708_vm0, %v4707_v0 }
 0xf18   :  { %4026 = vmatprep.subr.bf16.mxu1 %v4707_v0 }
 0xfce   :  { %v1485_v29 = vpop.f32.mrf.mxu1 }
 0xfcf   :  { %v1486_v31 = vadd.f32 %v1485_v29, %v1439_v11 }
 0xfd0   :  { %v4004_v33 = vpop.f32.mrf.mxu1 }
 0xfd1   :  { %v1491_v34 = vadd.f32 %v4985_v24, %v1486_v31 }
 0xfd2   :  { %v1488_v35 = vpop.f32.mrf.mxu1 }
 0xfd3   :  { %v1493_v36 = vmin.f32 %v1491_v34, 0.0  ;;  %vm1492_vm1 = vcmp.gt.f32.partialorder %v1491_v34, 0.0 }
 0xfd4   :  { %v4005_v38 = vpop.f32.mrf.mxu1 }
 0xfd5   :  { %v1494_v39 = vmul.f32 1.442695, %v1493_v36 }
 0xfd6   :  { %v1635_v35 = vpop.f32.mrf.mxu1 }
 0xfd7   :  { %4303 = vpow2.f32 %v1494_v39 }
 0xfd8   :  { %v4010_v36 = vpop.f32.mrf.mxu1 }
 0xfda   :  { %v1638_v38 = vpop.f32.mrf.mxu1 }
 0xfdc   :  { %v4011_v39 = vpop.f32.mrf.mxu1 }
 0xfe4   :  { %v4304_v40 = vpop.eup %4303 }
 0xfe5   :  { %v3688_v42 = vadd.f32 -1.0, %v4304_v40 }
 0xfe7   :  { %v1497_v44 = vsel %vm1492_vm1, %v1491_v34, %v3688_v42 }
 0xfe8   :  { %v1498_v45 = vpack.c.bf16 %v1497_v44, %v1497_v44 }
 0xfea   :  { %3689 = vmatmul.mubr.msk.bf16.vlgmr.msra.gmra.mxu0 %vm698_vm10, %v1498_v45 }
 0xfeb   :  { %4019 = vmatpush3.bf16.msra.mxu0 %v4881_v9  ;;  %4022 = vmatprep.mubr.msk.bf16.mxu0 %vm4708_vm0, %v4707_v0 }
 0xfec   :  { %4020 = vmatprep.subr.bf16.mxu0 %v4707_v0 }
 0xfef   :  { %4021 = vmatpush3.bf16.msra.mxu0 %v4888_v10 }
 0xff0   :  { %4034 = vmatprep.subr.bf16.mxu0 %v4707_v0 }
0x10aa   :  { %v1536_v9 = vpop.f32.mrf.mxu0 }
0x10ab   :  { %v1537_v49 = vadd.f32 %v1536_v9, %v5006_v47 }
0x10ac   :  { %v1538_v50 = vpop.f32.mrf.mxu0 }
0x10ad   :  { %1566 = vst [vmem:[#allocation24 + $0x8] sm:$0x3] %v1537_v49  ;;  %v1539_v10 = vadd.f32 %v1538_v50, %v5008_v48 }
0x10ae   :  { %v1540_v51 = vpop.f32.mrf.mxu0 }
0x10af   :  { %v1544_v52 = vand.u32 2147483647, %v1539_v10  ;;  %v1543_v23 = vmax.f32 %v1539_v10, 0.0 }
0x10b0   :  { %v1541_v56 = vpop.f32.mrf.mxu0 }
0x10b1   :  { %v1545_v59 = vsub.f32 0.0, %v1544_v52 }
0x10b3   :  { %v1546_v60 = vmul.f32 1.442695, %v1545_v59 }
0x10b5   :  { %4305 = vpow2.f32 %v1546_v60 }
0x10c2   :  { %v4306_v61 = vpop.eup %4305 }
0x10c3   :  { %v1548_v62 = vadd.f32 1.0, %v4306_v61  ;;  %v1551_v63 = vmul.f32 -0.5, %v4306_v61  ;;  %v1554_v3 = vand.u32 2147483647, %v4306_v61 }
0x10c5   :  { %4307 = vlog2.f32 %v1548_v62  ;;  %v1552_v1 = vadd.f32 1.0, %v1551_v63  ;;  %vm1555_vm2 = vcmp.lt.f32.partialorder %v1554_v3, 0.0004427343 }
0x10c7   :  { %v1553_v11 = vmul.f32 %v4306_v61, %v1552_v1 }
0x10d2   :  { %v4308_v6 = vpop.eup %4307 }
0x10d3   :  { %v1550_v8 = vmul.f32 0.6931472, %v4308_v6 }
0x10d5   :  { %v1556_v12 = vsel %vm1555_vm2, %v1553_v11, %v1550_v8 }
0x10d6   :  { %v1557_v25 = vadd.f32 %v1556_v12, %v1543_v23 }
0x10d8   :  { %v1558_v29 = vadd.f32 0.1, %v1557_v25 }
0x10da   :  { %v1563_v31 = vmul.f32 %v1561_v27, %v1558_v29  ;;  %1567 = vst [vmem:[#allocation24 + $0xa] sm:$0x3] %v1558_v29 }
0x10dc   :  { %v5164_v33 = vadd.f32 %v1563_v31, %v1537_v49 }
0x10de   :  { %v1597_v34 = vpack.c.bf16 %v5164_v33, %v5164_v33 }
0x10e0   :  { %1642 = vrot.lane.b32.xlu0 %v1597_v34, %s4711_s16 }
0x1152   :  { %v1643_v40 = vpop.permute.xlu0 %1642 }
0x1153   :  { %4015 = vmatmul.mubr.msk.bf16.vlgmr.msra.gmra.mxu1 %vm340_vm5, %v1643_v40 }
0x1154   :  { %4027 = vmatpush3.bf16.msra.mxu1 %v4896_v28  ;;  %4030 = vmatprep.mubr.msk.bf16.mxu1 %vm4708_vm0, %v4707_v0 }
0x1155   :  { %4028 = vmatprep.subr.bf16.mxu1 %v4707_v0 }
0x1158   :  { %4029 = vmatpush3.bf16.msra.mxu1 %v4900_v30 }
0x1159   :  { %4042 = vmatprep.subr.bf16.mxu1 %v4707_v0 }
0x115b   :  { %4031 = vmatmul.mubr.msk.bf16.vlgmr.msra.gmra.mxu1 %vm408_vm8, %v5137_v26 }
0x115c   :  { %4043 = vmatpush3.bf16.msra.mxu1 %v4923_v55  ;;  %4046 = vmatprep.mubr.msk.bf16.mxu1 %vm4708_vm0, %v4707_v0 }
0x115d   :  { %4044 = vmatprep.subr.bf16.mxu1 %v4707_v0 }
0x1160   :  { %4045 = vmatpush3.bf16.msra.mxu1 %v4932_v58 }
0x1161   :  { %4050 = vmatprep.subr.bf16.mxu1 %v4707_v0 }
0x1213   :  { %v1681_v28 = vpop.f32.mrf.mxu1 }
0x1214   :  { %v1682_v42 = vadd.f32 %v1681_v28, %v1635_v35 }
0x1215   :  { %v4016_v44 = vpop.f32.mrf.mxu1 }
0x1216   :  { %v1687_v30 = vadd.f32 %v4893_v16, %v1682_v42 }
0x1217   :  { %v1684_v45 = vpop.f32.mrf.mxu1 }
0x1218   :  { %v1689_v46 = vmin.f32 %v1687_v30, 0.0  ;;  %vm1688_vm7 = vcmp.gt.f32.partialorder %v1687_v30, 0.0 }
0x1219   :  { %v4017_v9 = vpop.f32.mrf.mxu1 }
0x121a   :  { %v1690_v26 = vmul.f32 1.442695, %v1689_v46  ;;  %v5227_v9 = vld [vmem:[%s5643_s8 + $0x8] sm:$0xff]  }
0x121b   :  { %v1772_v49 = vpop.f32.mrf.mxu1 }
0x121c   :  { %4309 = vpow2.f32 %v1690_v26  ;;  %v1773_v55 = vadd.f32 %v4910_v37, %v1772_v49  ;;  %v3702_v26 = vld [vmem:[%s5660_s1 + $0x4] sm:$0x1] }
0x121d   :  { %v4032_v50 = vpop.f32.mrf.mxu1 }
0x121e   :  { %1784 = vrot.lane.b32.xlu1 %v1773_v55, %s4693_s4 }
0x121f   :  { %v1775_v10 = vpop.f32.mrf.mxu1 }
0x1221   :  { %v4033_v58 = vpop.f32.mrf.mxu1 }
0x1229   :  { %v4310_v51 = vpop.eup %4309 }
0x122a   :  { %v3694_v52 = vadd.f32 -1.0, %v4310_v51 }
0x122c   :  { %v1693_v56 = vsel %vm1688_vm7, %v1687_v30, %v3694_v52 }
0x122d   :  { %v1694_v59 = vpack.c.bf16 %v1693_v56, %v1693_v56 }
0x122f   :  { %4023 = vmatmul.mubr.msk.bf16.vlgmr.msra.gmra.mxu0 %vm408_vm8, %v1694_v59 }
0x1230   :  { %4035 = vmatpush3.bf16.msra.mxu0 %v4918_v54  ;;  %4038 = vmatprep.mubr.msk.bf16.mxu0 %vm4708_vm0, %v4707_v0 }
0x1231   :  { %4036 = vmatprep.subr.bf16.mxu0 %v4707_v0 }
0x1234   :  { %4037 = vmatpush3.bf16.msra.mxu0 %v4926_v57 }
0x1235   :  { %1911 = vmatprep.subr.bf16.mxu0 %v4955_v13  ;;  %v1592_v13 = vld [vmem:[#allocation4 + $0x3] sm:$0x1] }
0x1237   :  { %4039 = vmatmul.mubr.msk.bf16.vlgmr.msra.gmra.mxu0 %vm408_vm8, %v1592_v13 }
0x1238   :  { %1912 = vmatpush1.bf16.msra.mxu0 %v4957_v14  ;;  %1935 = vmatprep.mubr.bf16.mxu0 %v4710_v22 }
0x1239   :  { %1913 = vmatprep.subr.bf16.mxu0 %v4961_v15 }
0x123c   :  { %1914 = vmatpush1.bf16.msra.mxu0 %v4963_v17 }
0x123d   :  { %1915 = vmatprep.subr.bf16.mxu0 %v4967_v18 }
0x1240   :  { %1916 = vmatpush1.bf16.msra.mxu0 %v4969_v19 }
0x1241   :  { %1917 = vmatprep.subr.bf16.mxu0 %v4973_v20 }
0x1244   :  { %1918 = vmatpush1.bf16.msra.mxu0 %v4975_v21  ;;  %v1596_v21 = vld [vmem:[#allocation7 + $0x6] sm:$0x3] }
0x1245   :  { %4062 = vmatprep.subr.bf16.mxu0 %v4707_v0 }
0x1290   :  { %v1785_v8 = vpop.permute.xlu1 %1784 }
0x12ef   :  { %v1732_v16 = vpop.f32.mrf.mxu0 }
0x12f0   :  { %v1733_v37 = vadd.f32 %v4914_v43, %v1732_v16 }
0x12f1   :  { %v4024_v60 = vpop.f32.mrf.mxu0 }
0x12f2   :  { %v1778_v61 = vadd.f32 %v1773_v55, %v1733_v37 }
0x12f3   :  { %v1735_v62 = vpop.f32.mrf.mxu0 }
0x12f4   :  { %v1779_v63 = vmul.f32 0.5, %v1778_v61 }
0x12f5   :  { %v4025_v1 = vpop.f32.mrf.mxu0 }
0x12f6   :  { %4311 = vtanh.f32 %v1779_v63 }
0x12f7   :  { %v1840_v18 = vpop.f32.mrf.mxu0 }
0x12f9   :  { %v4040_v19 = vpop.f32.mrf.mxu0 }
0x12fa   :  { %v5262_v19 = vld [vmem:[#allocation16] sm:$0xff]  }
0x12fb   :  { %v1843_v29 = vpop.f32.mrf.mxu0 }
0x12fc   :  { %v5271_v29 = vld [vmem:[%s5647_s12 + $0x8] sm:$0xff]  }
0x12fd   :  { %v4041_v20 = vpop.f32.mrf.mxu0 }
0x12fe   :  { %v5280_v20 = vld [vmem:[%s5647_s12] sm:$0xff]  }
0x1303   :  { %v4312_v3 = vpop.eup %4311 }
0x1304   :  { %v1781_v54 = vadd.f32 1.0, %v4312_v3 }
0x1306   :  { %v1782_v6 = vmul.f32 0.5, %v1781_v54 }
0x1308   :  { %v1787_v11 = vmul.f32 %v1785_v8, %v1782_v6  ;;  %v1794_v14 = vsub.f32 1.0, %v1782_v6  ;;  %v1800_v25 = vmul.f32 %v1782_v6, %v5132_v7 }
0x130a   :  { %1789 = vrot.lane.b32.xlu0 %v1787_v11, %s4693_s4 }
0x137c   :  { %v1790_v23 = vpop.permute.xlu0 %1789 }
0x137d   :  { %v1792_v57 = vadd.f32 %v1790_v23, %v1733_v37 }
0x137f   :  { %4313 = vtanh.f32 %v1792_v57 }
0x138c   :  { %v4314_v43 = vpop.eup %4313 }
0x138d   :  { %1796 = vrot.lane.b32.xlu1 %v4314_v43, %s4709_s2 }
0x1391   :  { %1961 = vrot.lane.b32.xlu1 %v1596_v21, %s4706_s9 }
0x13ff   :  { %v1797_v12 = vpop.permute.xlu1 %1796 }
0x1400   :  { %v1799_v15 = vmul.f32 %v1797_v12, %v1794_v14 }
0x1402   :  { %v5208_v27 = vadd.f32 %v1800_v25, %v1799_v15 }
0x1403   :  { %v1962_v11 = vpop.permute.xlu1 %1961 }
0x1404   :  { %v1802_v17 = vpack.c.bf16 %v5208_v27, %v5208_v27 }
0x1406   :  { %1847 = vrot.lane.b32.xlu0 %v1802_v17, %s4709_s2 }
0x1478   :  { %v5213_v31 = vpop.permute.xlu0 %1847 }
0x1479   :  { %4047 = vmatmul.mubr.msk.bf16.vlgmr.msra.gmra.mxu1 %vm408_vm8, %v5213_v31 }
0x147a   :  { %4051 = vmatpush3.bf16.msra.mxu1 %v4863_v4  ;;  %4052 = vmatprep.mubr.msk.bf16.mxu1 %vm4708_vm0, %v4707_v0 }
0x147b   :  { %4056 = vmatprep.subr.bf16.mxu1 %v4707_v0 }
0x1481   :  { %4053 = vmatmul.mubr.msk.bf16.vlgmr.msra.gmra.mxu1 %vm292_vm3, %v3702_v26 }
0x1482   :  { %4057 = vmatpush3.bf16.msra.mxu1 %v4865_v5  ;;  %4058 = vmatprep.mubr.msk.bf16.mxu1 %vm4708_vm0, %v4707_v0 }
0x1483   :  { %4070 = vmatprep.subr.bf16.mxu1 %v4707_v0 }
0x1539   :  { %v1886_v34 = vpop.f32.mrf.mxu1 }
0x153a   :  { %v1887_v35 = vadd.f32 %v1886_v34, %v1840_v18  ;;  %v5256_v18 = vld [vmem:[#allocation16 + $0x8] sm:$0xff]  }
0x153b   :  { %v4048_v36 = vpop.f32.mrf.mxu1 }
0x153c   :  { %v1892_v38 = vadd.f32 %v4985_v24, %v1887_v35  ;;  %v5236_v24 = vld [vmem:[%s5643_s8] sm:$0xff]  }
0x153d   :  { %v1889_v39 = vpop.f32.mrf.mxu1  ;;  %v5284_v35 = vld [vmem:[#allocation15] ss:$0 sm:$0xff] }
0x153e   :  { %v1894_v40 = vmin.f32 %v1892_v38, 0.0  ;;  %vm1893_vm9 = vcmp.gt.f32.partialorder %v1892_v38, 0.0 }
0x153f   :  { %v4049_v28 = vpop.f32.mrf.mxu1 }
0x1540   :  { %v1895_v42 = vmul.f32 1.442695, %v1894_v40 }
0x1541   :  { %v2036_v14 = vpop.f32.mrf.mxu1 }
0x1542   :  { %4315 = vpow2.f32 %v1895_v42 }
0x1543   :  { %v4054_v12 = vpop.f32.mrf.mxu1 }
0x1545   :  { %v2039_v25 = vpop.f32.mrf.mxu1 }
0x1546   :  { %v5316_v25 = vld [vmem:[#allocation22 + $0x20] ss:$8 sps:$4 sm:$0xff]  }
0x1547   :  { %v4055_v15 = vpop.f32.mrf.mxu1 }
0x1548   :  { %v5320_v15 = vld [vmem:[#allocation22 + $0x14] ss:$8 sps:$4 sm:$0xff]  }
0x154f   :  { %v4316_v44 = vpop.eup %4315 }
0x1550   :  { %v3699_v30 = vadd.f32 -1.0, %v4316_v44  ;;  %v5287_v44 = vld [vmem:[#allocation19] ss:$0 sm:$0xff] }
0x1552   :  { %v1898_v45 = vsel %vm1893_vm9, %v1892_v38, %v3699_v30 }
0x1553   :  { %v1899_v46 = vpack.c.bf16 %v1898_v45, %v1898_v45 }
0x1555   :  { %3700 = vmatmul.mubr.msk.bf16.vlgmr.msra.gmra.mxu0 %vm698_vm10, %v1899_v46 }
0x1556   :  { %4063 = vmatpush3.bf16.msra.mxu0 %v5227_v9  ;;  %4066 = vmatprep.mubr.msk.bf16.mxu0 %vm4708_vm0, %v4707_v0 }
0x1557   :  { %4064 = vmatprep.subr.bf16.mxu0 %v4707_v0 }
0x155a   :  { %4065 = vmatpush3.bf16.msra.mxu0 %v5236_v24 }
0x155b   :  { %4078 = vmatprep.subr.bf16.mxu0 %v4707_v0 }
0x1615   :  { %v1937_v49 = vpop.f32.mrf.mxu0 }
0x1616   :  { %v1938_v55 = vadd.f32 %v1937_v49, %v5006_v47 }
0x1617   :  { %v1939_v50 = vpop.f32.mrf.mxu0 }
0x1618   :  { %1967 = vst [vmem:[#allocation24 + $0xc] sm:$0x3] %v1938_v55  ;;  %v1940_v10 = vadd.f32 %v1939_v50, %v5008_v48 }
0x1619   :  { %v1941_v58 = vpop.f32.mrf.mxu0 }
0x161a   :  { %v1945_v51 = vand.u32 2147483647, %v1940_v10  ;;  %v1944_v54 = vmax.f32 %v1940_v10, 0.0  ;;  %v5292_v58 = vld [vmem:[#allocation21 + $0x8] sm:$0xff]  }
0x161b   :  { %v1942_v52 = vpop.f32.mrf.mxu0 }
0x161c   :  { %v1946_v56 = vsub.f32 0.0, %v1945_v51  ;;  %v5298_v51 = vld [vmem:[#allocation21] sm:$0xff]  }
0x161d   :  { %v5301_v52 = vld [vmem:[#allocation22 + $0x34] ss:$8 sps:$4 sm:$0xff]  }
0x161e   :  { %v1947_v59 = vmul.f32 1.442695, %v1946_v56 }
0x1620   :  { %4317 = vpow2.f32 %v1947_v59  ;;  %v5304_v59 = vld [vmem:[#allocation18] ss:$0 sm:$0xff] }
0x162d   :  { %v4318_v16 = vpop.eup %4317 }
0x162e   :  { %v1949_v37 = vadd.f32 1.0, %v4318_v16  ;;  %v1952_v60 = vmul.f32 -0.5, %v4318_v16  ;;  %v1955_v62 = vand.u32 2147483647, %v4318_v16 }
0x1630   :  { %4319 = vlog2.f32 %v1949_v37  ;;  %v1953_v61 = vadd.f32 1.0, %v1952_v60  ;;  %vm1956_vm11 = vcmp.lt.f32.partialorder %v1955_v62, 0.0004427343 }
0x1632   :  { %v1954_v3 = vmul.f32 %v4318_v16, %v1953_v61 }
0x163d   :  { %v4320_v63 = vpop.eup %4319 }
0x163e   :  { %v1951_v1 = vmul.f32 0.6931472, %v4320_v63 }
0x1640   :  { %v1957_v6 = vsel %vm1956_vm11, %v1954_v3, %v1951_v1 }
0x1641   :  { %v1958_v8 = vadd.f32 %v1957_v6, %v1944_v54 }
0x1643   :  { %v1959_v23 = vadd.f32 0.1, %v1958_v8 }
0x1645   :  { %v1964_v57 = vmul.f32 %v1962_v11, %v1959_v23  ;;  %1968 = vst [vmem:[#allocation24 + $0xe] sm:$0x3] %v1959_v23 }
0x1647   :  { %v5250_v13 = vadd.f32 %v1964_v57, %v1938_v55  ;;  %v1993_v57 = vld [vmem:[#allocation4 + $0x4] sm:$0x1] }
0x1649   :  { %v1998_v43 = vpack.c.bf16 %v5250_v13, %v5250_v13 }
0x164b   :  { %2043 = vrot.lane.b32.xlu0 %v1998_v43, %s4711_s16  ;;  %v5309_v43 = vld [vmem:[#allocation22 + $0x30] ss:$8 sps:$4 sm:$0xff]  }
0x16bd   :  { %v2044_v17 = vpop.permute.xlu0 %2043 }
0x16be   :  { %4059 = vmatmul.mubr.msk.bf16.vlgmr.msra.gmra.mxu1 %vm340_vm5, %v2044_v17  ;;  %v5323_v17 = vld [vmem:[#allocation22 + $0x10] ss:$8 sps:$4 sm:$0xff]  }
0x16bf   :  { %4071 = vmatpush3.bf16.msra.mxu1 %v5256_v18  ;;  %4074 = vmatprep.mubr.msk.bf16.mxu1 %vm4708_vm0, %v4707_v0 }
0x16c0   :  { %4072 = vmatprep.subr.bf16.mxu1 %v4707_v0 }
0x16c3   :  { %4073 = vmatpush3.bf16.msra.mxu1 %v5262_v19 }
0x16c4   :  { %4086 = vmatprep.subr.bf16.mxu1 %v4707_v0 }
0x16c6   :  { %4075 = vmatmul.mubr.msk.bf16.vlgmr.msra.gmra.mxu1 %vm408_vm8, %v5213_v31 }
0x16c7   :  { %4087 = vmatpush3.bf16.msra.mxu1 %v5271_v29  ;;  %4090 = vmatprep.mubr.msk.bf16.mxu1 %vm4708_vm0, %v4707_v0 }
0x16c8   :  { %4088 = vmatprep.subr.bf16.mxu1 %v4707_v0 }
0x16cb   :  { %4089 = vmatpush3.bf16.msra.mxu1 %v5280_v20 }
0x16cc   :  { %4094 = vmatprep.subr.bf16.mxu1 %v4707_v0 }
0x177e   :  { %v2082_v31 = vpop.f32.mrf.mxu1 }
0x177f   :  { %v2083_v21 = vadd.f32 %v2082_v31, %v2036_v14  ;;  %v5313_v14 = vld [vmem:[#allocation22 + $0x24] ss:$8 sps:$4 sm:$0xff]  }
0x1780   :  { %v4060_v34 = vpop.f32.mrf.mxu1  ;;  %v5326_v31 = vld [vmem:[#allocation22 + $0x4] ss:$8 sps:$4 sm:$0xff]  }
0x1781   :  { %v2088_v36 = vadd.f32 %v5284_v35, %v2083_v21  ;;  %v5329_v21 = vld [vmem:[#allocation22] ss:$8 sps:$4 sm:$0xff]  }
0x1782   :  { %v2085_v38 = vpop.f32.mrf.mxu1 }
0x1783   :  { %v2090_v39 = vmin.f32 %v2088_v36, 0.0  ;;  %vm2089_vm12 = vcmp.gt.f32.partialorder %v2088_v36, 0.0 }
0x1784   :  { %v4061_v40 = vpop.f32.mrf.mxu1 }
0x1785   :  { %v2091_v28 = vmul.f32 1.442695, %v2090_v39 }
0x1786   :  { %v2173_v42 = vpop.f32.mrf.mxu1 }
0x1787   :  { %4321 = vpow2.f32 %v2091_v28  ;;  %v2174_v30 = vadd.f32 %v5287_v44, %v2173_v42 }
0x1788   :  { %v4076_v45 = vpop.f32.mrf.mxu1 }
0x1789   :  { %2185 = vrot.lane.b32.xlu1 %v2174_v30, %s4693_s4 }
0x178a   :  { %v2176_v46 = vpop.f32.mrf.mxu1 }
0x178c   :  { %v4077_v26 = vpop.f32.mrf.mxu1 }
0x1794   :  { %v4322_v49 = vpop.eup %4321 }
0x1795   :  { %v3705_v55 = vadd.f32 -1.0, %v4322_v49  ;;  %v1997_v49 = vld [vmem:[#allocation7 + $0x8] sm:$0x3] }
0x1797   :  { %v2094_v50 = vsel %vm2089_vm12, %v2088_v36, %v3705_v55 }
0x1798   :  { %v2095_v10 = vpack.c.bf16 %v2094_v50, %v2094_v50 }
0x179a   :  { %4067 = vmatmul.mubr.msk.bf16.vlgmr.msra.gmra.mxu0 %vm408_vm8, %v2095_v10 }
0x179b   :  { %4079 = vmatpush3.bf16.msra.mxu0 %v5292_v58  ;;  %4082 = vmatprep.mubr.msk.bf16.mxu0 %vm4708_vm0, %v4707_v0 }
0x179c   :  { %4080 = vmatprep.subr.bf16.mxu0 %v4707_v0 }
0x179f   :  { %4081 = vmatpush3.bf16.msra.mxu0 %v5298_v51 }
0x17a0   :  { %2312 = vmatprep.subr.bf16.mxu0 %v5301_v52 }
0x17a2   :  { %4083 = vmatmul.mubr.msk.bf16.vlgmr.msra.gmra.mxu0 %vm408_vm8, %v1993_v57 }
0x17a3   :  { %2313 = vmatpush1.bf16.msra.mxu0 %v5309_v43  ;;  %2336 = vmatprep.mubr.bf16.mxu0 %v4710_v22 }
0x17a4   :  { %2314 = vmatprep.subr.bf16.mxu0 %v5313_v14 }
0x17a7   :  { %2315 = vmatpush1.bf16.msra.mxu0 %v5316_v25 }
0x17a8   :  { %2316 = vmatprep.subr.bf16.mxu0 %v5320_v15 }
0x17ab   :  { %2317 = vmatpush1.bf16.msra.mxu0 %v5323_v17 }
0x17ac   :  { %2318 = vmatprep.subr.bf16.mxu0 %v5326_v31 }
0x17af   :  { %2319 = vmatpush1.bf16.msra.mxu0 %v5329_v21 }
0x17b0   :  { %4106 = vmatprep.subr.bf16.mxu0 %v4707_v0 }
0x17fb   :  { %v2186_v6 = vpop.permute.xlu1 %2185 }
0x185a   :  { %v2133_v56 = vpop.f32.mrf.mxu0 }
0x185b   :  { %v2134_v16 = vadd.f32 %v5304_v59, %v2133_v56  ;;  %v5351_v56 = vld [vmem:[%s5649_s14] ss:$0 sm:$0xff] }
0x185c   :  { %v4068_v37 = vpop.f32.mrf.mxu0 }
0x185d   :  { %v2179_v60 = vadd.f32 %v2174_v30, %v2134_v16 }
0x185e   :  { %v2136_v61 = vpop.f32.mrf.mxu0 }
0x185f   :  { %v2180_v62 = vmul.f32 0.5, %v2179_v60 }
0x1860   :  { %v4069_v63 = vpop.f32.mrf.mxu0 }
0x1861   :  { %4323 = vtanh.f32 %v2180_v62 }
0x1862   :  { %v2241_v42 = vpop.f32.mrf.mxu0 }
0x1864   :  { %v4084_v30 = vpop.f32.mrf.mxu0 }
0x1866   :  { %v2244_v45 = vpop.f32.mrf.mxu0 }
0x1868   :  { %v4085_v46 = vpop.f32.mrf.mxu0 }
0x186e   :  { %v4324_v1 = vpop.eup %4323 }
0x186f   :  { %v2182_v3 = vadd.f32 1.0, %v4324_v1 }
0x1871   :  { %v2183_v54 = vmul.f32 0.5, %v2182_v3 }
0x1873   :  { %v2188_v8 = vmul.f32 %v2186_v6, %v2183_v54  ;;  %v2195_v34 = vsub.f32 1.0, %v2183_v54  ;;  %v2201_v38 = vmul.f32 %v2183_v54, %v5208_v27  ;;  %v3713_v6 = vld [vmem:[%s5660_s1 + $0x5] sm:$0x1] }
0x1875   :  { %2190 = vrot.lane.b32.xlu0 %v2188_v8, %s4693_s4 }
0x18e7   :  { %v2191_v11 = vpop.permute.xlu0 %2190 }
0x18e8   :  { %v2193_v23 = vadd.f32 %v2191_v11, %v2134_v16 }
0x18ea   :  { %4325 = vtanh.f32 %v2193_v23 }
0x18f7   :  { %v4326_v12 = vpop.eup %4325 }
0x18f8   :  { %2197 = vrot.lane.b32.xlu1 %v4326_v12, %s4709_s2 }
0x18fc   :  { %2362 = vrot.lane.b32.xlu1 %v1997_v49, %s4706_s9 }
0x196a   :  { %v2198_v36 = vpop.permute.xlu1 %2197 }
0x196b   :  { %v2200_v39 = vmul.f32 %v2198_v36, %v2195_v34 }
0x196d   :  { %v5334_v40 = vadd.f32 %v2201_v38, %v2200_v39 }
0x196f   :  { %v2203_v28 = vpack.c.bf16 %v5334_v40, %v5334_v40 }
0x1971   :  { %2248 = vrot.lane.b32.xlu0 %v2203_v28, %s4709_s2 }
0x19e3   :  { %v5339_v26 = vpop.permute.xlu0 %2248 }
0x19e4   :  { %4091 = vmatmul.mubr.msk.bf16.vlgmr.msra.gmra.mxu1 %vm408_vm8, %v5339_v26 }
0x19e5   :  { %4095 = vmatpush3.bf16.msra.mxu1 %v4863_v4  ;;  %4096 = vmatprep.mubr.msk.bf16.mxu1 %vm4708_vm0, %v4707_v0 }
0x19e6   :  { %4100 = vmatprep.subr.bf16.mxu1 %v4707_v0 }
0x19ec   :  { %4097 = vmatmul.mubr.msk.bf16.vlgmr.msra.gmra.mxu1 %vm292_vm3, %v3713_v6 }
0x19ed   :  { %4101 = vmatpush3.bf16.msra.mxu1 %v4865_v5  ;;  %4102 = vmatprep.mubr.msk.bf16.mxu1 %vm4708_vm0, %v4707_v0 }
0x19ee   :  { %4114 = vmatprep.subr.bf16.mxu1 %v4707_v0 }
0x1aa4   :  { %v2287_v55 = vpop.f32.mrf.mxu1 }
0x1aa5   :  { %v2288_v50 = vadd.f32 %v2287_v55, %v2241_v42 }
0x1aa6   :  { %v4092_v10 = vpop.f32.mrf.mxu1 }
0x1aa7   :  { %v2293_v16 = vadd.f32 %v5351_v56, %v2288_v50 }
0x1aa8   :  { %v2290_v37 = vpop.f32.mrf.mxu1 }
0x1aa9   :  { %v2295_v60 = vmin.f32 %v2293_v16, 0.0  ;;  %vm2294_vm13 = vcmp.gt.f32.partialorder %v2293_v16, 0.0 }
0x1aaa   :  { %v4093_v61 = vpop.f32.mrf.mxu1 }
0x1aab   :  { %v2296_v62 = vmul.f32 1.442695, %v2295_v60  ;;  %v2363_v60 = vpop.permute.xlu1 %2362 }
0x1aad   :  { %4327 = vpow2.f32 %v2296_v62 }
0x1aba   :  { %v4328_v63 = vpop.eup %4327 }
0x1abb   :  { %v3710_v1 = vadd.f32 -1.0, %v4328_v63 }
0x1abd   :  { %v2299_v3 = vsel %vm2294_vm13, %v2293_v16, %v3710_v1 }
0x1abe   :  { %v2300_v54 = vpack.c.bf16 %v2299_v3, %v2299_v3  ;;  %v2437_v3 = vpop.f32.mrf.mxu1 }
0x1ac0   :  { %3711 = vmatmul.mubr.msk.bf16.vlgmr.msra.gmra.mxu0 %vm698_vm10, %v2300_v54  ;;  %v4098_v54 = vpop.f32.mrf.mxu1 }
0x1ac1   :  { %4107 = vmatpush3.bf16.msra.mxu0 %v5227_v9  ;;  %4110 = vmatprep.mubr.msk.bf16.mxu0 %vm4708_vm0, %v4707_v0 }
0x1ac2   :  { %4108 = vmatprep.subr.bf16.mxu0 %v4707_v0  ;;  %v2440_v6 = vpop.f32.mrf.mxu1 }
0x1ac5   :  { %4109 = vmatpush3.bf16.msra.mxu0 %v5236_v24 }
0x1ac6   :  { %4122 = vmatprep.subr.bf16.mxu0 %v4707_v0 }
0x1b80   :  { %v2338_v8 = vpop.f32.mrf.mxu0 }
0x1b81   :  { %v2339_v11 = vadd.f32 %v2338_v8, %v5006_v47  ;;  %v4099_v8 = vpop.f32.mrf.mxu1 }
0x1b82   :  { %v2340_v23 = vpop.f32.mrf.mxu0 }
0x1b83   :  { %2368 = vst [vmem:[#allocation24 + $0x10] sm:$0x3] %v2339_v11  ;;  %v2341_v57 = vadd.f32 %v2340_v23, %v5008_v48 }
0x1b84   :  { %v2342_v12 = vpop.f32.mrf.mxu0 }
0x1b85   :  { %v2346_v34 = vand.u32 2147483647, %v2341_v57  ;;  %v2345_v10 = vmax.f32 %v2341_v57, 0.0 }
0x1b86   :  { %v2343_v36 = vpop.f32.mrf.mxu0 }
0x1b87   :  { %v2347_v38 = vsub.f32 0.0, %v2346_v34 }
0x1b89   :  { %v2348_v39 = vmul.f32 1.442695, %v2347_v38 }
0x1b8b   :  { %4329 = vpow2.f32 %v2348_v39 }
0x1b98   :  { %v4330_v28 = vpop.eup %4329 }
0x1b99   :  { %v2350_v42 = vadd.f32 1.0, %v4330_v28  ;;  %v2353_v30 = vmul.f32 -0.5, %v4330_v28  ;;  %v2356_v46 = vand.u32 2147483647, %v4330_v28 }
0x1b9b   :  { %4331 = vlog2.f32 %v2350_v42  ;;  %v2354_v45 = vadd.f32 1.0, %v2353_v30  ;;  %vm2357_vm14 = vcmp.lt.f32.partialorder %v2356_v46, 0.0004427343 }
0x1b9d   :  { %v2355_v50 = vmul.f32 %v4330_v28, %v2354_v45 }
0x1ba8   :  { %v4332_v49 = vpop.eup %4331 }
0x1ba9   :  { %v2352_v55 = vmul.f32 0.6931472, %v4332_v49 }
0x1bab   :  { %v2358_v16 = vsel %vm2357_vm14, %v2355_v50, %v2352_v55 }
0x1bac   :  { %v2359_v37 = vadd.f32 %v2358_v16, %v2345_v10 }
0x1bae   :  { %v2360_v61 = vadd.f32 0.1, %v2359_v37 }
0x1bb0   :  { %v2365_v62 = vmul.f32 %v2363_v60, %v2360_v61  ;;  %2369 = vst [vmem:[#allocation24 + $0x12] sm:$0x3] %v2360_v61 }
0x1bb2   :  { %v5371_v63 = vadd.f32 %v2365_v62, %v2339_v11 }
0x1bb4   :  { %v2399_v1 = vpack.c.bf16 %v5371_v63, %v5371_v63 }
0x1bb6   :  { %2444 = vrot.lane.b32.xlu0 %v2399_v1, %s4711_s16 }
0x1c28   :  { %v2445_v23 = vpop.permute.xlu0 %2444 }
0x1c29   :  { %4103 = vmatmul.mubr.msk.bf16.vlgmr.msra.gmra.mxu1 %vm340_vm5, %v2445_v23 }
0x1c2a   :  { %4115 = vmatpush3.bf16.msra.mxu1 %v5256_v18  ;;  %4118 = vmatprep.mubr.msk.bf16.mxu1 %vm4708_vm0, %v4707_v0 }
0x1c2b   :  { %4116 = vmatprep.subr.bf16.mxu1 %v4707_v0 }
0x1c2e   :  { %4117 = vmatpush3.bf16.msra.mxu1 %v5262_v19 }
0x1c2f   :  { %4130 = vmatprep.subr.bf16.mxu1 %v4707_v0 }
0x1c31   :  { %4119 = vmatmul.mubr.msk.bf16.vlgmr.msra.gmra.mxu1 %vm408_vm8, %v5339_v26 }
0x1c32   :  { %4131 = vmatpush3.bf16.msra.mxu1 %v5271_v29  ;;  %4134 = vmatprep.mubr.msk.bf16.mxu1 %vm4708_vm0, %v4707_v0 }
0x1c33   :  { %4132 = vmatprep.subr.bf16.mxu1 %v4707_v0 }
0x1c36   :  { %4133 = vmatpush3.bf16.msra.mxu1 %v5280_v20 }
0x1c37   :  { %4138 = vmatprep.subr.bf16.mxu1 %v4707_v0 }
0x1ce9   :  { %v2483_v11 = vpop.f32.mrf.mxu1 }
0x1cea   :  { %v2484_v57 = vadd.f32 %v2483_v11, %v2437_v3 }
0x1ceb   :  { %v4104_v12 = vpop.f32.mrf.mxu1 }
0x1cec   :  { %v2489_v34 = vadd.f32 %v5284_v35, %v2484_v57 }
0x1ced   :  { %v2486_v36 = vpop.f32.mrf.mxu1 }
0x1cee   :  { %v2491_v38 = vmin.f32 %v2489_v34, 0.0  ;;  %vm2490_vm15 = vcmp.gt.f32.partialorder %v2489_v34, 0.0 }
0x1cef   :  { %v4105_v39 = vpop.f32.mrf.mxu1 }
0x1cf0   :  { %v2492_v26 = vmul.f32 1.442695, %v2491_v38 }
0x1cf1   :  { %v2574_v28 = vpop.f32.mrf.mxu1 }
0x1cf2   :  { %4333 = vpow2.f32 %v2492_v26  ;;  %v2575_v42 = vadd.f32 %v5287_v44, %v2574_v28 }
0x1cf3   :  { %v4120_v30 = vpop.f32.mrf.mxu1 }
0x1cf4   :  { %2586 = vrot.lane.b32.xlu1 %v2575_v42, %s4693_s4 }
0x1cf5   :  { %v2577_v45 = vpop.f32.mrf.mxu1 }
0x1cf7   :  { %v4121_v46 = vpop.f32.mrf.mxu1 }
0x1cff   :  { %v4334_v49 = vpop.eup %4333 }
0x1d00   :  { %v3716_v55 = vadd.f32 -1.0, %v4334_v49 }
0x1d02   :  { %v2495_v50 = vsel %vm2490_vm15, %v2489_v34, %v3716_v55  ;;  %v2394_v34 = vld [vmem:[#allocation4 + $0x5] sm:$0x1] }
0x1d03   :  { %v2496_v10 = vpack.c.bf16 %v2495_v50, %v2495_v50 }
0x1d05   :  { %4111 = vmatmul.mubr.msk.bf16.vlgmr.msra.gmra.mxu0 %vm408_vm8, %v2496_v10  ;;  %v2398_v10 = vld [vmem:[#allocation7 + $0xa] sm:$0x3] }
0x1d06   :  { %4123 = vmatpush3.bf16.msra.mxu0 %v5292_v58  ;;  %4126 = vmatprep.mubr.msk.bf16.mxu0 %vm4708_vm0, %v4707_v0 }
0x1d07   :  { %4124 = vmatprep.subr.bf16.mxu0 %v4707_v0 }
0x1d0a   :  { %4125 = vmatpush3.bf16.msra.mxu0 %v5298_v51 }
0x1d0b   :  { %2713 = vmatprep.subr.bf16.mxu0 %v5301_v52 }
0x1d0d   :  { %4127 = vmatmul.mubr.msk.bf16.vlgmr.msra.gmra.mxu0 %vm408_vm8, %v2394_v34 }
0x1d0e   :  { %2714 = vmatpush1.bf16.msra.mxu0 %v5309_v43  ;;  %2737 = vmatprep.mubr.bf16.mxu0 %v4710_v22 }
0x1d0f   :  { %2715 = vmatprep.subr.bf16.mxu0 %v5313_v14 }
0x1d12   :  { %2716 = vmatpush1.bf16.msra.mxu0 %v5316_v25 }
0x1d13   :  { %2717 = vmatprep.subr.bf16.mxu0 %v5320_v15 }
0x1d16   :  { %2718 = vmatpush1.bf16.msra.mxu0 %v5323_v17 }
0x1d17   :  { %2719 = vmatprep.subr.bf16.mxu0 %v5326_v31 }
0x1d1a   :  { %2720 = vmatpush1.bf16.msra.mxu0 %v5329_v21 }
0x1d1b   :  { %4150 = vmatprep.subr.bf16.mxu0 %v4707_v0 }
0x1d66   :  { %v2587_v23 = vpop.permute.xlu1 %2586 }
0x1dc5   :  { %v2534_v16 = vpop.f32.mrf.mxu0 }
0x1dc6   :  { %v2535_v37 = vadd.f32 %v5304_v59, %v2534_v16 }
0x1dc7   :  { %v4112_v60 = vpop.f32.mrf.mxu0 }
0x1dc8   :  { %v2580_v61 = vadd.f32 %v2575_v42, %v2535_v37 }
0x1dc9   :  { %v2537_v62 = vpop.f32.mrf.mxu0 }
0x1dca   :  { %v2581_v1 = vmul.f32 0.5, %v2580_v61 }
0x1dcb   :  { %v4113_v3 = vpop.f32.mrf.mxu0 }
0x1dcc   :  { %4335 = vtanh.f32 %v2581_v1 }
0x1dcd   :  { %v2642_v45 = vpop.f32.mrf.mxu0 }
0x1dcf   :  { %v4128_v46 = vpop.f32.mrf.mxu0 }
0x1dd1   :  { %v2645_v49 = vpop.f32.mrf.mxu0 }
0x1dd3   :  { %v4129_v55 = vpop.f32.mrf.mxu0 }
0x1dd9   :  { %v4336_v54 = vpop.eup %4335 }
0x1dda   :  { %v2583_v6 = vadd.f32 1.0, %v4336_v54 }
0x1ddc   :  { %v2584_v8 = vmul.f32 0.5, %v2583_v6 }
0x1dde   :  { %v2589_v11 = vmul.f32 %v2587_v23, %v2584_v8  ;;  %v2596_v38 = vsub.f32 1.0, %v2584_v8  ;;  %v2602_v26 = vmul.f32 %v2584_v8, %v5334_v40 }
0x1de0   :  { %2591 = vrot.lane.b32.xlu0 %v2589_v11, %s4693_s4 }
0x1e52   :  { %v2592_v57 = vpop.permute.xlu0 %2591 }
0x1e53   :  { %v2594_v12 = vadd.f32 %v2592_v57, %v2535_v37  ;;  %v3724_v57 = vld [vmem:[%s5660_s1 + $0x6] sm:$0x1] }
0x1e55   :  { %4337 = vtanh.f32 %v2594_v12 }
0x1e62   :  { %v4338_v36 = vpop.eup %4337 }
0x1e63   :  { %2598 = vrot.lane.b32.xlu1 %v4338_v36, %s4709_s2 }
0x1e67   :  { %2763 = vrot.lane.b32.xlu1 %v2398_v10, %s4706_s9 }
0x1ed5   :  { %v2599_v39 = vpop.permute.xlu1 %2598 }
0x1ed6   :  { %v2601_v28 = vmul.f32 %v2599_v39, %v2596_v38 }
0x1ed8   :  { %v5415_v42 = vadd.f32 %v2602_v26, %v2601_v28 }
0x1eda   :  { %v2604_v30 = vpack.c.bf16 %v5415_v42, %v5415_v42 }
0x1edc   :  { %2649 = vrot.lane.b32.xlu0 %v2604_v30, %s4709_s2 }
0x1f4e   :  { %v5420_v50 = vpop.permute.xlu0 %2649 }
0x1f4f   :  { %4135 = vmatmul.mubr.msk.bf16.vlgmr.msra.gmra.mxu1 %vm408_vm8, %v5420_v50 }
0x1f50   :  { %4139 = vmatpush3.bf16.msra.mxu1 %v4863_v4  ;;  %4140 = vmatprep.mubr.msk.bf16.mxu1 %vm4708_vm0, %v4707_v0 }
0x1f51   :  { %4144 = vmatprep.subr.bf16.mxu1 %v4707_v0 }
0x1f57   :  { %4141 = vmatmul.mubr.msk.bf16.vlgmr.msra.gmra.mxu1 %vm292_vm3, %v3724_v57 }
0x1f58   :  { %4145 = vmatpush3.bf16.msra.mxu1 %v4865_v5  ;;  %4146 = vmatprep.mubr.msk.bf16.mxu1 %vm4708_vm0, %v4707_v0 }
0x1f59   :  { %4158 = vmatprep.subr.bf16.mxu1 %v4707_v0 }
0x200f   :  { %v2688_v16 = vpop.f32.mrf.mxu1 }
0x2010   :  { %v2689_v37 = vadd.f32 %v2688_v16, %v2642_v45 }
0x2011   :  { %v4136_v60 = vpop.f32.mrf.mxu1 }
0x2012   :  { %v2694_v61 = vadd.f32 %v5351_v56, %v2689_v37 }
0x2013   :  { %v2691_v62 = vpop.f32.mrf.mxu1 }
0x2014   :  { %v2696_v1 = vmin.f32 %v2694_v61, 0.0  ;;  %vm2695_vm1 = vcmp.gt.f32.partialorder %v2694_v61, 0.0 }
0x2015   :  { %v4137_v3 = vpop.f32.mrf.mxu1 }
0x2016   :  { %v2697_v54 = vmul.f32 1.442695, %v2696_v1 }
0x2017   :  { %v2838_v57 = vpop.f32.mrf.mxu1 }
0x2018   :  { %4339 = vpow2.f32 %v2697_v54  ;;  %v2764_v54 = vpop.permute.xlu1 %2763 }
0x2025   :  { %v4340_v6 = vpop.eup %4339 }
0x2026   :  { %v3721_v8 = vadd.f32 -1.0, %v4340_v6 }
0x2028   :  { %v2700_v23 = vsel %vm2695_vm1, %v2694_v61, %v3721_v8 }
0x2029   :  { %v2701_v11 = vpack.c.bf16 %v2700_v23, %v2700_v23 }
0x202b   :  { %3722 = vmatmul.mubr.msk.bf16.vlgmr.msra.gmra.mxu0 %vm698_vm10, %v2701_v11 }
0x202c   :  { %4151 = vmatpush3.bf16.msra.mxu0 %v5227_v9  ;;  %4154 = vmatprep.mubr.msk.bf16.mxu0 %vm4708_vm0, %v4707_v0 }
0x202d   :  { %4152 = vmatprep.subr.bf16.mxu0 %v4707_v0 }
0x2030   :  { %4153 = vmatpush3.bf16.msra.mxu0 %v5236_v24 }
0x2031   :  { %4166 = vmatprep.subr.bf16.mxu0 %v4707_v0 }
0x20eb   :  { %v2739_v12 = vpop.f32.mrf.mxu0 }
0x20ec   :  { %v2740_v34 = vadd.f32 %v2739_v12, %v5006_v47  ;;  %v4142_v12 = vpop.f32.mrf.mxu1 }
0x20ed   :  { %v2741_v36 = vpop.f32.mrf.mxu0 }
0x20ee   :  { %2769 = vst [vmem:[#allocation24 + $0x14] sm:$0x3] %v2740_v34  ;;  %v2742_v38 = vadd.f32 %v2741_v36, %v5008_v48  ;;  %v2841_v36 = vpop.f32.mrf.mxu1 }
0x20ef   :  { %v2743_v39 = vpop.f32.mrf.mxu0 }
0x20f0   :  { %v2747_v26 = vand.u32 2147483647, %v2742_v38  ;;  %v2746_v62 = vmax.f32 %v2742_v38, 0.0  ;;  %v4143_v39 = vpop.f32.mrf.mxu1 }
0x20f1   :  { %v2744_v28 = vpop.f32.mrf.mxu0 }
0x20f2   :  { %v2748_v30 = vsub.f32 0.0, %v2747_v26 }
0x20f4   :  { %v2749_v45 = vmul.f32 1.442695, %v2748_v30 }
0x20f6   :  { %4341 = vpow2.f32 %v2749_v45 }
0x2103   :  { %v4342_v46 = vpop.eup %4341 }
0x2104   :  { %v2751_v49 = vadd.f32 1.0, %v4342_v46  ;;  %v2754_v55 = vmul.f32 -0.5, %v4342_v46  ;;  %v2757_v16 = vand.u32 2147483647, %v4342_v46 }
0x2106   :  { %4343 = vlog2.f32 %v2751_v49  ;;  %v2755_v10 = vadd.f32 1.0, %v2754_v55  ;;  %vm2758_vm2 = vcmp.lt.f32.partialorder %v2757_v16, 0.0004427343 }
0x2108   :  { %v2756_v61 = vmul.f32 %v4342_v46, %v2755_v10 }
0x2113   :  { %v4344_v37 = vpop.eup %4343 }
0x2114   :  { %v2753_v60 = vmul.f32 0.6931472, %v4344_v37 }
0x2116   :  { %v2759_v1 = vsel %vm2758_vm2, %v2756_v61, %v2753_v60 }
0x2117   :  { %v2760_v3 = vadd.f32 %v2759_v1, %v2746_v62 }
0x2119   :  { %v2761_v6 = vadd.f32 0.1, %v2760_v3 }
0x211b   :  { %v2766_v8 = vmul.f32 %v2764_v54, %v2761_v6  ;;  %2770 = vst [vmem:[#allocation24 + $0x16] sm:$0x3] %v2761_v6 }
0x211d   :  { %v5447_v23 = vadd.f32 %v2766_v8, %v2740_v34 }
0x211f   :  { %v2800_v11 = vpack.c.bf16 %v5447_v23, %v5447_v23 }
0x2121   :  { %2845 = vrot.lane.b32.xlu0 %v2800_v11, %s4711_s16 }
0x2193   :  { %v2846_v26 = vpop.permute.xlu0 %2845 }
0x2194   :  { %4147 = vmatmul.mubr.msk.bf16.vlgmr.msra.gmra.mxu1 %vm340_vm5, %v2846_v26 }
0x2195   :  { %4159 = vmatpush3.bf16.msra.mxu1 %v5256_v18  ;;  %4162 = vmatprep.mubr.msk.bf16.mxu1 %vm4708_vm0, %v4707_v0 }
0x2196   :  { %4160 = vmatprep.subr.bf16.mxu1 %v4707_v0 }
0x2199   :  { %4161 = vmatpush3.bf16.msra.mxu1 %v5262_v19 }
0x219a   :  { %4174 = vmatprep.subr.bf16.mxu1 %v4707_v0 }
0x219c   :  { %4163 = vmatmul.mubr.msk.bf16.vlgmr.msra.gmra.mxu1 %vm408_vm8, %v5420_v50 }
0x219d   :  { %4175 = vmatpush3.bf16.msra.mxu1 %v5271_v29  ;;  %4178 = vmatprep.mubr.msk.bf16.mxu1 %vm4708_vm0, %v4707_v0 }
0x219e   :  { %4176 = vmatprep.subr.bf16.mxu1 %v4707_v0 }
0x21a1   :  { %4177 = vmatpush3.bf16.msra.mxu1 %v5280_v20 }
0x21a2   :  { %4182 = vmatprep.subr.bf16.mxu1 %v4707_v0 }
0x2254   :  { %v2884_v34 = vpop.f32.mrf.mxu1 }
0x2255   :  { %v2885_v38 = vadd.f32 %v2884_v34, %v2838_v57 }
0x2256   :  { %v4148_v28 = vpop.f32.mrf.mxu1 }
0x2257   :  { %v2890_v30 = vadd.f32 %v5284_v35, %v2885_v38 }
0x2258   :  { %v2887_v45 = vpop.f32.mrf.mxu1 }
0x2259   :  { %v2892_v46 = vmin.f32 %v2890_v30, 0.0  ;;  %vm2891_vm7 = vcmp.gt.f32.partialorder %v2890_v30, 0.0 }
0x225a   :  { %v4149_v49 = vpop.f32.mrf.mxu1 }
0x225b   :  { %v2893_v50 = vmul.f32 1.442695, %v2892_v46  ;;  %v2795_v46 = vld [vmem:[#allocation4 + $0x6] sm:$0x1] }
0x225c   :  { %v2975_v55 = vpop.f32.mrf.mxu1 }
0x225d   :  { %4345 = vpow2.f32 %v2893_v50  ;;  %v2976_v10 = vadd.f32 %v5287_v44, %v2975_v55 }
0x225e   :  { %v4164_v16 = vpop.f32.mrf.mxu1 }
0x225f   :  { %2987 = vrot.lane.b32.xlu1 %v2976_v10, %s4693_s4 }
0x2260   :  { %v2978_v37 = vpop.f32.mrf.mxu1 }
0x2262   :  { %v4165_v60 = vpop.f32.mrf.mxu1 }
0x226a   :  { %v4346_v61 = vpop.eup %4345 }
0x226b   :  { %v3727_v62 = vadd.f32 -1.0, %v4346_v61 }
0x226d   :  { %v2896_v1 = vsel %vm2891_vm7, %v2890_v30, %v3727_v62 }
0x226e   :  { %v2897_v3 = vpack.c.bf16 %v2896_v1, %v2896_v1 }
0x2270   :  { %4155 = vmatmul.mubr.msk.bf16.vlgmr.msra.gmra.mxu0 %vm408_vm8, %v2897_v3 }
0x2271   :  { %4167 = vmatpush3.bf16.msra.mxu0 %v5292_v58  ;;  %4170 = vmatprep.mubr.msk.bf16.mxu0 %vm4708_vm0, %v4707_v0 }
0x2272   :  { %4168 = vmatprep.subr.bf16.mxu0 %v4707_v0 }
0x2275   :  { %4169 = vmatpush3.bf16.msra.mxu0 %v5298_v51 }
0x2276   :  { %3114 = vmatprep.subr.bf16.mxu0 %v5301_v52 }
0x2278   :  { %4171 = vmatmul.mubr.msk.bf16.vlgmr.msra.gmra.mxu0 %vm408_vm8, %v2795_v46 }
0x2279   :  { %3115 = vmatpush1.bf16.msra.mxu0 %v5309_v43  ;;  %3138 = vmatprep.mubr.bf16.mxu0 %v4710_v22 }
0x227a   :  { %3116 = vmatprep.subr.bf16.mxu0 %v5313_v14 }
0x227d   :  { %3117 = vmatpush1.bf16.msra.mxu0 %v5316_v25 }
0x227e   :  { %3118 = vmatprep.subr.bf16.mxu0 %v5320_v15 }
0x2281   :  { %3119 = vmatpush1.bf16.msra.mxu0 %v5323_v17 }
0x2282   :  { %3120 = vmatprep.subr.bf16.mxu0 %v5326_v31 }
0x2285   :  { %3121 = vmatpush1.bf16.msra.mxu0 %v5329_v21 }
0x2286   :  { %4194 = vmatprep.subr.bf16.mxu0 %v4707_v0 }
0x22d1   :  { %v2988_v38 = vpop.permute.xlu1 %2987 }
0x2330   :  { %v2935_v54 = vpop.f32.mrf.mxu0 }
0x2331   :  { %v2936_v6 = vadd.f32 %v5304_v59, %v2935_v54 }
0x2332   :  { %v4156_v8 = vpop.f32.mrf.mxu0 }
0x2333   :  { %v2981_v11 = vadd.f32 %v2976_v10, %v2936_v6 }
0x2334   :  { %v2938_v57 = vpop.f32.mrf.mxu0 }
0x2335   :  { %v2982_v12 = vmul.f32 0.5, %v2981_v11 }
0x2336   :  { %v4157_v36 = vpop.f32.mrf.mxu0 }
0x2337   :  { %4347 = vtanh.f32 %v2982_v12 }
0x2338   :  { %v3043_v61 = vpop.f32.mrf.mxu0 }
0x233a   :  { %v4172_v62 = vpop.f32.mrf.mxu0 }
0x233c   :  { %v3046_v1 = vpop.f32.mrf.mxu0 }
0x233e   :  { %v4173_v3 = vpop.f32.mrf.mxu0 }
0x2344   :  { %v4348_v39 = vpop.eup %4347 }
0x2345   :  { %v2984_v26 = vadd.f32 1.0, %v4348_v39 }
0x2347   :  { %v2985_v34 = vmul.f32 0.5, %v2984_v26 }
0x2349   :  { %v2990_v28 = vmul.f32 %v2988_v38, %v2985_v34  ;;  %v2997_v50 = vsub.f32 1.0, %v2985_v34  ;;  %v3003_v10 = vmul.f32 %v2985_v34, %v5415_v42 }
0x234b   :  { %2992 = vrot.lane.b32.xlu0 %v2990_v28, %s4693_s4 }
0x23bd   :  { %v2993_v30 = vpop.permute.xlu0 %2992 }
0x23be   :  { %v2995_v45 = vadd.f32 %v2993_v30, %v2936_v6  ;;  %v2799_v6 = vld [vmem:[#allocation7 + $0xc] sm:$0x3] }
0x23c0   :  { %4349 = vtanh.f32 %v2995_v45  ;;  %v3735_v45 = vld [vmem:[%s5660_s1 + $0x7] sm:$0x1] }
0x23cd   :  { %v4350_v49 = vpop.eup %4349 }
0x23ce   :  { %2999 = vrot.lane.b32.xlu1 %v4350_v49, %s4709_s2 }
0x23d2   :  { %3164 = vrot.lane.b32.xlu1 %v2799_v6, %s4706_s9 }
0x2440   :  { %v3000_v55 = vpop.permute.xlu1 %2999 }
0x2441   :  { %v3002_v16 = vmul.f32 %v3000_v55, %v2997_v50 }
0x2443   :  { %v5491_v37 = vadd.f32 %v3003_v10, %v3002_v16 }
0x2445   :  { %v3005_v60 = vpack.c.bf16 %v5491_v37, %v5491_v37 }
0x2447   :  { %3050 = vrot.lane.b32.xlu0 %v3005_v60, %s4709_s2 }
0x24b9   :  { %v5496_v54 = vpop.permute.xlu0 %3050 }
0x24ba   :  { %4179 = vmatmul.mubr.msk.bf16.vlgmr.msra.gmra.mxu1 %vm408_vm8, %v5496_v54 }
0x24bb   :  { %4183 = vmatpush3.bf16.msra.mxu1 %v4863_v4  ;;  %4184 = vmatprep.mubr.msk.bf16.mxu1 %vm4708_vm0, %v4707_v0 }
0x24bc   :  { %4188 = vmatprep.subr.bf16.mxu1 %v4707_v0 }
0x24c2   :  { %4185 = vmatmul.mubr.msk.bf16.vlgmr.msra.gmra.mxu1 %vm292_vm3, %v3735_v45 }
0x24c3   :  { %4189 = vmatpush3.bf16.msra.mxu1 %v4865_v5  ;;  %4190 = vmatprep.mubr.msk.bf16.mxu1 %vm4708_vm0, %v4707_v0 }
0x24c4   :  { %4202 = vmatprep.subr.bf16.mxu1 %v4707_v0 }
0x257a   :  { %v3089_v8 = vpop.f32.mrf.mxu1 }
0x257b   :  { %v3090_v11 = vadd.f32 %v3089_v8, %v3043_v61 }
0x257c   :  { %v4180_v57 = vpop.f32.mrf.mxu1 }
0x257d   :  { %v3095_v12 = vadd.f32 %v5351_v56, %v3090_v11 }
0x257e   :  { %v3092_v36 = vpop.f32.mrf.mxu1 }
0x257f   :  { %v3097_v39 = vmin.f32 %v3095_v12, 0.0  ;;  %vm3096_vm9 = vcmp.gt.f32.partialorder %v3095_v12, 0.0 }
0x2580   :  { %v4181_v26 = vpop.f32.mrf.mxu1 }
0x2581   :  { %v3098_v34 = vmul.f32 1.442695, %v3097_v39  ;;  %v3165_v39 = vpop.permute.xlu1 %3164 }
0x2583   :  { %4351 = vpow2.f32 %v3098_v34 }
0x2590   :  { %v4352_v38 = vpop.eup %4351 }
0x2591   :  { %v3732_v4 = vadd.f32 -1.0, %v4352_v38 }
0x2593   :  { %v3101_v28 = vsel %vm3096_vm9, %v3095_v12, %v3732_v4 }
0x2594   :  { %v3102_v30 = vpack.c.bf16 %v3101_v28, %v3101_v28  ;;  %v3239_v28 = vpop.f32.mrf.mxu1 }
0x2596   :  { %3733 = vmatmul.mubr.msk.bf16.vlgmr.msra.gmra.mxu0 %vm698_vm10, %v3102_v30  ;;  %v4186_v30 = vpop.f32.mrf.mxu1 }
0x2597   :  { %4195 = vmatpush3.bf16.msra.mxu0 %v5227_v9  ;;  %4198 = vmatprep.mubr.msk.bf16.mxu0 %vm4708_vm0, %v4707_v0 }
0x2598   :  { %4196 = vmatprep.subr.bf16.mxu0 %v4707_v0  ;;  %v3242_v45 = vpop.f32.mrf.mxu1 }
0x259b   :  { %4197 = vmatpush3.bf16.msra.mxu0 %v5236_v24 }
0x259c   :  { %4210 = vmatprep.subr.bf16.mxu0 %v4707_v0 }
0x2656   :  { %v3140_v9 = vpop.f32.mrf.mxu0 }
0x2657   :  { %v3141_v46 = vadd.f32 %v3140_v9, %v5006_v47  ;;  %v4187_v9 = vpop.f32.mrf.mxu1 }
0x2658   :  { %v3142_v49 = vpop.f32.mrf.mxu0 }
0x2659   :  { %3170 = vst [vmem:[#allocation24 + $0x18] sm:$0x3] %v3141_v46  ;;  %v3143_v24 = vadd.f32 %v3142_v49, %v5008_v48 }
0x265a   :  { %v3144_v50 = vpop.f32.mrf.mxu0 }
0x265b   :  { %v3148_v55 = vand.u32 2147483647, %v3143_v24  ;;  %v3147_v57 = vmax.f32 %v3143_v24, 0.0 }
0x265c   :  { %v3145_v10 = vpop.f32.mrf.mxu0 }
0x265d   :  { %v3149_v16 = vsub.f32 0.0, %v3148_v55 }
0x265f   :  { %v3150_v60 = vmul.f32 1.442695, %v3149_v16 }
0x2661   :  { %4353 = vpow2.f32 %v3150_v60 }
0x266e   :  { %v4354_v61 = vpop.eup %4353 }
0x266f   :  { %v3152_v5 = vadd.f32 1.0, %v4354_v61  ;;  %v3155_v62 = vmul.f32 -0.5, %v4354_v61  ;;  %v3158_v3 = vand.u32 2147483647, %v4354_v61 }
0x2671   :  { %4355 = vlog2.f32 %v3152_v5  ;;  %v3156_v1 = vadd.f32 1.0, %v3155_v62  ;;  %vm3159_vm3 = vcmp.lt.f32.partialorder %v3158_v3, 0.0004427343 }
0x2673   :  { %v3157_v11 = vmul.f32 %v4354_v61, %v3156_v1 }
0x267e   :  { %v4356_v6 = vpop.eup %4355 }
0x267f   :  { %v3154_v8 = vmul.f32 0.6931472, %v4356_v6 }
0x2681   :  { %v3160_v12 = vsel %vm3159_vm3, %v3157_v11, %v3154_v8 }
0x2682   :  { %v3161_v36 = vadd.f32 %v3160_v12, %v3147_v57 }
0x2684   :  { %v3162_v26 = vadd.f32 0.1, %v3161_v36 }
0x2686   :  { %v3167_v34 = vmul.f32 %v3165_v39, %v3162_v26  ;;  %3171 = vst [vmem:[#allocation24 + $0x1a] sm:$0x3] %v3162_v26 }
0x2688   :  { %v5523_v38 = vadd.f32 %v3167_v34, %v3141_v46 }
0x268a   :  { %v3201_v4 = vpack.c.bf16 %v5523_v38, %v5523_v38 }
0x268c   :  { %3246 = vrot.lane.b32.xlu0 %v3201_v4, %s4711_s16  ;;  %v3196_v4 = vld [vmem:[#allocation4 + $0x7] sm:$0x1] }
0x26fe   :  { %v3247_v49 = vpop.permute.xlu0 %3246 }
0x26ff   :  { %4191 = vmatmul.mubr.msk.bf16.vlgmr.msra.gmra.mxu1 %vm340_vm5, %v3247_v49 }
0x2700   :  { %4203 = vmatpush3.bf16.msra.mxu1 %v5256_v18  ;;  %4206 = vmatprep.mubr.msk.bf16.mxu1 %vm4708_vm0, %v4707_v0 }
0x2701   :  { %4204 = vmatprep.subr.bf16.mxu1 %v4707_v0 }
0x2704   :  { %4205 = vmatpush3.bf16.msra.mxu1 %v5262_v19 }
0x2705   :  { %4218 = vmatprep.subr.bf16.mxu1 %v4707_v0 }
0x2707   :  { %4207 = vmatmul.mubr.msk.bf16.vlgmr.msra.gmra.mxu1 %vm408_vm8, %v5496_v54 }
0x2708   :  { %4219 = vmatpush3.bf16.msra.mxu1 %v5271_v29  ;;  %4222 = vmatprep.mubr.msk.bf16.mxu1 %vm4708_vm0, %v4707_v0 }
0x2709   :  { %4220 = vmatprep.subr.bf16.mxu1 %v4707_v0 }
0x270c   :  { %4221 = vmatpush3.bf16.msra.mxu1 %v5280_v20 }
0x27bf   :  { %v3285_v18 = vpop.f32.mrf.mxu1 }
0x27c0   :  { %v3286_v46 = vadd.f32 %v3285_v18, %v3239_v28 }
0x27c1   :  { %v4192_v24 = vpop.f32.mrf.mxu1 }
0x27c2   :  { %v3291_v50 = vadd.f32 %v5284_v35, %v3286_v46 }
0x27c3   :  { %v3288_v19 = vpop.f32.mrf.mxu1 }
0x27c4   :  { %v3293_v55 = vmin.f32 %v3291_v50, 0.0  ;;  %vm3292_vm11 = vcmp.gt.f32.partialorder %v3291_v50, 0.0 }
0x27c5   :  { %v4193_v10 = vpop.f32.mrf.mxu1 }
0x27c6   :  { %v3294_v16 = vmul.f32 1.442695, %v3293_v55 }
0x27c7   :  { %v3376_v60 = vpop.f32.mrf.mxu1 }
0x27c8   :  { %4357 = vpow2.f32 %v3294_v16  ;;  %v3377_v29 = vadd.f32 %v5287_v44, %v3376_v60 }
0x27c9   :  { %v4208_v54 = vpop.f32.mrf.mxu1 }
0x27ca   :  { %3388 = vrot.lane.b32.xlu1 %v3377_v29, %s4693_s4 }
0x27cb   :  { %v3379_v61 = vpop.f32.mrf.mxu1 }
0x27cd   :  { %v4209_v5 = vpop.f32.mrf.mxu1 }
0x27d5   :  { %v4358_v62 = vpop.eup %4357 }
0x27d6   :  { %v3738_v20 = vadd.f32 -1.0, %v4358_v62 }
0x27d8   :  { %v3297_v1 = vsel %vm3292_vm11, %v3291_v50, %v3738_v20 }
0x27d9   :  { %v3298_v3 = vpack.c.bf16 %v3297_v1, %v3297_v1 }
0x27db   :  { %4199 = vmatmul.mubr.msk.bf16.vlgmr.msra.gmra.mxu0 %vm408_vm8, %v3298_v3 }
0x27dc   :  { %4211 = vmatpush3.bf16.msra.mxu0 %v5292_v58  ;;  %4214 = vmatprep.mubr.msk.bf16.mxu0 %vm4708_vm0, %v4707_v0 }
0x27dd   :  { %4212 = vmatprep.subr.bf16.mxu0 %v4707_v0 }
0x27e0   :  { %4213 = vmatpush3.bf16.msra.mxu0 %v5298_v51 }
0x27e1   :  { %3515 = vmatprep.subr.bf16.mxu0 %v5301_v52 }
0x27e3   :  { %4215 = vmatmul.mubr.msk.bf16.vlgmr.msra.gmra.mxu0 %vm408_vm8, %v3196_v4 }
0x27e4   :  { %3516 = vmatpush1.bf16.msra.mxu0 %v5309_v43  ;;  %3539 = vmatprep.mubr.bf16.mxu0 %v4710_v22 }
0x27e5   :  { %3517 = vmatprep.subr.bf16.mxu0 %v5313_v14 }
0x27e8   :  { %3518 = vmatpush1.bf16.msra.mxu0 %v5316_v25 }
0x27e9   :  { %3519 = vmatprep.subr.bf16.mxu0 %v5320_v15 }
0x27ec   :  { %3520 = vmatpush1.bf16.msra.mxu0 %v5323_v17 }
0x27ed   :  { %3521 = vmatprep.subr.bf16.mxu0 %v5326_v31 }
0x27f0   :  { %3522 = vmatpush1.bf16.msra.mxu0 %v5329_v21 }
0x283c   :  { %v3389_v26 = vpop.permute.xlu1 %3388 }
0x289b   :  { %v3336_v35 = vpop.f32.mrf.mxu0 }
0x289c   :  { %v3337_v44 = vadd.f32 %v5304_v59, %v3336_v35  ;;  %v3200_v59 = vld [vmem:[#allocation7 + $0xe] sm:$0x3] }
0x289d   :  { %v4200_v6 = vpop.f32.mrf.mxu0 }
0x289e   :  { %v3382_v8 = vadd.f32 %v3377_v29, %v3337_v44 }
0x289f   :  { %v3339_v11 = vpop.f32.mrf.mxu0 }
0x28a0   :  { %v3383_v57 = vmul.f32 0.5, %v3382_v8 }
0x28a1   :  { %v4201_v12 = vpop.f32.mrf.mxu0 }
0x28a2   :  { %4359 = vtanh.f32 %v3383_v57 }
0x28af   :  { %v4360_v36 = vpop.eup %4359 }
0x28b0   :  { %v3385_v58 = vadd.f32 1.0, %v4360_v36 }
0x28b2   :  { %v3386_v39 = vmul.f32 0.5, %v3385_v58 }
0x28b4   :  { %v3391_v34 = vmul.f32 %v3389_v26, %v3386_v39 }
0x28b6   :  { %3393 = vrot.lane.b32.xlu0 %v3391_v34, %s4693_s4 }
0x2928   :  { %v3394_v0 = vpop.permute.xlu0 %3393 }
0x2929   :  { %v3396_v51 = vadd.f32 %v3394_v0, %v3337_v44 }
0x292b   :  { %4361 = vtanh.f32 %v3396_v51 }
0x2938   :  { %v4362_v52 = vpop.eup %4361 }
0x2939   :  { %3400 = vrot.lane.b32.xlu1 %v4362_v52, %s4709_s2 }
0x293d   :  { %3565 = vrot.lane.b32.xlu1 %v3200_v59, %s4706_s9  ;;  %s4712_s9 = smov [#allocation24]  }
0x293e   :  { %s3605_s1 = sshll.u32 %s4712_s9, 4  ;;  %s3606_s1 = int_to_ptr.vmem [resolvable:$true] %s3605_s1 }
0x293f   :  { %p4634_p5 = scmp.lt.s32.totalorder %s3606_s1, %s3606_s1 }
0x2941   :  { %772 = vrot.lane.b32.xlu1 %v5012_v32, %s4711_s16  ;;  %v3398_v32 = vsub.f32 1.0, %v3386_v39 }
0x2945   :  { %1172 = vrot.lane.b32.xlu1 %v5088_v53, %s4711_s16  ;;  %v3404_v53 = vmul.f32 %v3386_v39, %v5491_v37 }
0x2949   :  { %1573 = vrot.lane.b32.xlu1 %v5164_v33, %s4711_s16 }
0x294d   :  { %1974 = vrot.lane.b32.xlu1 %v5250_v13, %s4711_s16 }
0x2951   :  { %2375 = vrot.lane.b32.xlu1 %v5371_v63, %s4711_s16 }
0x2955   :  { %2776 = vrot.lane.b32.xlu1 %v5447_v23, %s4711_s16 }
0x2959   :  { %3177 = vrot.lane.b32.xlu1 %v5523_v38, %s4711_s16 }
0x29ab   :  { %v3401_v22 = vpop.permute.xlu1 %3400 }
0x29ac   :  { %v3403_v33 = vmul.f32 %v3401_v22, %v3398_v32 }
0x29ae   :  { %v3405_v13 = vadd.f32 %v3404_v53, %v3403_v33 }
0x29af   :  { %v5596_v14 = vpop.permute.xlu1 %3565 }
0x29b0   :  { %v3406_v43 = vpack.c.bf16 %v3405_v13, %v3405_v13 }
0x29b2   :  { %3451 = vrot.lane.b32.xlu0 %v3406_v43, %s4709_s2 }
0x29b3   :  { %v773_v15 = vpop.permute.xlu1 %772 }
0x29b6   :  { %768 = vrot.lane.b32.xlu0 %v4942_v2, %s4709_s2  ;;  %v3444_v2 = vpop.f32.mrf.mxu0 }
0x29b7   :  { %v1173_v17 = vpop.permute.xlu1 %1172 }
0x29b8   :  { %v1176_v38 = vsel %vm340_vm5, %v1173_v17, 0.0 }
0x29ba   :  { %1168 = vrot.lane.b32.xlu0 %v5056_v41, %s4709_s2  ;;  %v4216_v41 = vpop.f32.mrf.mxu0 }
0x29bb   :  { %v1574_v31 = vpop.permute.xlu1 %1573 }
0x29bc   :  { %v3447_v25 = vpop.f32.mrf.mxu0  ;;  %v1577_v9 = vsel %vm340_vm5, %v1574_v31, 0.0 }
0x29be   :  { %1569 = vrot.lane.b32.xlu0 %v5132_v7, %s4709_s2  ;;  %v4217_v7 = vpop.f32.mrf.mxu0 }
0x29bf   :  { %v1975_v23 = vpop.permute.xlu1 %1974 }
0x29c0   :  { %v1978_v50 = vsel %vm340_vm5, %v1975_v23, 0.0 }
0x29c2   :  { %1970 = vrot.lane.b32.xlu0 %v5208_v27, %s4709_s2 }
0x29c3   :  { %v2376_v18 = vpop.permute.xlu1 %2375 }
0x29c4   :  { %v2379_v60 = vsel %vm340_vm5, %v2376_v18, 0.0 }
0x29c6   :  { %2371 = vrot.lane.b32.xlu0 %v5334_v40, %s4709_s2  ;;  %v776_v40 = vsel %vm340_vm5, %v773_v15, 0.0 }
0x29c7   :  { %v2777_v10 = vpop.permute.xlu1 %2776 }
0x29c8   :  { %v2780_v5 = vsel %vm340_vm5, %v2777_v10, 0.0 }
0x29ca   :  { %2772 = vrot.lane.b32.xlu0 %v5415_v42, %s4709_s2 }
0x29cb   :  { %v3178_v20 = vpop.permute.xlu1 %3177 }
0x29cc   :  { %v3181_v35 = vsel %vm340_vm5, %v3178_v20, 0.0 }
0x29ce   :  { %3173 = vrot.lane.b32.xlu0 %v5491_v37, %s4709_s2 }
0x29d2   :  { %3574 = vrot.lane.b32.xlu0 %v3405_v13, %s4709_s2  ;;  %s4629_s2 = scalar_lea.vmem %s3606_s1, 512 }
0x29d3   :  { %p4630_p4 = scmp.ne.s32.totalorder %s3606_s1, %s4629_s2  ;;  %p4635_p6 = scmp.lt.s32.totalorder %s4629_s2, %s4629_s2 }
0x29d5   :  { %p4636_p7 = por %p4635_p6, %p4634_p5 }
0x29d7   :  { %p4637_p8 = pnand %p4636_p7, %p4630_p4 }
0x2a24   :  { %v3452_v27 = vpop.permute.xlu0 %3451 }
0x2a25   :  { %4223 = vmatmul.mubr.msk.bf16.vlgmr.msra.gmra.mxu1 %vm408_vm8, %v3452_v27 }
0x2a28   :  { %v769_v21 = vpop.permute.xlu0 %768 }
0x2a29   :  { %v775_v63 = vsel %vm408_vm8, %v769_v21, 0.0 }
0x2a2a   :  { %v779_v42 = vcombine.low %v775_v63, %v776_v40 }
0x2a2c   :  { %3668 = vst.sshfl [vmem:[#allocation25] sm:$0x33 pattern:$0x76325410] %v779_v42  ;;  %v1169_v37 = vpop.permute.xlu0 %1168 }
0x2a2d   :  { %v1175_v28 = vsel %vm408_vm8, %v1169_v37, 0.0 }
0x2a2e   :  { %v1179_v30 = vcombine.low %v1175_v28, %v1176_v38 }
0x2a30   :  { %3679 = vst.sshfl [vmem:[#allocation25 + $0x4] sm:$0x33 pattern:$0x76325410] %v1179_v30  ;;  %v1570_v45 = vpop.permute.xlu0 %1569 }
0x2a31   :  { %v1576_v49 = vsel %vm408_vm8, %v1570_v45, 0.0 }
0x2a32   :  { %v1580_v46 = vcombine.low %v1576_v49, %v1577_v9 }
0x2a34   :  { %3690 = vst.sshfl [vmem:[#allocation25 + $0x8] sm:$0x33 pattern:$0x76325410] %v1580_v46  ;;  %v1971_v24 = vpop.permute.xlu0 %1970 }
0x2a35   :  { %v1977_v19 = vsel %vm408_vm8, %v1971_v24, 0.0 }
0x2a36   :  { %v1981_v55 = vcombine.low %v1977_v19, %v1978_v50 }
0x2a38   :  { %3701 = vst.sshfl [vmem:[#allocation25 + $0xc] sm:$0x33 pattern:$0x76325410] %v1981_v55  ;;  %v2372_v16 = vpop.permute.xlu0 %2371 }
0x2a39   :  { %v2378_v29 = vsel %vm408_vm8, %v2372_v16, 0.0 }
0x2a3a   :  { %v2382_v54 = vcombine.low %v2378_v29, %v2379_v60 }
0x2a3c   :  { %3712 = vst.sshfl [vmem:[#allocation25 + $0x10] sm:$0x33 pattern:$0x76325410] %v2382_v54  ;;  %v2773_v61 = vpop.permute.xlu0 %2772 }
0x2a3d   :  { %v2779_v62 = vsel %vm408_vm8, %v2773_v61, 0.0 }
0x2a3e   :  { %v2783_v1 = vcombine.low %v2779_v62, %v2780_v5 }
0x2a40   :  { %3723 = vst.sshfl [vmem:[#allocation25 + $0x14] sm:$0x33 pattern:$0x76325410] %v2783_v1  ;;  %v3174_v3 = vpop.permute.xlu0 %3173 }
0x2a41   :  { %v3180_v44 = vsel %vm408_vm8, %v3174_v3, 0.0 }
0x2a42   :  { %v3184_v6 = vcombine.low %v3180_v44, %v3181_v35 }
0x2a44   :  { %3734 = vst.sshfl [vmem:[#allocation25 + $0x18] sm:$0x33 pattern:$0x76325410] %v3184_v6  ;;  %v3575_v8 = vpop.permute.xlu0 %3574 }
0x2a45   :  { %3599 = vst.msk [vmem:[#allocation3] sm:$0x3] %vm218_vm6, %v3575_v8 }
0x2ae5   :  { %v3490_v11 = vpop.f32.mrf.mxu1 }
0x2ae6   :  { %v3491_v57 = vadd.f32 %v3490_v11, %v3444_v2 }
0x2ae7   :  { %v4224_v12 = vpop.f32.mrf.mxu1 }
0x2ae8   :  { %v3496_v36 = vadd.f32 %v5351_v56, %v3491_v57 }
0x2ae9   :  { %v3493_v58 = vpop.f32.mrf.mxu1 }
0x2aea   :  { %v3498_v39 = vmin.f32 %v3496_v36, 0.0  ;;  %vm3497_vm0 = vcmp.gt.f32.partialorder %v3496_v36, 0.0 }
0x2aeb   :  { %v4225_v26 = vpop.f32.mrf.mxu1 }
0x2aec   :  { %v3499_v34 = vmul.f32 1.442695, %v3498_v39 }
0x2aee   :  { %4363 = vpow2.f32 %v3499_v34 }
0x2afb   :  { %v4364_v0 = vpop.eup %4363 }
0x2afc   :  { %v3743_v51 = vadd.f32 -1.0, %v4364_v0 }
0x2afe   :  { %v3502_v52 = vsel %vm3497_vm0, %v3496_v36, %v3743_v51 }
0x2aff   :  { %v3503_v59 = vpack.c.bf16 %v3502_v52, %v3502_v52 }
0x2b01   :  { %3744 = vmatmul.mubr.msk.bf16.vlgmr.msra.gmra.mxu0 %vm698_vm10, %v3503_v59 }
0x2bc1   :  { %v3541_v4 = vpop.f32.mrf.mxu0 }
0x2bc2   :  { %v3542_v32 = vadd.f32 %v3541_v4, %v5006_v47 }
0x2bc3   :  { %v3543_v22 = vpop.f32.mrf.mxu0 }
0x2bc4   :  { %3571 = vst [vmem:[#allocation24 + $0x1c] sm:$0x3] %v3542_v32  ;;  %v3544_v53 = vadd.f32 %v3543_v22, %v5008_v48 }
0x2bc5   :  { %v3545_v56 = vpop.f32.mrf.mxu0 }
0x2bc6   :  { %v3549_v33 = vand.u32 2147483647, %v3544_v53  ;;  %v3548_v47 = vmax.f32 %v3544_v53, 0.0 }
0x2bc7   :  { %v3546_v13 = vpop.f32.mrf.mxu0 }
0x2bc8   :  { %v3550_v43 = vsub.f32 0.0, %v3549_v33 }
0x2bca   :  { %v3551_v2 = vmul.f32 1.442695, %v3550_v43 }
0x2bcc   :  { %4365 = vpow2.f32 %v3551_v2 }
0x2bd9   :  { %v4366_v41 = vpop.eup %4365 }
0x2bda   :  { %v3553_v25 = vadd.f32 1.0, %v4366_v41  ;;  %v3556_v7 = vmul.f32 -0.5, %v4366_v41  ;;  %v3559_v17 = vand.u32 2147483647, %v4366_v41 }
0x2bdc   :  { %4367 = vlog2.f32 %v3553_v25  ;;  %v3557_v15 = vadd.f32 1.0, %v3556_v7  ;;  %vm3560_vm6 = vcmp.lt.f32.partialorder %v3559_v17, 0.0004427343 }
0x2bde   :  { %v3558_v21 = vmul.f32 %v4366_v41, %v3557_v15 }
0x2be9   :  { %v4368_v27 = vpop.eup %4367 }
0x2bea   :  { %v3555_v31 = vmul.f32 0.6931472, %v4368_v27 }
0x2bec   :  { %v3561_v40 = vsel %vm3560_vm6, %v3558_v21, %v3555_v31 }
0x2bed   :  { %v3562_v48 = vadd.f32 %v3561_v40, %v3548_v47 }
0x2bef   :  { %v3563_v63 = vadd.f32 0.1, %v3562_v48 }
0x2bf1   :  { %3572 = vst [vmem:[#allocation24 + $0x1e] sm:$0x3] %v3563_v63  ;;  %v3568_v42 = vmul.f32 %v5596_v14, %v3563_v63 }
0x2bf2   :  { %4640 = shalt.err (!%p4637_p8)
}
0x2bf3   :  { %3611 = dma.vmem_to_hbm [thread:$0]  %s3606_s1, 512, %s5652_s17, [#allocation6], %s4693_s4, %s4693_s4, %s4694_s20   ;;  %v3569_v23 = vadd.f32 %v3568_v42, %v3542_v32  ;;  %v3581_v37 = vsel %vm408_vm8, %v3575_v8, 0.0 }
0x2bf4   :  { %s4713_s29 = smov [#allocation25]  }
0x2bf5   :  { %3578 = vrot.lane.b32.xlu1 %v3569_v23, %s4711_s16  ;;  %s3617_s0 = sshll.u32 %s4713_s29, 4  ;;  %s3618_s0 = int_to_ptr.vmem [resolvable:$true] %s3617_s0 }
0x2bf6   :  { %s4649_s19 = scalar_lea.vmem %s3618_s0, 512  ;;  %p4654_p10 = scmp.lt.s32.totalorder %s3618_s0, %s3618_s0 }
0x2bf7   :  { %p4650_p9 = scmp.ne.s32.totalorder %s3618_s0, %s4649_s19  ;;  %p4655_p11 = scmp.lt.s32.totalorder %s4649_s19, %s4649_s19 }
0x2bf9   :  { %p4656_p12 = por %p4655_p11, %p4654_p10 }
0x2bfb   :  { %p4657_p13 = pnand %p4656_p12, %p4650_p9 }
0x2c67   :  { %v3579_v14 = vpop.permute.xlu1 %3578 }
0x2c68   :  { %v3582_v38 = vsel %vm340_vm5, %v3579_v14, 0.0  ;;  %3597 = vst.msk [vmem:[#allocation2] sm:$0x3] %vm215_vm4, %v3579_v14 }
0x2c69   :  { %v3585_v28 = vcombine.low %v3581_v37, %v3582_v38 }
0x2c6b   :  { %3745 = vst.sshfl [vmem:[#allocation25 + $0x1c] sm:$0x33 pattern:$0x76325410] %v3585_v28 }
0x2c6c   :  { %4660 = shalt.err (!%p4657_p13)
}
0x2c6d   :  { %3623 = dma.vmem_to_hbm [thread:$0]  %s3618_s0, 512, %s5653_s18, [#allocation26], %s4693_s4, %s4693_s4, %s4694_s20  }
0x2c6e   :  { %4683 = dma.done.wait [#allocation6], 512  }
0x2c6f   :  { %4684 = vsyncadd [#allocation6], 4294966784 }
0x2c70   :  { %4685 = dma.done.wait [#allocation26], 512  }
0x2c71   :  { %4686 = vsyncadd [#allocation26], 4294966784 }
0x2c72   :  { %3630 = vsyncpa [#allocation5], 1 }
0x2c73   :  { %3631 = vsyncpa [#allocation8], 1 }
0x2c74   :  { %3632 = vsyncpa [#allocation11], 1 }
0x2c75   :  { %3633 = vsyncpa [#allocation14], 1 }
0x2c76   :  { %3634 = vsyncpa [#allocation17], 1 }
0x2c77   :  { %3635 = vsyncpa [#allocation20], 1 }
0x2c78   :  { %3636 = vsyncpa [#allocation23], 1 }
0x2c79   :  { %3637 = vsyncpa [#allocation6], 1 }
0x2c7a   :  { %3638 = vsyncpa [#allocation26], 1 }

</bundles_post_ra>
